<compile_context>
chip_gen: v7x
topology: tpu7x:2x2x1
jax: 0.10.0
libtpu: 0.0.40
codegen_flags: <defaults>
</compile_context>

<pallas_src>
import jax
import jax.numpy as jnp
from jax import lax
from jax.experimental import pallas as pl
from jax.experimental.pallas import tpu as pltpu

EPS = 1e-5
_PREC = lax.Precision.HIGHEST
_TILE_BYTES_CAP = 4 * 1024 * 1024          # target per (C, T) f32 tile


def _vmem_limit_bytes():
    """~65% of this generation's physical VMEM (v7x 64 MiB, v5e/v6e 128 MiB)."""
    cap = None
    try:
        cap = getattr(pltpu.get_tpu_info(), "vmem_capacity_bytes", None)
    except Exception:
        cap = None
    if not cap:
        cap = 64 * 1024 * 1024             # conservative fallback (v7x per-TC)
    return int(cap * 0.65)


# ----------------------------------------------------------------------------
# Shared bottleneck math (column-oriented: channels on sublanes).
#   context: (C, 1)  ->  (sigmoid(channel_mul) (C,1), channel_add (C,1))
# ----------------------------------------------------------------------------
def _bottleneck(context, w1s_ref, lnp_ref, w2s_ref, b2s_ref):
    two_p = w1s_ref.shape[0]
    p_half = two_p // 2

    # stacked 1x1 convs: (2P, C) @ (C, 1); rows [0:P)=add branch, [P:2P)=mul
    h = jnp.dot(w1s_ref[...], context, precision=_PREC,
                preferred_element_type=jnp.float32) + lnp_ref[:, 0:1]

    def ln_relu(v, gamma, beta):           # LayerNorm over the P sublanes + ReLU
        mu = jnp.mean(v, axis=0, keepdims=True)
        var = jnp.mean((v - mu) ** 2, axis=0, keepdims=True)
        return jnp.maximum((v - mu) * lax.rsqrt(var + EPS) * gamma + beta, 0.0)

    ha = ln_relu(h[:p_half], lnp_ref[:p_half, 1:2], lnp_ref[:p_half, 2:3])
    hm = ln_relu(h[p_half:], lnp_ref[p_half:, 1:2], lnp_ref[p_half:, 2:3])

    add_t = jnp.dot(w2s_ref[0], ha, precision=_PREC,
                    preferred_element_type=jnp.float32) + b2s_ref[:, 0:1]
    mul_t = jax.nn.sigmoid(
        jnp.dot(w2s_ref[1], hm, precision=_PREC,
                preferred_element_type=jnp.float32) + b2s_ref[:, 1:2])
    return mul_t, add_t


# ----------------------------------------------------------------------------
# Fast path: whole (C, HW) slab resident in VMEM -> one read of x, fully fused.
# ----------------------------------------------------------------------------
def gc_fused_kernel(x_ref, wm_ref, bm_ref, w1s_ref, lnp_ref, w2s_ref, b2s_ref,
                    o_ref):
    x = x_ref[0]                                              # (C, HW)
    logits = jnp.dot(wm_ref[...], x, precision=_PREC,
                     preferred_element_type=jnp.float32) + bm_ref[0, 0]
    m = jnp.max(logits, axis=-1, keepdims=True)
    p = jnp.exp(logits - m)                                   # (1, HW)
    denom = jnp.sum(p, axis=-1, keepdims=True)
    context = lax.dot_general(x, p, (((1,), (1,)), ((), ())), precision=_PREC,
                              preferred_element_type=jnp.float32) / denom
    mul_t, add_t = _bottleneck(context, w1s_ref, lnp_ref, w2s_ref, b2s_ref)
    o_ref[0] = x * mul_t + add_t


# ----------------------------------------------------------------------------
# Tiled path, pass 1: attention pooling via online softmax over HW tiles.
# Emits the per-batch pooled context as a (C, 1) column.
# ----------------------------------------------------------------------------
def pool_kernel(x_ref, wm_ref, bm_ref, ctx_ref, m_sc, l_sc, acc_sc):
    t = pl.program_id(1)

    @pl.when(t == 0)
    def _init():
        m_sc[...] = jnp.full_like(m_sc, -jnp.inf)
        l_sc[...] = jnp.zeros_like(l_sc)
        acc_sc[...] = jnp.zeros_like(acc_sc)

    x = x_ref[0]                                              # (C, T)
    logits = jnp.dot(wm_ref[...], x, precision=_PREC,
                     preferred_element_type=jnp.float32) + bm_ref[0, 0]  # (1, T)

    m_prev = m_sc[...]
    m_new = jnp.maximum(m_prev, jnp.max(logits, axis=-1, keepdims=True))
    corr = jnp.exp(m_prev - m_new)
    p = jnp.exp(logits - m_new)                               # (1, T)
    l_sc[...] = corr * l_sc[...] + jnp.sum(p, axis=-1, keepdims=True)
    acc_sc[...] = corr * acc_sc[...] + lax.dot_general(
        x, p, (((1,), (1,)), ((), ())), precision=_PREC,
        preferred_element_type=jnp.float32)                   # (C, 1)
    m_sc[...] = m_new

    @pl.when(t == pl.num_programs(1) - 1)
    def _finalize():
        ctx_ref[0] = acc_sc[...] / l_sc[...]                  # single division


# ----------------------------------------------------------------------------
# Tiled path, pass 1.5: tiny bottleneck kernel (weights touched only here).
# ----------------------------------------------------------------------------
def bottleneck_kernel(ctx_ref, w1s_ref, lnp_ref, w2s_ref, b2s_ref, o_ref):
    mul_t, add_t = _bottleneck(ctx_ref[0], w1s_ref, lnp_ref, w2s_ref, b2s_ref)
    o_ref[0, :, 0:1] = mul_t                                  # channel_mul term
    o_ref[0, :, 1:2] = add_t                                  # channel_add term


# ----------------------------------------------------------------------------
# Tiled path, pass 2: lane-dense broadcast fuse  out = x * mul + add.
# ----------------------------------------------------------------------------
def fuse_kernel(x_ref, ma_ref, o_ref):
    o_ref[0] = x_ref[0] * ma_ref[0, :, 0:1] + ma_ref[0, :, 1:2]


# ----------------------------------------------------------------------------
# Wrapper
# ----------------------------------------------------------------------------
def _choose_hw_tile(hw, c, cap_bytes):
    """Largest multiple-of-128 divisor of HW whose (C, T) f32 tile <= cap."""
    if hw % 128 != 0 or hw <= 128:
        # TODO(synk): pad HW to a 128-multiple with a masked tail instead of a
        # single full tile for very large awkward HW.
        return hw
    t = min(hw, max(128, (cap_bytes // (c * 4)) // 128 * 128))
    while hw % t != 0:
        t -= 128
    return t


def _pack_params(params):
    (wm, bm, wa1, ba1, ga, bta, wa2, ba2,
     wu1, bu1, gu, btu, wu2, bu2) = params
    w1s = jnp.concatenate([wa1, wu1], axis=0)                           # (2P, C)
    lnp = jnp.stack([jnp.concatenate([ba1[:, 0], bu1[:, 0]]),           # bias1
                     jnp.concatenate([ga[:, 0], gu[:, 0]]),             # gamma
                     jnp.concatenate([bta[:, 0], btu[:, 0]])], axis=1)  # (2P, 3)
    w2s = jnp.stack([wa2, wu2], axis=0)                                 # (2, C, P)
    b2s = jnp.stack([ba2[:, 0], bu2[:, 0]], axis=1)                     # (C, 2)
    return wm, bm, w1s, lnp, w2s, b2s


def _full(shape):
    return pl.BlockSpec(shape, lambda *_: (0,) * len(shape))


def gc_block(x_nchw, params, *, block_hw=None, force_tiled=False):
    N, C, H, W = x_nchw.shape
    HW = H * W
    x = x_nchw.reshape(N, C, HW)              # free reshape: NCHW layout kept
    wm, bm, w1s, lnp, w2s, b2s = _pack_params(params)

    vmem_limit = _vmem_limit_bytes()
    cparams = lambda sem: pltpu.CompilerParams(
        dimension_semantics=sem, vmem_limit_bytes=vmem_limit)

    slab_bytes = C * HW * 4
    param_bytes = sum(int(w.size) * 4 for w in (wm, bm, w1s, lnp, w2s, b2s))
    fast_fits = 4 * slab_bytes + 2 * param_bytes + (2 << 20) <= vmem_limit

    if fast_fits and not force_tiled and block_hw is None:
        # ---- single-read fused path -----------------------------------
        y = pl.pallas_call(
            gc_fused_kernel,
            out_shape=jax.ShapeDtypeStruct((N, C, HW), jnp.float32),
            grid_spec=pltpu.PrefetchScalarGridSpec(
                num_scalar_prefetch=0,
                grid=(N,),
                in_specs=[pl.BlockSpec((1, C, HW), lambda n: (n, 0, 0)),
                          _full(wm.shape), _full(bm.shape), _full(w1s.shape),
                          _full(lnp.shape), _full(w2s.shape), _full(b2s.shape)],
                out_specs=pl.BlockSpec((1, C, HW), lambda n: (n, 0, 0)),
            ),
            compiler_params=cparams(("parallel",)),
        )(x, wm, bm, w1s, lnp, w2s, b2s)
        return y.reshape(N, C, H, W)

    # ---- tiled path ----------------------------------------------------
    T = (_choose_hw_tile(HW, C, min(_TILE_BYTES_CAP, vmem_limit // 10))
         if block_hw is None else block_hw)
    assert HW % T == 0 and (T == HW or T % 128 == 0), "bad HW tile"
    num_t = HW // T

    # pass 1: pooled context (N, C, 1) -- no bottleneck weights resident
    ctx = pl.pallas_call(
        pool_kernel,
        out_shape=jax.ShapeDtypeStruct((N, C, 1), jnp.float32),
        grid_spec=pltpu.PrefetchScalarGridSpec(
            num_scalar_prefetch=0,
            grid=(N, num_t),
            in_specs=[pl.BlockSpec((1, C, T), lambda n, t: (n, 0, t)),
                      _full(wm.shape), _full(bm.shape)],
            out_specs=pl.BlockSpec((1, C, 1), lambda n, t: (n, 0, 0)),
            scratch_shapes=[pltpu.VMEM((1, 1), jnp.float32),   # running max m
                            pltpu.VMEM((1, 1), jnp.float32),   # running sum l
                            pltpu.VMEM((C, 1), jnp.float32)],  # context acc
        ),
        compiler_params=cparams(("parallel", "arbitrary")),
    )(x, wm, bm)

    # pass 1.5: tiny bottleneck kernel -> (N, C, 2) = [mul, add] columns
    ma = pl.pallas_call(
        bottleneck_kernel,
        out_shape=jax.ShapeDtypeStruct((N, C, 2), jnp.float32),
        grid_spec=pltpu.PrefetchScalarGridSpec(
            num_scalar_prefetch=0,
            grid=(N,),
            in_specs=[pl.BlockSpec((1, C, 1), lambda n: (n, 0, 0)),
                      _full(w1s.shape), _full(lnp.shape),
                      _full(w2s.shape), _full(b2s.shape)],
            out_specs=pl.BlockSpec((1, C, 2), lambda n: (n, 0, 0)),
        ),
        compiler_params=cparams(("parallel",)),
    )(ctx, w1s, lnp, w2s, b2s)

    # pass 2: fully parallel broadcast fuse, lane-dense stores
    y = pl.pallas_call(
        fuse_kernel,
        out_shape=jax.ShapeDtypeStruct((N, C, HW), jnp.float32),
        grid_spec=pltpu.PrefetchScalarGridSpec(
            num_scalar_prefetch=0,
            grid=(N, num_t),
            in_specs=[pl.BlockSpec((1, C, T), lambda n, t: (n, 0, t)),
                      pl.BlockSpec((1, C, 2), lambda n, t: (n, 0, 0))],
            out_specs=pl.BlockSpec((1, C, T), lambda n, t: (n, 0, t)),
        ),
        compiler_params=cparams(("parallel", "parallel")),
    )(x, ma)

    return y.reshape(N, C, H, W)


# ----------------------------------------------------------------------------
# Parameters (PyTorch module shapes) + pure-JAX reference for validation
# ----------------------------------------------------------------------------
def make_params(key, C, P):
    ks = jax.random.split(key, 14)
    f = lambda k, shape, s=0.1: jax.random.normal(k, shape, jnp.float32) * s
    wm = f(ks[0], (1, C))                      # conv_mask weight (1,C,1,1)
    bm = f(ks[1], (1, 1))                      # conv_mask bias
    wa1, ba1 = f(ks[2], (P, C)), f(ks[3], (P, 1))
    ga, bta = 1.0 + f(ks[4], (P, 1), 0.2), f(ks[5], (P, 1), 0.2)
    wa2, ba2 = f(ks[6], (C, P)), f(ks[7], (C, 1))
    wu1, bu1 = f(ks[8], (P, C)), f(ks[9], (P, 1))
    gu, btu = 1.0 + f(ks[10], (P, 1), 0.2), f(ks[11], (P, 1), 0.2)
    wu2, bu2 = f(ks[12], (C, P)), f(ks[13], (C, 1))
    return [wm, bm, wa1, ba1, ga, bta, wa2, ba2, wu1, bu1, gu, btu, wu2, bu2]


def gc_block_ref(x_nchw, params):
    (wm, bm, wa1, ba1, ga, bta, wa2, ba2,
     wu1, bu1, gu, btu, wu2, bu2) = params
    N, C, H, W = x_nchw.shape
    x = x_nchw.reshape(N, C, H * W)
    logits = jnp.einsum('oc,ncs->nos', wm, x, precision=_PREC) + bm[0, 0]
    attn = jax.nn.softmax(logits, axis=-1)
    context = jnp.einsum('ncs,nos->nc', x, attn, precision=_PREC)[:, :, None]

    def bottleneck(ctx, w1, b1, g, bt, w2, b2):
        h = jnp.einsum('pc,nci->npi', w1, ctx, precision=_PREC) + b1
        mu = jnp.mean(h, axis=(1, 2), keepdims=True)
        var = jnp.mean((h - mu) ** 2, axis=(1, 2), keepdims=True)
        h = (h - mu) / jnp.sqrt(var + EPS) * g + bt
        h = jnp.maximum(h, 0.0)
        return jnp.einsum('cp,npi->nci', w2, h, precision=_PREC) + b2

    mul_term = jax.nn.sigmoid(bottleneck(context, wu1, bu1, gu, btu, wu2, bu2))
    add_term = bottleneck(context, wa1, ba1, ga, bta, wa2, ba2)
    return (x * mul_term + add_term).reshape(N, C, H, W)


if __name__ == "__main__":
    N, C, H, W = 2, 128, 16, 16          # small but lane/sublane friendly
    reduction = 4
    P = C // reduction

    key = jax.random.PRNGKey(0)
    kx, kp = jax.random.split(key)
    x = jax.random.normal(kx, (N, C, H, W), jnp.float32)
    params = make_params(kp, C, P)

    ref = gc_block_ref(x, params)

    # fused single-read path (whole (C,HW) slab resident in VMEM)
    out_fast = jax.block_until_ready(gc_block(x, params))
    # tiled three-kernel path (online softmax over 128-wide HW tiles)
    out_tiled = jax.block_until_ready(gc_block(x, params, block_hw=128))

    assert out_fast.shape == (N, C, H, W)
    assert jnp.allclose(out_fast, ref, atol=2e-4, rtol=2e-4), "fast path mismatch"
    assert jnp.allclose(out_tiled, ref, atol=2e-4, rtol=2e-4), "tiled path mismatch"
    print("KERNEL_OK")
</pallas_src>

<mosaic_0001>
module attributes {stable_mosaic.version = 11 : i64} {
  func.func @gc_fused_kernel(%arg0: i32, %arg1: memref<1x128x256xf32, #tpu.memory_space<vmem>>, %arg2: memref<1x128xf32, #tpu.memory_space<vmem>>, %arg3: memref<1x1xf32, #tpu.memory_space<vmem>>, %arg4: memref<64x128xf32, #tpu.memory_space<vmem>>, %arg5: memref<64x3xf32, #tpu.memory_space<vmem>>, %arg6: memref<2x128x32xf32, #tpu.memory_space<vmem>>, %arg7: memref<128x2xf32, #tpu.memory_space<vmem>>, %arg8: memref<1x128x256xf32, #tpu.memory_space<vmem>>) attributes {dimension_semantics = [#tpu.dimension_semantics<parallel>], iteration_bounds = array<i64: 2>, scalar_prefetch = 0 : i64, scratch_operands = 0 : i64, tpu.core_type = #tpu.core_type<tc>, window_params = [{transform_indices = @transform_0, window_bounds = array<i64: 1, 128, 256>}, {pipeline_mode = #tpu.pipeline_mode<synchronous>, transform_indices = @transform_1, window_bounds = array<i64: 1, 128>}, {pipeline_mode = #tpu.pipeline_mode<synchronous>, transform_indices = @transform_2, window_bounds = array<i64: 1, 1>}, {pipeline_mode = #tpu.pipeline_mode<synchronous>, transform_indices = @transform_3, window_bounds = array<i64: 64, 128>}, {pipeline_mode = #tpu.pipeline_mode<synchronous>, transform_indices = @transform_4, window_bounds = array<i64: 64, 3>}, {pipeline_mode = #tpu.pipeline_mode<synchronous>, transform_indices = @transform_5, window_bounds = array<i64: 2, 128, 32>}, {pipeline_mode = #tpu.pipeline_mode<synchronous>, transform_indices = @transform_6, window_bounds = array<i64: 128, 2>}, {transform_indices = @transform_7, window_bounds = array<i64: 1, 128, 256>}]} {
    %c0 = arith.constant 0 : index
    %c0_0 = arith.constant 0 : index
    %c0_1 = arith.constant 0 : index
    %0 = vector.load %arg1[%c0, %c0_0, %c0_1] : memref<1x128x256xf32, #tpu.memory_space<vmem>>, vector<1x128x256xf32>
    %1 = vector.shape_cast %0 : vector<1x128x256xf32> to vector<128x256xf32>
    %c0_2 = arith.constant 0 : index
    %c0_3 = arith.constant 0 : index
    %2 = vector.load %arg2[%c0_2, %c0_3] : memref<1x128xf32, #tpu.memory_space<vmem>>, vector<1x128xf32>
    %cst = arith.constant dense<0.000000e+00> : vector<1x256xf32>
    %3 = tpu.matmul %2, %1, %cst {dimension_numbers = #tpu.dot_dimension_numbers<[1], [0], [0], [1], [0, 0, 1, 1], [], []>, precision = #tpu.contract_precision<fp32>} : vector<1x128xf32>, vector<128x256xf32>, vector<1x256xf32> -> vector<1x256xf32>
    %c0_4 = arith.constant 0 : index
    %c0_5 = arith.constant 0 : index
    %4 = vector.load %arg3[%c0_4, %c0_5] : memref<1x1xf32, #tpu.memory_space<vmem>>, vector<1x1xf32>
    %5 = vector.extract %4[0, 0] : f32 from vector<1x1xf32>
    %6 = vector.broadcast %5 : f32 to vector<1x256xf32>
    %7 = arith.addf %3, %6 : vector<1x256xf32>
    %cst_6 = arith.constant dense<0xFF800000> : vector<1xf32>
    %8 = vector.multi_reduction <maximumf>, %7, %cst_6 [1] : vector<1x256xf32> to vector<1xf32>
    %9 = vector.shape_cast %8 : vector<1xf32> to vector<1x1xf32>
    %10 = vector.broadcast %9 : vector<1x1xf32> to vector<1x256xf32>
    %11 = arith.subf %7, %10 : vector<1x256xf32>
    %12 = math.exp %11 : vector<1x256xf32>
    %cst_7 = arith.constant dense<0.000000e+00> : vector<1xf32>
    %13 = vector.multi_reduction <add>, %12, %cst_7 [1] : vector<1x256xf32> to vector<1xf32>
    %14 = vector.shape_cast %13 : vector<1xf32> to vector<1x1xf32>
    %cst_8 = arith.constant dense<0.000000e+00> : vector<128x1xf32>
    %15 = tpu.matmul %1, %12, %cst_8 {dimension_numbers = #tpu.dot_dimension_numbers<[1], [1], [0], [0], [0, 0, 1, 0], [], []>, precision = #tpu.contract_precision<fp32>} : vector<128x256xf32>, vector<1x256xf32>, vector<128x1xf32> -> vector<128x1xf32>
    %16 = vector.broadcast %14 : vector<1x1xf32> to vector<128x1xf32>
    %17 = arith.divf %15, %16 : vector<128x1xf32>
    %c0_9 = arith.constant 0 : index
    %c0_10 = arith.constant 0 : index
    %18 = vector.load %arg4[%c0_9, %c0_10] : memref<64x128xf32, #tpu.memory_space<vmem>>, vector<64x128xf32>
    %cst_11 = arith.constant dense<0.000000e+00> : vector<64x1xf32>
    %19 = tpu.matmul %18, %17, %cst_11 {dimension_numbers = #tpu.dot_dimension_numbers<[1], [0], [0], [1], [0, 0, 1, 1], [], []>, precision = #tpu.contract_precision<fp32>} : vector<64x128xf32>, vector<128x1xf32>, vector<64x1xf32> -> vector<64x1xf32>
    %c0_12 = arith.constant 0 : index
    %c0_13 = arith.constant 0 : index
    %20 = vector.load %arg5[%c0_12, %c0_13] : memref<64x3xf32, #tpu.memory_space<vmem>>, vector<64x1xf32>
    %21 = arith.addf %19, %20 : vector<64x1xf32>
    %22 = vector.extract_strided_slice %21 {offsets = [0, 0], sizes = [32, 1], strides = [1, 1]} : vector<64x1xf32> to vector<32x1xf32>
    %c0_14 = arith.constant 0 : index
    %c1 = arith.constant 1 : index
    %23 = vector.load %arg5[%c0_14, %c1] : memref<64x3xf32, #tpu.memory_space<vmem>>, vector<32x1xf32>
    %c0_15 = arith.constant 0 : index
    %c2 = arith.constant 2 : index
    %24 = vector.load %arg5[%c0_15, %c2] : memref<64x3xf32, #tpu.memory_space<vmem>>, vector<32x1xf32>
    %cst_16 = arith.constant dense<0.000000e+00> : vector<1xf32>
    %25 = vector.multi_reduction <add>, %22, %cst_16 [0] : vector<32x1xf32> to vector<1xf32>
    %26 = vector.shape_cast %25 : vector<1xf32> to vector<1x1xf32>
    %cst_17 = arith.constant 3.200000e+01 : f32
    %27 = vector.broadcast %cst_17 : f32 to vector<1x1xf32>
    %28 = arith.divf %26, %27 : vector<1x1xf32>
    %29 = vector.broadcast %28 : vector<1x1xf32> to vector<32x1xf32>
    %30 = arith.subf %22, %29 : vector<32x1xf32>
    %31 = arith.mulf %30, %30 : vector<32x1xf32>
    %cst_18 = arith.constant dense<0.000000e+00> : vector<1xf32>
    %32 = vector.multi_reduction <add>, %31, %cst_18 [0] : vector<32x1xf32> to vector<1xf32>
    %33 = vector.shape_cast %32 : vector<1xf32> to vector<1x1xf32>
    %cst_19 = arith.constant 3.200000e+01 : f32
    %34 = vector.broadcast %cst_19 : f32 to vector<1x1xf32>
    %35 = arith.divf %33, %34 : vector<1x1xf32>
    %36 = vector.broadcast %28 : vector<1x1xf32> to vector<32x1xf32>
    %37 = arith.subf %22, %36 : vector<32x1xf32>
    %cst_20 = arith.constant 9.99999974E-6 : f32
    %38 = vector.broadcast %cst_20 : f32 to vector<1x1xf32>
    %39 = arith.addf %35, %38 : vector<1x1xf32>
    %40 = math.rsqrt %39 : vector<1x1xf32>
    %41 = vector.broadcast %40 : vector<1x1xf32> to vector<32x1xf32>
    %42 = arith.mulf %37, %41 : vector<32x1xf32>
    %43 = arith.mulf %42, %23 : vector<32x1xf32>
    %44 = arith.addf %43, %24 : vector<32x1xf32>
    %cst_21 = arith.constant 0.000000e+00 : f32
    %45 = vector.broadcast %cst_21 : f32 to vector<32x1xf32>
    %46 = arith.maximumf %44, %45 : vector<32x1xf32>
    %47 = vector.extract_strided_slice %21 {offsets = [32, 0], sizes = [32, 1], strides = [1, 1]} : vector<64x1xf32> to vector<32x1xf32>
    %c32 = arith.constant 32 : index
    %c1_22 = arith.constant 1 : index
    %48 = vector.load %arg5[%c32, %c1_22] : memref<64x3xf32, #tpu.memory_space<vmem>>, vector<32x1xf32>
    %c32_23 = arith.constant 32 : index
    %c2_24 = arith.constant 2 : index
    %49 = vector.load %arg5[%c32_23, %c2_24] : memref<64x3xf32, #tpu.memory_space<vmem>>, vector<32x1xf32>
    %cst_25 = arith.constant dense<0.000000e+00> : vector<1xf32>
    %50 = vector.multi_reduction <add>, %47, %cst_25 [0] : vector<32x1xf32> to vector<1xf32>
    %51 = vector.shape_cast %50 : vector<1xf32> to vector<1x1xf32>
    %cst_26 = arith.constant 3.200000e+01 : f32
    %52 = vector.broadcast %cst_26 : f32 to vector<1x1xf32>
    %53 = arith.divf %51, %52 : vector<1x1xf32>
    %54 = vector.broadcast %53 : vector<1x1xf32> to vector<32x1xf32>
    %55 = arith.subf %47, %54 : vector<32x1xf32>
    %56 = arith.mulf %55, %55 : vector<32x1xf32>
    %cst_27 = arith.constant dense<0.000000e+00> : vector<1xf32>
    %57 = vector.multi_reduction <add>, %56, %cst_27 [0] : vector<32x1xf32> to vector<1xf32>
    %58 = vector.shape_cast %57 : vector<1xf32> to vector<1x1xf32>
    %cst_28 = arith.constant 3.200000e+01 : f32
    %59 = vector.broadcast %cst_28 : f32 to vector<1x1xf32>
    %60 = arith.divf %58, %59 : vector<1x1xf32>
    %61 = vector.broadcast %53 : vector<1x1xf32> to vector<32x1xf32>
    %62 = arith.subf %47, %61 : vector<32x1xf32>
    %cst_29 = arith.constant 9.99999974E-6 : f32
    %63 = vector.broadcast %cst_29 : f32 to vector<1x1xf32>
    %64 = arith.addf %60, %63 : vector<1x1xf32>
    %65 = math.rsqrt %64 : vector<1x1xf32>
    %66 = vector.broadcast %65 : vector<1x1xf32> to vector<32x1xf32>
    %67 = arith.mulf %62, %66 : vector<32x1xf32>
    %68 = arith.mulf %67, %48 : vector<32x1xf32>
    %69 = arith.addf %68, %49 : vector<32x1xf32>
    %cst_30 = arith.constant 0.000000e+00 : f32
    %70 = vector.broadcast %cst_30 : f32 to vector<32x1xf32>
    %71 = arith.maximumf %69, %70 : vector<32x1xf32>
    %c0_31 = arith.constant 0 : index
    %c0_32 = arith.constant 0 : index
    %c0_33 = arith.constant 0 : index
    %72 = vector.load %arg6[%c0_31, %c0_32, %c0_33] : memref<2x128x32xf32, #tpu.memory_space<vmem>>, vector<1x128x32xf32>
    %73 = vector.shape_cast %72 : vector<1x128x32xf32> to vector<128x32xf32>
    %cst_34 = arith.constant dense<0.000000e+00> : vector<128x1xf32>
    %74 = tpu.matmul %73, %46, %cst_34 {dimension_numbers = #tpu.dot_dimension_numbers<[1], [0], [0], [1], [0, 0, 1, 1], [], []>, precision = #tpu.contract_precision<fp32>} : vector<128x32xf32>, vector<32x1xf32>, vector<128x1xf32> -> vector<128x1xf32>
    %c0_35 = arith.constant 0 : index
    %c0_36 = arith.constant 0 : index
    %75 = vector.load %arg7[%c0_35, %c0_36] : memref<128x2xf32, #tpu.memory_space<vmem>>, vector<128x1xf32>
    %76 = arith.addf %74, %75 : vector<128x1xf32>
    %c1_37 = arith.constant 1 : index
    %c0_38 = arith.constant 0 : index
    %c0_39 = arith.constant 0 : index
    %77 = vector.load %arg6[%c1_37, %c0_38, %c0_39] : memref<2x128x32xf32, #tpu.memory_space<vmem>>, vector<1x128x32xf32>
    %78 = vector.shape_cast %77 : vector<1x128x32xf32> to vector<128x32xf32>
    %cst_40 = arith.constant dense<0.000000e+00> : vector<128x1xf32>
    %79 = tpu.matmul %78, %71, %cst_40 {dimension_numbers = #tpu.dot_dimension_numbers<[1], [0], [0], [1], [0, 0, 1, 1], [], []>, precision = #tpu.contract_precision<fp32>} : vector<128x32xf32>, vector<32x1xf32>, vector<128x1xf32> -> vector<128x1xf32>
    %c0_41 = arith.constant 0 : index
    %c1_42 = arith.constant 1 : index
    %80 = vector.load %arg7[%c0_41, %c1_42] : memref<128x2xf32, #tpu.memory_space<vmem>>, vector<128x1xf32>
    %81 = arith.addf %79, %80 : vector<128x1xf32>
    %82 = arith.negf %81 : vector<128x1xf32>
    %83 = math.exp %82 : vector<128x1xf32>
    %cst_43 = arith.constant 1.000000e+00 : f32
    %84 = vector.broadcast %cst_43 : f32 to vector<128x1xf32>
    %85 = arith.addf %84, %83 : vector<128x1xf32>
    %86 = arith.divf %84, %85 : vector<128x1xf32>
    %87 = vector.broadcast %86 : vector<128x1xf32> to vector<128x256xf32>
    %88 = arith.mulf %1, %87 : vector<128x256xf32>
    %89 = vector.broadcast %76 : vector<128x1xf32> to vector<128x256xf32>
    %90 = arith.addf %88, %89 : vector<128x256xf32>
    %c0_44 = arith.constant 0 : index
    %c0_45 = arith.constant 0 : index
    %c0_46 = arith.constant 0 : index
    %91 = vector.load %arg8[%c0_44, %c0_45, %c0_46] : memref<1x128x256xf32, #tpu.memory_space<vmem>>, vector<1x128x256xf32>
    %92 = vector.shape_cast %91 : vector<1x128x256xf32> to vector<128x256xf32>
    %93 = vector.shape_cast %90 : vector<128x256xf32> to vector<1x128x256xf32>
    tpu.vector_store %arg8[%c0_44, %c0_45, %c0_46], %93 {strides = array<i32>} : memref<1x128x256xf32, #tpu.memory_space<vmem>>, vector<1x128x256xf32>,
    return
  }
  func.func @transform_0(%arg0: i32) -> (i32, i32, i32) {
    %c0_i32 = arith.constant 0 : i32
    %c0_i32_0 = arith.constant 0 : i32
    %c0_i32_1 = arith.constant 0 : i32
    return %arg0, %c0_i32, %c0_i32_0 : i32, i32, i32
  }
  func.func @transform_1(%arg0: i32) -> (i32, i32) {
    %c0_i32 = arith.constant 0 : i32
    %c0_i32_0 = arith.constant 0 : i32
    %c0_i32_1 = arith.constant 0 : i32
    return %c0_i32, %c0_i32_0 : i32, i32
  }
  func.func @transform_2(%arg0: i32) -> (i32, i32) {
    %c0_i32 = arith.constant 0 : i32
    %c0_i32_0 = arith.constant 0 : i32
    %c0_i32_1 = arith.constant 0 : i32
    return %c0_i32, %c0_i32_0 : i32, i32
  }
  func.func @transform_3(%arg0: i32) -> (i32, i32) {
    %c0_i32 = arith.constant 0 : i32
    %c0_i32_0 = arith.constant 0 : i32
    %c0_i32_1 = arith.constant 0 : i32
    return %c0_i32, %c0_i32_0 : i32, i32
  }
  func.func @transform_4(%arg0: i32) -> (i32, i32) {
    %c0_i32 = arith.constant 0 : i32
    %c0_i32_0 = arith.constant 0 : i32
    %c0_i32_1 = arith.constant 0 : i32
    return %c0_i32, %c0_i32_0 : i32, i32
  }
  func.func @transform_5(%arg0: i32) -> (i32, i32, i32) {
    %c0_i32 = arith.constant 0 : i32
    %c0_i32_0 = arith.constant 0 : i32
    %c0_i32_1 = arith.constant 0 : i32
    %c0_i32_2 = arith.constant 0 : i32
    return %c0_i32, %c0_i32_0, %c0_i32_1 : i32, i32, i32
  }
  func.func @transform_6(%arg0: i32) -> (i32, i32) {
    %c0_i32 = arith.constant 0 : i32
    %c0_i32_0 = arith.constant 0 : i32
    %c0_i32_1 = arith.constant 0 : i32
    return %c0_i32, %c0_i32_0 : i32, i32
  }
  func.func @transform_7(%arg0: i32) -> (i32, i32, i32) {
    %c0_i32 = arith.constant 0 : i32
    %c0_i32_0 = arith.constant 0 : i32
    %c0_i32_1 = arith.constant 0 : i32
    return %arg0, %c0_i32, %c0_i32_0 : i32, i32, i32
  }
}

</mosaic_0001>

<bundles_post_ra>
// kernel: tpu_custom_call.1
= control target key start
LH: loop header
LB: loop body
LE: loop exit
PB: predicated region body
PF: predicated region fallthrough
CT: control target
= control target key end

     0   :  { %s9825_s0 = inlined_call_operand.vmem [shape: f32[2,128,256], index: 0, kind: input, shape index: {}]   ;;  %s9826_s1 = inlined_call_operand.vmem [shape: f32[1,128], index: 1, kind: input, shape index: {}]   ;;  %s9827_s2 = inlined_call_operand.<no memory space> [shape: f32[1,1], index: 2, kind: input, shape index: {}]   ;;  %s9828_s3 = inlined_call_operand.hbm [shape: f32[64,128], index: 3, kind: input, shape index: {}]   ;;  %s9829_s4 = inlined_call_operand.vmem [shape: f32[64,3], index: 4, kind: input, shape index: {}]   ;;  %s9830_s5 = inlined_call_operand.vmem [shape: f32[2,128,32], index: 5, kind: input, shape index: {}]   ;;  %s9831_s6 = inlined_call_operand.vmem [shape: f32[128,2], index: 6, kind: input, shape index: {}]   ;;  %s9832_s7 = inlined_call_operand.hbm [shape: f32[2,128,256], index: 7, kind: output, shape index: {}]  }
   0x1   :  { %v12_v0 = vstv %s9827_s2 }
   0x2   :  { %13 = vst [vmem:[#allocation2] sm:$0x1] %v12_v0 }
   0x3   :  { %14 = vsyncpa [#allocation4], 0 }
   0x4   :  { %15 = vsyncpa [#allocation5], 0 }
   0x5   :  { %17 = vsyncpa [#allocation5 + $0x1], 0  ;;  %s7482_s26 = smov 0   ;;  %s7484_s27 = smov 0  }
   0x6   :  { %s7486_s28 = smov 0   ;;  %s7488_s29 = smov 0  }
   0x7 LB: > { %s7503_s2 = sadd.s32 4294967295, %s7427_s29   ;;  %s5349_s30 = sadd.s32 4294967294, %s7427_s29   ;;  %s7427_s29 = sphi %s7488_s29, %s10423_s29   ;;  %s7423_s28 = sphi %s7486_s28, %s10422_s28   ;;  %s7419_s27 = sphi %s7484_s27, %s10421_s27   ;;  %s7415_s26 = sphi %s7482_s26, %s10420_s26  }
   0x8   : > { %s7507_s8 = sadd.s32 1, %s7427_s29   ;;  %s182_s9 = sadd.s32 1, %s7423_s28 }
   0x9   : > { %s179_s10 = ssub.s32 %s7427_s29, %s7507_s8  ;;  %p192_p0 = scmp.ne.s32.totalorder %s7423_s28, %s7419_s27 }
   0xa   : > { %p180_p1 = scmp.eq.s32.totalorder %s179_s10, 0  ;;  %p193_p2 = scmp.eq.s32.totalorder %s7503_s2, 1 }
   0xb   : > { %p198_p3 = scmp.ne.s32.totalorder %s7419_s27, %s7415_s26  ;;  %p199_p4 = scmp.eq.s32.totalorder %s5349_s30, 1 }
   0xc   : > { %s7518_s11 = scalar_select %p180_p1, %s7423_s28, %s182_s9  }
   0xd   : > { %p7520_p5 = por %p193_p2, %p192_p0  ;;  %p7524_p6 = por %p199_p4, %p198_p3 }
   0xe   : > { %p5350_p7 = scmp.ge.s32.totalorder %s7427_s29, 1  ;;  %p206_p8 = scmp.lt.s32.totalorder %s7427_s29, 3 }
   0xf   : > { %s10049_s12 = scalar_select %p7520_p5, 1, 0 }
  0x10   : > { %s10050_s13 = scalar_select %p7524_p6, 1, 0 }
  0x11   : > { %p9833_p9 = scmp.eq.s32.totalorder %s7503_s2, 0  ;;  %p7531_p10 = pnand %p5350_p7, %p206_p8 }
  0x12   : > { %s7429_s15 = smov [#allocation3]   ;;  %s7333_s20 = scalar_lea.hbm %s9828_s3, 1024 }
  0x13   : > { %s10051_s14 = scalar_select %p7531_p10, 1, 0 }
  0x14   : > { %s224_s16 = sshll.u32 %s7429_s15, 4  ;;  %p7173_p11 = pneg %p7531_p10  ;;  %s225_s16 = int_to_ptr.vmem [resolvable:$true] %s224_s16 }
  0x15   : > { %p7334_p13 = scmp.ne.s32.totalorder %s9828_s3, %s7333_s20  ;;  %p7340_p3 = scmp.lt.u32.totalorder %s7333_s20, %s9828_s3 }
  0x16   : > { %p7539_p12 = pnand %p9833_p9, %p7173_p11 }
  0x18   : > { %p7335_p0 = pneg %p7539_p12 }
  0x1a   : > { %p7336_p1 = pnand %p7335_p0, %p7334_p13 }
  0x1c   : > { %p7337_p2 = pneg %p7336_p1 }
  0x1e   : > { %p7342_p4 = pnand %p7340_p3, %p7337_p2 }
  0x20   : > { %7345 = shalt.err (!%p7342_p4)
}
  0x21   : > { %s7346_s25 = scalar_lea.vmem %s225_s16, 1024  ;;  %p7354_p9 = scmp.lt.s32.totalorder %s225_s16, %s225_s16 }
  0x22   : > { %p7347_p7 = scmp.ne.s32.totalorder %s225_s16, %s7346_s25  ;;  %p7355_p6 = scmp.lt.s32.totalorder %s7346_s25, %s7346_s25 }
  0x24   : > { %p7349_p8 = pnand %p7347_p7, %p7335_p0  ;;  %p7356_p5 = por %p7355_p6, %p7354_p9 }
  0x26   : > { %p7350_p11 = pneg %p7349_p8 }
  0x28   : > { %p7357_p10 = pnand %p7356_p5, %p7350_p11 }
  0x2a   : > { %7360 = shalt.err (!%p7357_p10)
}
  0x2b   : > { %s7430_s30 = smov 128   ;;  %s7431_s9 = smov 8  }
  0x2c   : > { %7176 = dma.hbm_to_vmem [thread:$0]  (!%p7539_p12), %s9828_s3, 1024, %s225_s16, [#allocation4], %s7430_s30, %s7430_s30, %s7431_s9  }
  0x2d   : > { %p10053_p13 = scmp.ne.s32.totalorder %s10051_s14, 0 }
  0x2f   : > { %257 = sbr.rel (%p10053_p13) target bundleno = 1887 (0x75f), region = 48 }
  0x36   : > { %p10054_p1 = scmp.eq.s32.totalorder %s7503_s2, 0 }
  0x38   : > { %7406 = dma.done.wait (%p10054_p1), [#allocation4], 1024   ;;  %p10055_p0 = pmov %p10054_p1 }
  0x39   : > { %p289_p5 = scmp.lt.s32.totalorder %s7503_s2, 1  ;;  %v9836_v1 = vmov 0.0   ;;  %vm1185_vm0 = vcmask 1040384   ;;  %s7433_s25 = smov 127   ;;  %vm2471_vm1 = vcmask 261120   ;;  %vm2273_vm2 = vcmask 7168  }
  0x3a   : > { %7408 = vsyncadd (%p10055_p0), [#allocation4], 4294966272  ;;  %426 = vmatprep.mubr.f32.mxu0 %v9836_v1  ;;  %s5396_s21 = sshll.u32 %s7503_s2, 12  ;;  %p10418_p9 = scmp.ne.s32.totalorder %s10049_s12, 0 }
  0x3b   : > { %s290_s17 = scalar_select %p289_p5, %s7503_s2, 1 }
  0x3c   : > { %s9774_s30 = scalar_lea.hbm %s9832_s7, %s5396_s21  ;;  %s7436_s9 = smov [#allocation6]  }
  0x3d   : > { %s5395_s18 = sshll.u32 %s290_s17, 8  ;;  %s7434_s17 = smov 126  }
  0x3e   : > { %s7571_s16 = scalar_lea.vmem %s9825_s0, %s5395_s18  ;;  %s7365_s10 = sshll.u32 %s7436_s9, 4  ;;  %s7366_s10 = int_to_ptr.vmem [resolvable:$false] %s7365_s10 }
  0x3f   : > { %v7574_v2 = vld [vmem:[%s7571_s16 + $0x8] sm:$0xff]  ;;  %v7577_v3 = vld [vmem:[%s7571_s16 + $0x18] sm:$0xff]  ;;  %v7580_v4 = vld [vmem:[%s7571_s16] sm:$0xff]  ;;  %s7367_s15 = scalar_lea.vmem %s7366_s10, 8192 }
  0x40   : > { %10056 = vst [vmem:[#allocation9_spill] sm:$0xff] %v7574_v2  ;;  %10057 = vst [vmem:[#allocation10_spill] sm:$0xff] %v7577_v3  ;;  %v330_v5 = vand.u32 4294901760, %v7574_v2  ;;  %v334_v6 = vand.u32 4294901760, %v7577_v3  ;;  %v7585_v7 = vld [vmem:[%s7571_s16 + $0x10] sm:$0xff]  ;;  %v332_v8 = vand.u32 4294901760, %v7580_v4 }
  0x41   : > { %10058 = vst [vmem:[#allocation11_spill] sm:$0xff] %v7580_v4  ;;  %10059 = vst [vmem:[#allocation12_spill] sm:$0xff] %v7585_v7  ;;  %v7589_v9 = vld [vmem:[%s7571_s16 + $0x28] sm:$0xff]  ;;  %v7592_v10 = vld [vmem:[%s7571_s16 + $0x38] sm:$0xff]  ;;  %v336_v11 = vand.u32 4294901760, %v7585_v7 }
  0x42   : > { %10060 = vst [vmem:[#allocation13_spill] sm:$0xff] %v7589_v9  ;;  %10061 = vst [vmem:[#allocation14_spill] sm:$0xff] %v7592_v10  ;;  %v338_v12 = vand.u32 4294901760, %v7589_v9  ;;  %v342_v13 = vand.u32 4294901760, %v7592_v10  ;;  %v7598_v14 = vld [vmem:[%s7571_s16 + $0x20] sm:$0xff]  ;;  %v7601_v15 = vld [vmem:[%s7571_s16 + $0x30] sm:$0xff]  ;;  %v7606_v17 = vpack.c.bf16 %v334_v6, %v330_v5  ;;  %v7652_v37 = vsub.f32 %v7574_v2, %v330_v5 }
  0x43   : > { %10062 = vst [vmem:[#allocation15_spill] sm:$0xff] %v7598_v14  ;;  %10063 = vst [vmem:[#allocation16_spill] sm:$0xff] %v7601_v15  ;;  %v7604_v16 = vld [vmem:[%s7571_s16 + $0x48] sm:$0xff]  ;;  %v7609_v18 = vld [vmem:[%s7571_s16 + $0x58] sm:$0xff]  ;;  %v7617_v21 = vpack.c.bf16 %v336_v11, %v332_v8  ;;  %v340_v24 = vand.u32 4294901760, %v7598_v14  ;;  %v344_v25 = vand.u32 4294901760, %v7601_v15  ;;  %v7655_v38 = vsub.f32 %v7577_v3, %v334_v6 }
  0x44   : > { %10064 = vst [vmem:[#allocation17_spill] sm:$0xff] %v7604_v16  ;;  %10065 = vst [vmem:[#allocation18_spill] sm:$0xff] %v7606_v17  ;;  %v7612_v19 = vld [vmem:[%s7571_s16 + $0x40] sm:$0xff]  ;;  %v7615_v20 = vld [vmem:[%s7571_s16 + $0x50] sm:$0xff]  ;;  %v7619_v22 = vpack.c.bf16 %v342_v13, %v338_v12  ;;  %6430 = vmatprep.subr.bf16.mxu0 %v7606_v17  ;;  %v346_v26 = vand.u32 4294901760, %v7604_v16  ;;  %v350_v27 = vand.u32 4294901760, %v7609_v18  ;;  %v7658_v39 = vsub.f32 %v7580_v4, %v332_v8 }
  0x45   : > { %10066 = vst [vmem:[#allocation19_spill] sm:$0xff] %v7609_v18  ;;  %10067 = vst [vmem:[#allocation20_spill] sm:$0xff] %v7612_v19  ;;  %v7622_v23 = vld [vmem:[%s7571_s16 + $0x68] sm:$0xff]  ;;  %6432 = vmatpush1.bf16.msra.mxu0 %v7617_v21  ;;  %v348_v28 = vand.u32 4294901760, %v7612_v19  ;;  %v352_v29 = vand.u32 4294901760, %v7615_v20  ;;  %v7633_v30 = vld [vmem:[%s7571_s16 + $0x78] sm:$0xff]  ;;  %v7639_v32 = vpack.c.bf16 %v344_v25, %v340_v24  ;;  %v7663_v41 = vsub.f32 %v7585_v7, %v336_v11 }
  0x46   : > { %10068 = vst [vmem:[#allocation21_spill] sm:$0xff] %v7615_v20  ;;  %10069 = vst [vmem:[#allocation22_spill] sm:$0xff] %v7617_v21  ;;  %v7636_v31 = vld [vmem:[%s7571_s16 + $0x60] sm:$0xff]  ;;  %6434 = vmatprep.subr.bf16.mxu0 %v7619_v22  ;;  %v354_v33 = vand.u32 4294901760, %v7622_v23  ;;  %v7643_v34 = vld [vmem:[%s7571_s16 + $0x70] sm:$0xff]  ;;  %v7660_v40 = vpack.c.bf16 %v350_v27, %v346_v26  ;;  %v7666_v42 = vsub.f32 %v7589_v9, %v338_v12  ;;  %v358_v44 = vand.u32 4294901760, %v7633_v30 }
  0x47   : > { %10070 = vst [vmem:[#allocation23_spill] sm:$0xff] %v7619_v22  ;;  %10071 = vst [vmem:[#allocation24_spill] sm:$0xff] %v7622_v23  ;;  %v7646_v35 = vld [vmem:[%s7571_s16 + $0x88] sm:$0xff]  ;;  %v7649_v36 = vld [vmem:[%s7571_s16 + $0x98] sm:$0xff]  ;;  %v7668_v43 = vpack.c.bf16 %v352_v29, %v348_v28  ;;  %v356_v45 = vand.u32 4294901760, %v7636_v31  ;;  %v360_v46 = vand.u32 4294901760, %v7643_v34  ;;  %v7683_v51 = vsub.f32 %v7592_v10, %v342_v13 }
  0x48   : > { %10072 = vst [vmem:[#allocation25_spill] sm:$0xff] %v7633_v30  ;;  %10073 = vst [vmem:[#allocation26_spill] sm:$0xff] %v7636_v31  ;;  %v362_v47 = vand.u32 4294901760, %v7646_v35  ;;  %v366_v48 = vand.u32 4294901760, %v7649_v36  ;;  %v7677_v49 = vld [vmem:[%s7571_s16 + $0x80] sm:$0xff]  ;;  %v7680_v50 = vld [vmem:[%s7571_s16 + $0x90] sm:$0xff]  ;;  %v7686_v52 = vsub.f32 %v7598_v14, %v340_v24  ;;  %v7689_v53 = vsub.f32 %v7601_v15, %v344_v25 }
  0x49   : > { %10074 = vst [vmem:[#allocation27_spill] sm:$0xff] %v7639_v32  ;;  %10075 = vst [vmem:[#allocation28_spill] sm:$0xff] %v7643_v34  ;;  %6436 = vmatpush1.bf16.msra.mxu0 %v7639_v32  ;;  %v7692_v54 = vpack.c.bf16 %v358_v44, %v354_v33  ;;  %v7695_v55 = vld [vmem:[%s7571_s16 + $0xa8] sm:$0xff]  ;;  %v7698_v56 = vld [vmem:[%s7571_s16 + $0xb8] sm:$0xff]  ;;  %v7704_v58 = vsub.f32 %v7604_v16, %v346_v26  ;;  %v7707_v59 = vsub.f32 %v7609_v18, %v350_v27 }
  0x4a   : > { %10076 = vst [vmem:[#allocation29_spill] sm:$0xff] %v7646_v35  ;;  %10077 = vst [vmem:[#allocation30_spill] sm:$0xff] %v7649_v36  ;;  %6438 = vmatprep.subr.bf16.mxu0 %v7660_v40  ;;  %v7701_v57 = vld [vmem:[%s7571_s16 + $0xa0] sm:$0xff]  ;;  %v7710_v60 = vsub.f32 %v7612_v19, %v348_v28  ;;  %v7713_v61 = vsub.f32 %v7615_v20, %v352_v29  ;;  %v7716_v62 = vld [vmem:[%s7571_s16 + $0xb0] sm:$0xff]  ;;  %v7725_v5 = vsub.f32 %v7622_v23, %v354_v33 }
  0x4b   : > { %10078 = vst [vmem:[#allocation31_spill] sm:$0xff] %v7660_v40  ;;  %10079 = vst [vmem:[#allocation32_spill] sm:$0xff] %v7668_v43  ;;  %v7719_v63 = vld [vmem:[%s7571_s16 + $0xc8] sm:$0xff]  ;;  %v7722_v0 = vld [vmem:[%s7571_s16 + $0xd8] sm:$0xff]  ;;  %v7728_v6 = vsub.f32 %v7633_v30, %v358_v44  ;;  %v364_v8 = vand.u32 4294901760, %v7677_v49  ;;  %v368_v11 = vand.u32 4294901760, %v7680_v50  ;;  %v7733_v12 = vpack.c.bf16 %v360_v46, %v356_v45 }
  0x4c   : > { %10080 = vst [vmem:[#allocation33_spill] sm:$0xff] %v7677_v49  ;;  %10081 = vst [vmem:[#allocation34_spill] sm:$0xff] %v7680_v50  ;;  %v7735_v13 = vpack.c.bf16 %v366_v48, %v362_v47  ;;  %v370_v24 = vand.u32 4294901760, %v7695_v55  ;;  %v374_v25 = vand.u32 4294901760, %v7698_v56  ;;  %v7740_v26 = vld [vmem:[%s7571_s16 + $0xc0] sm:$0xff]  ;;  %v7743_v27 = vld [vmem:[%s7571_s16 + $0xd0] sm:$0xff]  ;;  %v7751_v1 = vsub.f32 %v7636_v31, %v356_v45 }
  0x4d   : > { %10082 = vst [vmem:[#allocation35_spill] sm:$0xff] %v7692_v54  ;;  %10083 = vst [vmem:[#allocation36_spill] sm:$0xff] %v7695_v55  ;;  %6440 = vmatpush1.bf16.msra.mxu0 %v7668_v43  ;;  %v372_v28 = vand.u32 4294901760, %v7701_v57  ;;  %v376_v29 = vand.u32 4294901760, %v7716_v62  ;;  %v378_v33 = vand.u32 4294901760, %v7719_v63  ;;  %v382_v44 = vand.u32 4294901760, %v7722_v0 }
  0x4e   : > { %10084 = vst [vmem:[#allocation37_spill] sm:$0xff] %v7698_v56  ;;  %10085 = vst [vmem:[#allocation38_spill] sm:$0xff] %v7701_v57  ;;  %6442 = vmatprep.subr.bf16.mxu0 %v7692_v54  ;;  %v7754_v30 = vsub.f32 %v7643_v34, %v360_v46  ;;  %v7757_v18 = vsub.f32 %v7646_v35, %v362_v47  ;;  %v7760_v20 = vsub.f32 %v7649_v36, %v366_v48  ;;  %v326_v46 = vld [vmem:[%s9826_s1] sm:$0x1] }
  0x4f   : > { %10086 = vst [vmem:[#allocation39_spill] sm:$0xff] %v7716_v62  ;;  %10087 = vst [vmem:[#allocation40_spill] sm:$0xff] %v7719_v63  ;;  %v7762_v23 = vpack.c.bf16 %v368_v11, %v364_v8  ;;  %v7765_v10 = vsub.f32 %v7677_v49, %v364_v8  ;;  %v380_v15 = vand.u32 4294901760, %v7740_v26  ;;  %v384_v45 = vand.u32 4294901760, %v7743_v27  ;;  %v7796_v49 = vld [vmem:[%s7571_s16 + $0xe8] sm:$0xff] }
  0x50   : > { %10088 = vst [vmem:[#allocation41_spill] sm:$0xff] %v7722_v0  ;;  %10089 = vst [vmem:[#allocation42_spill] sm:$0xff] %v7733_v12  ;;  %v7774_v47 = vsub.f32 %v7680_v50, %v368_v11  ;;  %v7776_v48 = vpack.c.bf16 %v374_v25, %v370_v24  ;;  %v7779_v36 = vsub.f32 %v7695_v55, %v370_v24  ;;  %v7806_v31 = vand.u32 4294901760, %v326_v46 }
  0x51   : > { %10090 = vst [vmem:[#allocation43_spill] sm:$0xff] %v7735_v13  ;;  %10091 = vst [vmem:[#allocation44_spill] sm:$0xff] %v7740_v26  ;;  %6444 = vmatpush1.bf16.msra.mxu0 %v7733_v12  ;;  %v7782_v8 = vsub.f32 %v7698_v56, %v374_v25  ;;  %v7785_v34 = vpack.c.bf16 %v376_v29, %v372_v28  ;;  %v7788_v35 = vsub.f32 %v7701_v57, %v372_v28  ;;  %v7802_v25 = vld [vmem:[%s7571_s16 + $0xf8] sm:$0xff]  ;;  %v7817_v57 = vld [vmem:[%s7571_s16 + $0xe0] sm:$0xff] }
  0x52   : > { %10092 = vst [vmem:[#allocation45_spill] sm:$0xff] %v7743_v27  ;;  %10093 = vst [vmem:[#allocation46_spill] sm:$0xff] %v7762_v23  ;;  %6446 = vmatprep.subr.bf16.mxu0 %v7735_v13  ;;  %v7791_v11 = vsub.f32 %v7716_v62, %v376_v29  ;;  %v7793_v50 = vpack.c.bf16 %v382_v44, %v378_v33  ;;  %v7799_v24 = vsub.f32 %v7719_v63, %v378_v33  ;;  %v7820_v33 = vld [vmem:[%s7571_s16 + $0xf0] sm:$0xff] }
  0x53   : > { %10094 = vst [vmem:[#allocation47_spill] sm:$0xff] %v7776_v48  ;;  %10095 = vst [vmem:[#allocation48_spill] sm:$0xff] %v7785_v34  ;;  %v7809_v28 = vsub.f32 %v7722_v0, %v382_v44  ;;  %v7811_v29 = vpack.c.bf16 %v384_v45, %v380_v15  ;;  %v7814_v62 = vsub.f32 %v7740_v26, %v380_v15  ;;  %v386_v56 = vand.u32 4294901760, %v7796_v49 }
  0x54   : > { %10096 = vst [vmem:[#allocation49_spill] sm:$0xff] %v7793_v50  ;;  %10097 = vst [vmem:[#allocation50_spill] sm:$0xff] %v7796_v49  ;;  %v7825_v55 = vsub.f32 %v7743_v27, %v384_v45  ;;  %v10105_v44 = vand.u32 4294901760, %v7652_v37  ;;  %v10106_v15 = vand.u32 4294901760, %v7655_v38  ;;  %v390_v16 = vand.u32 4294901760, %v7802_v25 }
  0x55   : > { %10098 = vst [vmem:[#allocation51_spill] sm:$0xff] %v7802_v25  ;;  %10099 = vst [vmem:[#allocation52_spill] sm:$0xff] %v7809_v28  ;;  %6448 = vmatpush1.bf16.msra.mxu0 %v7762_v23  ;;  %v7837_v63 = vsub.f32 %v326_v46, %v7806_v31  ;;  %v9866_v45 = vand.u32 4294901760, %v7663_v41  ;;  %v388_v19 = vand.u32 4294901760, %v7817_v57  ;;  %v10108_v14 = vand.u32 4294901760, %v7658_v39 }
  0x56   : > { %10100 = vst [vmem:[#allocation53_spill] sm:$0xff] %v7811_v29  ;;  %10101 = vst [vmem:[#allocation54_spill] sm:$0xff] %v7814_v62  ;;  %v441_v0 = vsub.f32 %v7652_v37, %v10105_v44  ;;  %v453_v26 = vsub.f32 %v7655_v38, %v10106_v15  ;;  %6450 = vmatprep.subr.bf16.mxu0 %v7776_v48  ;;  %v10109_v3 = vand.u32 4294901760, %v7666_v42  ;;  %v10110_v7 = vand.u32 4294901760, %v7683_v51 }
  0x57   : > { %10102 = vst [vmem:[#allocation55_spill] sm:$0xff] %v7817_v57  ;;  %10103 = vst [vmem:[#allocation56_spill] sm:$0xff] %v7820_v33  ;;  %v447_v46 = vsub.f32 %v7658_v39, %v10108_v14  ;;  %v459_v27 = vsub.f32 %v7663_v41, %v9866_v45  ;;  %v7861_v2 = vpack.c.bf16 %v390_v16, %v386_v56  ;;  %v9903_v54 = vand.u32 4294901760, %v7754_v30 }
  0x58   : > { %10104 = vst [vmem:[#allocation57_spill] sm:$0xff] %v7825_v55  ;;  %10107 = vst [vmem:[#allocation58_spill] sm:$0xff] %v7837_v63  ;;  %v442_v15 = vand.u32 4294901760, %v441_v0  ;;  %v454_v9 = vand.u32 4294901760, %v453_v26  ;;  %v465_v44 = vsub.f32 %v7666_v42, %v10109_v3  ;;  %v477_v0 = vsub.f32 %v7683_v51, %v10110_v7 }
  0x59   : > { %6452 = vmatpush1.bf16.msra.mxu0 %v7785_v34  ;;  %10111 = vst [vmem:[#allocation59_spill] sm:$0xff] %v7861_v2  ;;  %v7864_v14 = vsub.f32 %v7796_v49, %v386_v56  ;;  %v7867_v4 = vsub.f32 %v7802_v25, %v390_v16  ;;  %v10112_v3 = vand.u32 4294901760, %v7820_v33  ;;  %v10114_v7 = vand.u32 4294901760, %v7686_v52 }
  0x5a   : > { %6454 = vmatprep.subr.bf16.mxu0 %v7793_v50  ;;  %v10115_v50 = vand.u32 4294901760, %v7689_v53  ;;  %v9885_v56 = vand.u32 4294901760, %v7707_v59  ;;  %v6461_v49 = vpack.c.bf16 %v454_v9, %v442_v15  ;;  %v10116_v16 = vand.u32 4294901760, %v7837_v63 }
  0x5b   : > { %v7872_v34 = vpack.c.bf16 %v10112_v3, %v388_v19  ;;  %v471_v26 = vsub.f32 %v7686_v52, %v10114_v7  ;;  %v448_v45 = vand.u32 4294901760, %v447_v46  ;;  %v460_v3 = vand.u32 4294901760, %v459_v27 }
  0x5c   : > { %v483_v48 = vsub.f32 %v7689_v53, %v10115_v50  ;;  %v430_v25 = vsub.f32 %v7837_v63, %v10116_v16  ;;  %v466_v13 = vand.u32 4294901760, %v465_v44  ;;  %v478_v12 = vand.u32 4294901760, %v477_v0 }
  0x5d   : > { %10113 = vst [vmem:[#allocation60_spill] sm:$0xff] %v7872_v34  ;;  %6456 = vmatpush1.bf16.msra.mxu0 %v7811_v29  ;;  %v9888_v7 = vand.u32 4294901760, %v7713_v61  ;;  %v10117_v50 = vand.u32 4294901760, %v7704_v58  ;;  %v501_v15 = vsub.f32 %v7707_v59, %v9885_v56  ;;  %v9891_v46 = vand.u32 4294901760, %v7725_v5 }
  0x5e   : > { %6458 = vmatprep.subr.bf16.mxu0 %v7861_v2  ;;  %v9896_v16 = vand.u32 4294901760, %v7728_v6  ;;  %v472_v23 = vand.u32 4294901760, %v471_v26  ;;  %v484_v27 = vand.u32 4294901760, %v483_v48  ;;  %v10118_v44 = vand.u32 4294901760, %v7710_v60 }
  0x5f   : > { %v489_v9 = vsub.f32 %v7704_v58, %v10117_v50  ;;  %v507_v2 = vsub.f32 %v7713_v61, %v9888_v7  ;;  %v431_v29 = vand.u32 4294901760, %v430_v25  ;;  %v513_v50 = vsub.f32 %v7725_v5, %v9891_v46 }
  0x60   : > { %v495_v0 = vsub.f32 %v7710_v60, %v10118_v44  ;;  %v525_v56 = vsub.f32 %v7728_v6, %v9896_v16  ;;  %v7911_v48 = vsub.f32 %v7817_v57, %v388_v19  ;;  %v6463_v44 = vpack.c.bf16 %v460_v3, %v448_v45 }
  0x61   : > { %6460 = vmatpush1.bf16.msra.mxu0 %v7872_v34  ;;  %v6465_v7 = vpack.c.bf16 %v478_v12, %v466_v13  ;;  %v490_v43 = vand.u32 4294901760, %v489_v9  ;;  %v502_v46 = vand.u32 4294901760, %v501_v15  ;;  %v9902_v40 = vand.u32 4294901760, %v7760_v20 }
  0x62   : > { %6462 = vmatprep.subr.bf16.mxu0 %v6461_v49  ;;  %v6467_v32 = vpack.c.bf16 %v484_v27, %v472_v23  ;;  %v496_v16 = vand.u32 4294901760, %v495_v0  ;;  %v508_v22 = vand.u32 4294901760, %v507_v2  ;;  %v9901_v26 = vand.u32 4294901760, %v7765_v10 }
  0x63   : > { %v514_v34 = vand.u32 4294901760, %v513_v50  ;;  %v526_v19 = vand.u32 4294901760, %v525_v56  ;;  %v10119_v45 = vand.u32 4294901760, %v7751_v1  ;;  %v9904_v25 = vand.u32 4294901760, %v7774_v47 }
  0x64   : > { %432 = vmatmul.mubr.f32.vlgmr.msra.gmra.mrb[0].mxu0 %v431_v29  ;;  %v531_v49 = vsub.f32 %v7754_v30, %v9903_v54  ;;  %v10120_v23 = vand.u32 4294901760, %v7757_v18  ;;  %v549_v12 = vsub.f32 %v7760_v20, %v9902_v40  ;;  %v10121_v13 = vmov 0.0  }
  0x65   : > { %v519_v3 = vsub.f32 %v7751_v1, %v10119_v45  ;;  %6464 = vmatpush1.bf16.msra.mxu0 %v6463_v44  ;;  %662 = vmatprep.mubr.f32.mxu0 %v10121_v13  ;;  %v6469_v29 = vpack.c.bf16 %v502_v46, %v490_v43  ;;  %v543_v56 = vsub.f32 %v7765_v10, %v9901_v26  ;;  %v9906_v9 = vand.u32 4294901760, %v7779_v36 }
  0x66   : > { %v537_v2 = vsub.f32 %v7757_v18, %v10120_v23  ;;  %6466 = vmatprep.subr.bf16.mxu0 %v6465_v7  ;;  %v10122_v27 = vand.u32 4294901760, %v7820_v33  ;;  %v555_v50 = vsub.f32 %v7774_v47, %v9904_v25  ;;  %v9905_v43 = vand.u32 4294901760, %v7791_v11 }
  0x67   : > { %v6471_v46 = vpack.c.bf16 %v508_v22, %v496_v16  ;;  %v6473_v44 = vpack.c.bf16 %v526_v19, %v514_v34  ;;  %v520_v45 = vand.u32 4294901760, %v519_v3  ;;  %v9911_v23 = vand.u32 4294901760, %v7799_v24 }
  0x68   : > { %v7939_v0 = vsub.f32 %v7820_v33, %v10122_v27  ;;  %v532_v26 = vand.u32 4294901760, %v531_v49  ;;  %v538_v40 = vand.u32 4294901760, %v537_v2  ;;  %v550_v54 = vand.u32 4294901760, %v549_v12 }
  0x69   : > { %6468 = vmatpush1.bf16.msra.mxu0 %v6467_v32  ;;  %v596_v27 = vand.u32 4294901760, %v7809_v28  ;;  %v544_v15 = vand.u32 4294901760, %v543_v56  ;;  %v561_v25 = vsub.f32 %v7779_v36, %v9906_v9  ;;  %v10123_v7 = vand.u32 4294901760, %v7782_v8 }
  0x6a   : > { %6470 = vmatprep.subr.bf16.mxu0 %v6469_v29  ;;  %v590_v34 = vand.u32 4294901760, %v7814_v62  ;;  %v556_v16 = vand.u32 4294901760, %v555_v50  ;;  %v10124_v32 = vand.u32 4294901760, %v7788_v35  ;;  %v579_v3 = vsub.f32 %v7791_v11, %v9905_v43 }
  0x6b   : > { %v573_v22 = vsub.f32 %v7782_v8, %v10123_v7  ;;  %v602_v49 = vand.u32 4294901760, %v7825_v55  ;;  %v585_v2 = vsub.f32 %v7799_v24, %v9911_v23  ;;  %v597_v12 = vsub.f32 %v7809_v28, %v596_v27 }
  0x6c   : > { %v567_v19 = vsub.f32 %v7788_v35, %v10124_v32  ;;  %v608_v29 = vand.u32 4294901760, %v7864_v14  ;;  %v620_v56 = vand.u32 4294901760, %v7867_v4  ;;  %v6475_v50 = vpack.c.bf16 %v532_v26, %v520_v45 }
  0x6d   : > { %6472 = vmatpush1.bf16.msra.mxu0 %v6471_v46  ;;  %v591_v7 = vsub.f32 %v7814_v62, %v590_v34  ;;  %v603_v32 = vsub.f32 %v7825_v55, %v602_v49  ;;  %v614_v43 = vand.u32 4294901760, %v7911_v48  ;;  %v6477_v9 = vpack.c.bf16 %v550_v54, %v538_v40 }
  0x6e   : > { %6474 = vmatprep.subr.bf16.mxu0 %v6473_v44  ;;  %v562_v33 = vand.u32 4294901760, %v561_v25  ;;  %v574_v57 = vand.u32 4294901760, %v573_v22  ;;  %v6479_v21 = vpack.c.bf16 %v556_v16, %v544_v15  ;;  %v568_v23 = vand.u32 4294901760, %v567_v19 }
  0x6f   : > { %v580_v63 = vand.u32 4294901760, %v579_v3  ;;  %v586_v17 = vand.u32 4294901760, %v585_v2  ;;  %v598_v28 = vand.u32 4294901760, %v597_v12  ;;  %v609_v13 = vsub.f32 %v7864_v14, %v608_v29 }
  0x70   : > { %v621_v46 = vsub.f32 %v7867_v4, %v620_v56  ;;  %v592_v26 = vand.u32 4294901760, %v591_v7  ;;  %v604_v45 = vand.u32 4294901760, %v603_v32  ;;  %v615_v55 = vsub.f32 %v7911_v48, %v614_v43 }
  0x71   : > { %6476 = vmatpush1.bf16.msra.mxu0 %v6475_v50  ;;  %v626_v62 = vand.u32 4294901760, %v7939_v0  ;;  %v6481_v40 = vpack.c.bf16 %v574_v57, %v562_v33  ;;  %v6483_v54 = vpack.c.bf16 %v580_v63, %v568_v23  ;;  %v6485_v25 = vpack.c.bf16 %v598_v28, %v586_v17 }
  0x72   : > { %6478 = vmatprep.subr.bf16.mxu0 %v6477_v9  ;;  %v610_v15 = vand.u32 4294901760, %v609_v13  ;;  %v622_v44 = vand.u32 4294901760, %v621_v46  ;;  %v6487_v22 = vpack.c.bf16 %v604_v45, %v592_v26  ;;  %v616_v16 = vand.u32 4294901760, %v615_v55 }
  0x73   : > { %v627_v19 = vsub.f32 %v7939_v0, %v626_v62  ;;  %v10125_v3 = vand.u32 4294901760, %v7652_v37  ;;  %v10126_v2 = vand.u32 4294901760, %v7655_v38  ;;  %v10127_v50 = vand.u32 4294901760, %v7658_v39 }
  0x74   : > { %v10128_v57 = vand.u32 4294901760, %v7663_v41  ;;  %v10129_v17 = vand.u32 4294901760, %v7666_v42  ;;  %v10131_v28 = vand.u32 4294901760, %v7686_v52  ;;  %v10132_v33 = vand.u32 4294901760, %v7689_v53 }
  0x75   : > { %6480 = vmatpush1.bf16.msra.mxu0 %v6479_v21  ;;  %v7980_v12 = vpack.c.bf16 %v10126_v2, %v10125_v3  ;;  %v10130_v21 = vand.u32 4294901760, %v7683_v51  ;;  %v10133_v9 = vand.u32 4294901760, %v7704_v58  ;;  %v10134_v23 = vand.u32 4294901760, %v7707_v59 }
  0x76   : > { %6482 = vmatprep.subr.bf16.mxu0 %v6481_v40  ;;  %v7986_v63 = vpack.c.bf16 %v10128_v57, %v10127_v50  ;;  %v7998_v13 = vpack.c.bf16 %v10132_v33, %v10131_v28  ;;  %v10135_v32 = vand.u32 4294901760, %v7710_v60  ;;  %v10136_v46 = vand.u32 4294901760, %v7713_v61 }
  0x77   : > { %v7992_v55 = vpack.c.bf16 %v10130_v21, %v10129_v17  ;;  %v8004_v7 = vpack.c.bf16 %v10134_v23, %v10133_v9  ;;  %v10137_v45 = vand.u32 4294901760, %v7725_v5  ;;  %v10138_v40 = vand.u32 4294901760, %v7728_v6 }
  0x78   : > { %v8010_v26 = vpack.c.bf16 %v10136_v46, %v10135_v32  ;;  %v10139_v2 = vand.u32 4294901760, %v7751_v1  ;;  %v10140_v50 = vand.u32 4294901760, %v7754_v30  ;;  %v10141_v17 = vand.u32 4294901760, %v7757_v18 }
  0x79   : > { %v8016_v3 = vpack.c.bf16 %v10138_v40, %v10137_v45  ;;  %v10142_v21 = vand.u32 4294901760, %v7760_v20  ;;  %v10144_v33 = vand.u32 4294901760, %v7765_v10  ;;  %v10145_v9 = vand.u32 4294901760, %v7774_v47  ;;  %6484 = vmatpush1.bf16.msra.mxu0 %v6483_v54  ;;  %v10172_v54 = vld [vmem:[#allocation60_spill] sm:$0xff] }
  0x7a   : > { %v8022_v57 = vpack.c.bf16 %v10140_v50, %v10139_v2  ;;  %v10147_v32 = vand.u32 4294901760, %v7779_v36  ;;  %v10148_v46 = vand.u32 4294901760, %v7782_v8  ;;  %v10149_v40 = vand.u32 4294901760, %v7788_v35  ;;  %6486 = vmatprep.subr.bf16.mxu0 %v6485_v25 }
  0x7b   : > { %v8028_v28 = vpack.c.bf16 %v10142_v21, %v10141_v17  ;;  %v8034_v23 = vpack.c.bf16 %v10145_v9, %v10144_v33  ;;  %v10150_v2 = vand.u32 4294901760, %v7791_v11  ;;  %v10151_v17 = vand.u32 4294901760, %v7799_v24 }
  0x7c   : > { %v8040_v45 = vpack.c.bf16 %v10148_v46, %v10147_v32  ;;  %v8052_v33 = vpack.c.bf16 %v602_v49, %v590_v34  ;;  %v8054_v9 = vpack.c.bf16 %v620_v56, %v608_v29  ;;  %v6489_v32 = vpack.c.bf16 %v622_v44, %v610_v15  ;;  %v10170_v29 = vld [vmem:[#allocation53_spill] sm:$0xff]  ;;  %v10171_v56 = vld [vmem:[#allocation59_spill] sm:$0xff] }
  0x7d   : > { %10143 = vst [vmem:[#allocation61_spill] sm:$0xff] %v8028_v28  ;;  %10146 = vst [vmem:[#allocation62_spill] sm:$0xff] %v8034_v23  ;;  %v8046_v50 = vpack.c.bf16 %v10150_v2, %v10149_v40  ;;  %v8050_v21 = vpack.c.bf16 %v596_v27, %v10151_v17  ;;  %v628_v28 = vand.u32 4294901760, %v627_v19  ;;  %v8056_v23 = vpack.c.bf16 %v626_v62, %v614_v43  ;;  %v327_v62 = vld [vmem:[#allocation2] sm:$0x1] }
  0x7e   : > { %6488 = vmatpush1.bf16.msra.mxu0 %v6487_v22  ;;  %v6493_v40 = vpack.c.bf16 %v7655_v38, %v7652_v37  ;;  %v6495_v27 = vpack.c.bf16 %v7663_v41, %v7658_v39  ;;  %v6497_v34 = vpack.c.bf16 %v7683_v51, %v7666_v42  ;;  %v6499_v43 = vpack.c.bf16 %v7689_v53, %v7686_v52 }
  0x7f   : > { %v6491_v46 = vpack.c.bf16 %v628_v28, %v616_v16  ;;  %6490 = vmatprep.subr.bf16.mxu0 %v6489_v32  ;;  %v10152_v49 = vmov 0.0   ;;  %7165 = vpush %v327_v62  ;;  %v6501_v37 = vpack.c.bf16 %v7707_v59, %v7704_v58  ;;  %v6503_v38 = vpack.c.bf16 %v7713_v61, %v7710_v60  ;;  %v10153_v58 = vld [vmem:[#allocation52_spill] sm:$0xff]  ;;  %v10155_v59 = vld [vmem:[#allocation57_spill] sm:$0xff]  ;;  %v10158_v60 = vld [vmem:[#allocation22_spill] sm:$0xff] }
  0x80   : > { %v6505_v39 = vpack.c.bf16 %v7728_v6, %v7725_v5  ;;  %v6507_v41 = vpack.c.bf16 %v7754_v30, %v7751_v1  ;;  %v6509_v42 = vpack.c.bf16 %v7760_v20, %v7757_v18  ;;  %v6511_v51 = vpack.c.bf16 %v7774_v47, %v7765_v10  ;;  %v10154_v30 = vld [vmem:[#allocation54_spill] sm:$0xff]  ;;  %v10159_v61 = vld [vmem:[#allocation23_spill] sm:$0xff] }
  0x81   : > { %v6513_v52 = vpack.c.bf16 %v7782_v8, %v7779_v36  ;;  %v6515_v53 = vpack.c.bf16 %v7791_v11, %v7788_v35  ;;  %v6517_v1 = vpack.c.bf16 %v10153_v58, %v7799_v24  ;;  %v6519_v18 = vpack.c.bf16 %v10155_v59, %v10154_v30  ;;  %v10156_v36 = vld [vmem:[#allocation18_spill] sm:$0xff]  ;;  %v10160_v5 = vld [vmem:[#allocation27_spill] sm:$0xff]  ;;  %v10182_v58 = vld [vmem:[#allocation20_spill] sm:$0xff] }
  0x82   : > { %6492 = vmatpush1.bf16.msra.mxu0 %v6491_v46  ;;  %v6521_v10 = vpack.c.bf16 %v7867_v4, %v7864_v14  ;;  %v6523_v20 = vpack.c.bf16 %v7939_v0, %v7911_v48  ;;  %v10157_v35 = vld [vmem:[#allocation58_spill] sm:$0xff]  ;;  %v10161_v6 = vld [vmem:[#allocation31_spill] sm:$0xff]  ;;  %v10162_v4 = vld [vmem:[#allocation32_spill] sm:$0xff] }
  0x83   : > { %6494 = vmatprep.subr.bf16.mxu0 %v6493_v40  ;;  %v10163_v47 = vld [vmem:[#allocation35_spill] sm:$0xff]  ;;  %v10164_v8 = vld [vmem:[#allocation42_spill] sm:$0xff]  ;;  %v10168_v48 = vld [vmem:[#allocation48_spill] sm:$0xff]  ;;  %v10173_v25 = vand.u32 4294901760, %v10157_v35 }
  0x84   : > { %v10165_v11 = vld [vmem:[#allocation43_spill] sm:$0xff]  ;;  %v10166_v24 = vld [vmem:[#allocation46_spill] sm:$0xff]  ;;  %v10169_v0 = vld [vmem:[#allocation49_spill] sm:$0xff] }
  0x85   : > { %664 = vmatmul.mubr.f32.vlgmr.msra.gmra.mrb[0].mxu0 %v7806_v31  ;;  %v10167_v14 = vld [vmem:[#allocation47_spill] sm:$0xff]  ;;  %v10174_v15 = vld [vmem:[#allocation61_spill] sm:$0xff]  ;;  %v10175_v44 = vld [vmem:[#allocation62_spill] sm:$0xff] }
  0x86   : > { %6496 = vmatpush1.bf16.msra.mxu0 %v6495_v27  ;;  %798 = vmatprep.mubr.f32.mxu0 %v10152_v49  ;;  %v10176_v40 = vld [vmem:[#allocation11_spill] sm:$0xff]  ;;  %v10183_v30 = vld [vmem:[#allocation17_spill] sm:$0xff] }
  0x87   : > { %6498 = vmatprep.subr.bf16.mxu0 %v6497_v34  ;;  %v10177_v34 = vld [vmem:[#allocation15_spill] sm:$0xff] }
  0x8a   : > { %6500 = vmatpush1.bf16.msra.mxu0 %v6499_v43  ;;  %v10178_v43 = vld [vmem:[#allocation9_spill] sm:$0xff] }
  0x8b   : > { %6502 = vmatprep.subr.bf16.mxu0 %v6501_v37  ;;  %v10179_v37 = vld [vmem:[#allocation13_spill] sm:$0xff] }
  0x8e   : > { %6504 = vmatpush1.bf16.msra.mxu0 %v6503_v38 }
  0x8f   : > { %6506 = vmatprep.subr.bf16.mxu0 %v6505_v39 }
  0x92   : > { %6508 = vmatpush1.bf16.msra.mxu0 %v6507_v41 }
  0x93   : > { %6510 = vmatprep.subr.bf16.mxu0 %v6509_v42  ;;  %v10180_v42 = vld [vmem:[#allocation12_spill] sm:$0xff] }
  0x96   : > { %6512 = vmatpush1.bf16.msra.mxu0 %v6511_v51 }
  0x97   : > { %6514 = vmatprep.subr.bf16.mxu0 %v6513_v52  ;;  %v10181_v52 = vld [vmem:[#allocation10_spill] sm:$0xff] }
  0x9a   : > { %6516 = vmatpush1.bf16.msra.mxu0 %v6515_v53 }
  0x9b   : > { %6518 = vmatprep.subr.bf16.mxu0 %v6517_v1 }
  0x9e   : > { %6520 = vmatpush1.bf16.msra.mxu0 %v6519_v18 }
  0x9f   : > { %6522 = vmatprep.subr.bf16.mxu0 %v6521_v10  ;;  %v10184_v10 = vld [vmem:[#allocation16_spill] sm:$0xff] }
  0xa2   : > { %6524 = vmatpush1.bf16.msra.mxu0 %v6523_v20 }
  0xa3   : > { %6526 = vmatprep.subr.bf16.mxu0 %v10156_v36 }
  0xa5   : > { %801 = vmatmul.mubr.f32.vlgmr.msra.gmra.mrb[0].mxu0 %v10157_v35 }
  0xa6   : > { %6528 = vmatpush1.bf16.msra.mxu0 %v10158_v60  ;;  %903 = vmatprep.mubr.f32.mxu0 %v10152_v49 }
  0xa7   : > { %6530 = vmatprep.subr.bf16.mxu0 %v10159_v61 }
  0xaa   : > { %6532 = vmatpush1.bf16.msra.mxu0 %v10160_v5 }
  0xab   : > { %6534 = vmatprep.subr.bf16.mxu0 %v10161_v6 }
  0xae   : > { %6536 = vmatpush1.bf16.msra.mxu0 %v10162_v4 }
  0xaf   : > { %6538 = vmatprep.subr.bf16.mxu0 %v10163_v47 }
  0xb0   : > { %s7166_s22 = spop %7165 }
  0xb1   : > { %v329_v22 = vstv %s7166_s22 }
  0xb2   : > { %6540 = vmatpush1.bf16.msra.mxu0 %v10164_v8 }
  0xb3   : > { %6542 = vmatprep.subr.bf16.mxu0 %v10165_v11 }
  0xb6   : > { %6544 = vmatpush1.bf16.msra.mxu0 %v10166_v24 }
  0xb7   : > { %6546 = vmatprep.subr.bf16.mxu0 %v10167_v14 }
  0xba   : > { %6548 = vmatpush1.bf16.msra.mxu0 %v10168_v48 }
  0xbb   : > { %6550 = vmatprep.subr.bf16.mxu0 %v10169_v0 }
  0xbe   : > { %6552 = vmatpush1.bf16.msra.mxu0 %v10170_v29 }
  0xbf   : > { %6554 = vmatprep.subr.bf16.mxu0 %v10171_v56 }
  0xc2   : > { %6556 = vmatpush1.bf16.msra.mxu0 %v10172_v54 }
  0xc3   : > { %6558 = vmatprep.subr.bf16.mxu0 %v7980_v12 }
  0xc5   : > { %907 = vmatmul.mubr.f32.vlgmr.msra.gmra.mrb[0].mxu0 %v10173_v25 }
  0xc6   : > { %6560 = vmatpush1.bf16.msra.mxu0 %v7986_v63  ;;  %1073 = vmatprep.mubr.f32.mxu0 %v10152_v49 }
  0xc7   : > { %6562 = vmatprep.subr.bf16.mxu0 %v7992_v55 }
  0xca   : > { %6564 = vmatpush1.bf16.msra.mxu0 %v7998_v13 }
  0xcb   : > { %6566 = vmatprep.subr.bf16.mxu0 %v8004_v7 }
  0xce   : > { %6568 = vmatpush1.bf16.msra.mxu0 %v8010_v26 }
  0xcf   : > { %6570 = vmatprep.subr.bf16.mxu0 %v8016_v3 }
  0xd2   : > { %6572 = vmatpush1.bf16.msra.mxu0 %v8022_v57 }
  0xd3   : > { %6574 = vmatprep.subr.bf16.mxu0 %v10174_v15  ;;  %v10192_v15 = vld [vmem:[#allocation28_spill] sm:$0xff] }
  0xd6   : > { %6576 = vmatpush1.bf16.msra.mxu0 %v10175_v44 }
  0xd7   : > { %6578 = vmatprep.subr.bf16.mxu0 %v8040_v45  ;;  %v1202_v45 = vlaneseq }
  0xda   : > { %6580 = vmatpush1.bf16.msra.mxu0 %v8046_v50 }
  0xdb   : > { %6582 = vmatprep.subr.bf16.mxu0 %v8050_v21 }
  0xde   : > { %6584 = vmatpush1.bf16.msra.mxu0 %v8052_v33 }
  0xdf   : > { %6586 = vmatprep.subr.bf16.mxu0 %v8054_v9 }
  0xe2   : > { %6588 = vmatpush1.bf16.msra.mxu0 %v8056_v23 }
  0xe3   : > { %6590 = vmatprep.subr.bf16.mxu0 %v10156_v36  ;;  %v10185_v36 = vld [vmem:[#allocation14_spill] sm:$0xff] }
  0xe5   : > { %1075 = vmatmul.mubr.f32.vlgmr.msra.gmra.mrb[0].mxu0 %v7806_v31 }
  0xe6   : > { %6592 = vmatpush1.bf16.msra.mxu0 %v10158_v60  ;;  %1177 = vmatprep.mubr.f32.mxu0 %v10152_v49 }
  0xe7   : > { %6594 = vmatprep.subr.bf16.mxu0 %v10159_v61  ;;  %v10186_v61 = vld [vmem:[#allocation26_spill] sm:$0xff] }
  0xea   : > { %6596 = vmatpush1.bf16.msra.mxu0 %v10160_v5 }
  0xeb   : > { %6598 = vmatprep.subr.bf16.mxu0 %v10161_v6  ;;  %v10187_v6 = vld [vmem:[#allocation24_spill] sm:$0xff] }
  0xee   : > { %6600 = vmatpush1.bf16.msra.mxu0 %v10162_v4 }
  0xef   : > { %6602 = vmatprep.subr.bf16.mxu0 %v10163_v47 }
  0xf2   : > { %6604 = vmatpush1.bf16.msra.mxu0 %v10164_v8  ;;  %v10188_v8 = vld [vmem:[#allocation21_spill] sm:$0xff] }
  0xf3   : > { %6606 = vmatprep.subr.bf16.mxu0 %v10165_v11 }
  0xf6   : > { %6608 = vmatpush1.bf16.msra.mxu0 %v10166_v24  ;;  %v10189_v24 = vld [vmem:[#allocation19_spill] sm:$0xff] }
  0xf7   : > { %6610 = vmatprep.subr.bf16.mxu0 %v10167_v14 }
  0xfa   : > { %6612 = vmatpush1.bf16.msra.mxu0 %v10168_v48 }
  0xfb   : > { %6614 = vmatprep.subr.bf16.mxu0 %v10169_v0  ;;  %v10190_v0 = vld [vmem:[#allocation33_spill] sm:$0xff] }
  0xfe   : > { %6616 = vmatpush1.bf16.msra.mxu0 %v10170_v29 }
  0xff   : > { %6618 = vmatprep.subr.bf16.mxu0 %v10171_v56  ;;  %v10191_v56 = vld [vmem:[#allocation29_spill] sm:$0xff] }
 0x102   : > { %6620 = vmatpush1.bf16.msra.mxu0 %v10172_v54 }
 0x105   : > { %1179 = vmatmul.mubr.f32.vlgmr.msra.gmra.mrb[0].mxu0 %v7806_v31  ;;  %v1203_v31 = vshrl.u32 %v1202_v45, 7  ;;  %v10198_v45 = vld [vmem:[#allocation44_spill] sm:$0xff] }
 0x107   : > { %v8150_v2 = vsub.s32 0, %v1203_v31 }
 0x1d8   : > { %v1180_v16 = vpop.f32.mrb[0].mxu0 }
 0x1d9   : > { %v6913_v19 = vadd.f32 %v1180_v16, %v329_v22  ;;  %v1182_v12 = vpop.f32.mrb[1].mxu0 }
 0x1da   : > { %v6914_v63 = vadd.f32 %v1182_v12, %v329_v22  ;;  %v10193_v22 = vld [vmem:[#allocation25_spill] sm:$0xff]  ;;  %v10194_v12 = vld [vmem:[#allocation38_spill] sm:$0xff] }
 0x1db   : > { %v1186_v55 = vsel %vm1185_vm0, %v6913_v19, -inf }
 0x1dc   : > { %v1187_v13 = vsel %vm1185_vm0, %v6914_v63, -inf }
 0x1dd   : > { %v1188_v7 = vmax.f32 %v1186_v55, %v1187_v13  ;;  %v10195_v55 = vld [vmem:[#allocation36_spill] sm:$0xff] }
 0x1df   : > { %1189 = vmax.xlane.f32.xlu0 %v1188_v7 }
 0x26c   : > { %v1190_v26 = vpop.xlane.xlu0 %1189 }
 0x26d   : > { %v1191_v3 = vsub.f32 %v6913_v19, %v1190_v26  ;;  %v1192_v57 = vsub.f32 %v6914_v63, %v1190_v26  ;;  %v10196_v26 = vld [vmem:[#allocation34_spill] sm:$0xff] }
 0x26f   : > { %v1193_v28 = vmul.f32 1.442695, %v1191_v3  ;;  %v1195_v23 = vmul.f32 1.442695, %v1192_v57  ;;  %v10197_v57 = vld [vmem:[#allocation30_spill] sm:$0xff] }
 0x271   : > { %7227 = vpow2.f32 %v1193_v28 }
 0x272   : > { %7229 = vpow2.f32 %v1195_v23 }
 0x27b   : > { %v7228_v50 = vpop.eup %7227 }
 0x27c   : > { %v7230_v17 = vpop.eup %7229  ;;  %v8153_v21 = vrot.slane %v7228_v50, %v8150_v2  ;;  %v1197_v33 = vsel %vm1185_vm0, %v7228_v50, 0.0  ;;  %v10199_v50 = vld [vmem:[#allocation40_spill] sm:$0xff] }
 0x27d   : > { %v8157_v9 = vrot.slane %v7230_v17, %v8150_v2  ;;  %v1198_v32 = vsel %vm1185_vm0, %v7230_v17, 0.0 }
 0x27e   : > { %v1199_v46 = vadd.f32 %v1198_v32, %v1197_v33  ;;  %v1210_v27 = vmul.f32 %v8153_v21, %v10176_v40  ;;  %v1214_v62 = vmul.f32 %v8153_v21, %v10177_v34  ;;  %v1212_v51 = vmul.f32 %v8153_v21, %v10180_v42  ;;  %v10200_v32 = vld [vmem:[#allocation39_spill] sm:$0xff]  ;;  %v10201_v40 = vld [vmem:[#allocation37_spill] sm:$0xff] }
 0x27f   : > { %v1211_v49 = vmul.f32 %v8157_v9, %v10178_v43  ;;  %v1215_v38 = vmul.f32 %v8157_v9, %v10179_v37  ;;  %v1213_v53 = vmul.f32 %v8157_v9, %v10181_v52  ;;  %v1218_v1 = vmul.f32 %v8153_v21, %v10182_v58  ;;  %v10205_v42 = vld [vmem:[#allocation41_spill] sm:$0xff]  ;;  %v10206_v58 = vld [vmem:[#allocation56_spill] sm:$0xff] }
 0x280   : > { %1200 = vadd.xlane.f32.xlu0 %v1199_v46  ;;  %v1219_v59 = vmul.f32 %v8157_v9, %v10183_v30  ;;  %v1216_v20 = vmul.f32 %v8153_v21, %v10184_v10  ;;  %v1217_v35 = vmul.f32 %v8157_v9, %v10185_v36  ;;  %v1222_v5 = vmul.f32 %v8153_v21, %v10186_v61  ;;  %v10207_v30 = vld [vmem:[#allocation51_spill] sm:$0xff]  ;;  %v1311_v10 = vld [vmem:[#allocation3] sm:$0xff] }
 0x281   : > { %v1242_v39 = vadd.f32 %v1211_v49, %v1210_v27  ;;  %v1248_v41 = vadd.f32 %v1215_v38, %v1214_v62  ;;  %v1245_v18 = vadd.f32 %v1213_v53, %v1212_v51  ;;  %v1223_v4 = vmul.f32 %v8157_v9, %v10187_v6  ;;  %v10202_v62 = vld [vmem:[#allocation55_spill] sm:$0xff]  ;;  %v10203_v49 = vld [vmem:[#allocation50_spill] sm:$0xff] }
 0x282   : > { %v1254_v60 = vadd.f32 %v1219_v59, %v1218_v1  ;;  %v1251_v47 = vadd.f32 %v1217_v35, %v1216_v20  ;;  %v1220_v11 = vmul.f32 %v8153_v21, %v10188_v8  ;;  %v1221_v14 = vmul.f32 %v8157_v9, %v10189_v24  ;;  %v1312_v24 = vld [vmem:[#allocation3 + $0x8] sm:$0xff] }
 0x283   : > { %1243 = vadd.xlane.f32.xlu1 %v1242_v39  ;;  %v1260_v48 = vadd.f32 %v1223_v4, %v1222_v5  ;;  %v1226_v29 = vmul.f32 %v8153_v21, %v10190_v0  ;;  %v1227_v54 = vmul.f32 %v8157_v9, %v10191_v56  ;;  %v1224_v44 = vmul.f32 %v8153_v21, %v10192_v15  ;;  %v10204_v39 = vld [vmem:[#allocation45_spill] sm:$0xff] }
 0x284   : > { %1249 = vadd.xlane.f32.xlu0 %v1248_v41  ;;  %v1257_v25 = vadd.f32 %v1221_v14, %v1220_v11  ;;  %v1225_v16 = vmul.f32 %v8157_v9, %v10193_v22  ;;  %v1230_v63 = vmul.f32 %v8153_v21, %v10194_v12  ;;  %v1231_v13 = vmul.f32 %v8157_v9, %v10195_v55  ;;  %v1313_v14 = vld [vmem:[#allocation3 + $0x10] sm:$0xff]  ;;  %v1314_v12 = vld [vmem:[#allocation3 + $0x18] sm:$0xff] }
 0x285   : > { %v1266_v19 = vadd.f32 %v1227_v54, %v1226_v29  ;;  %v1228_v3 = vmul.f32 %v8153_v21, %v10196_v26  ;;  %v1229_v28 = vmul.f32 %v8157_v9, %v10197_v57  ;;  %v1234_v31 = vmul.f32 %v8153_v21, %v10198_v45 }
 0x286   : > { %v1263_v7 = vadd.f32 %v1225_v16, %v1224_v44  ;;  %v1272_v23 = vadd.f32 %v1231_v13, %v1230_v63  ;;  %v1235_v17 = vmul.f32 %v8157_v9, %v10199_v50  ;;  %v1232_v46 = vmul.f32 %v8153_v21, %v10200_v32  ;;  %v1315_v50 = vld [vmem:[#allocation3 + $0x20] sm:$0xff] }
 0x287   : > { %1246 = vadd.xlane.f32.xlu1 %v1245_v18  ;;  %v1269_v33 = vadd.f32 %v1229_v28, %v1228_v3  ;;  %v1233_v27 = vmul.f32 %v8157_v9, %v10201_v40  ;;  %v1238_v43 = vmul.f32 %v8153_v21, %v10202_v62  ;;  %v1239_v37 = vmul.f32 %v8157_v9, %v10203_v49 }
 0x288   : > { %1255 = vadd.xlane.f32.xlu0 %v1254_v60  ;;  %v1278_v34 = vadd.f32 %v1235_v17, %v1234_v31  ;;  %v1236_v41 = vmul.f32 %v8153_v21, %v10204_v39  ;;  %v1237_v51 = vmul.f32 %v8157_v9, %v10205_v42  ;;  %v1240_v1 = vmul.f32 %v8153_v21, %v10206_v58 }
 0x289   : > { %v1275_v38 = vadd.f32 %v1233_v27, %v1232_v46  ;;  %v1284_v52 = vadd.f32 %v1239_v37, %v1238_v43  ;;  %v1241_v59 = vmul.f32 %v8157_v9, %v10207_v30  ;;  %v8224_v20 = vand.u32 4294901760, %v1311_v10  ;;  %v1316_v46 = vld [vmem:[#allocation3 + $0x28] sm:$0xff] }
 0x28a   : > { %v1281_v53 = vadd.f32 %v1237_v51, %v1236_v41  ;;  %v8244_v15 = vand.u32 4294901760, %v1313_v14  ;;  %v8259_v28 = vand.u32 4294901760, %v1314_v12  ;;  %v8279_v39 = vand.u32 4294901760, %v1315_v50 }
 0x28b   : > { %1252 = vadd.xlane.f32.xlu1 %v1251_v47  ;;  %v1287_v18 = vadd.f32 %v1241_v59, %v1240_v1  ;;  %v8227_v36 = vsub.f32 %v1311_v10, %v8224_v20  ;;  %v8282_v41 = vand.u32 4294901760, %v1316_v46 }
 0x28c   : > { %1261 = vadd.xlane.f32.xlu0 %v1260_v48  ;;  %v8257_v57 = vsub.f32 %v1313_v14, %v8244_v15  ;;  %v8272_v62 = vsub.f32 %v1314_v12, %v8259_v28 }
 0x28d   : > { %v9921_v35 = vand.u32 4294901760, %v8227_v36 }
 0x28f   : > { %1258 = vadd.xlane.f32.xlu1 %v1257_v25  ;;  %v1411_v60 = vsub.f32 %v8227_v36, %v9921_v35  ;;  %v8242_v25 = vand.u32 4294901760, %v1312_v24 }
 0x290   : > { %1267 = vadd.xlane.f32.xlu0 %v1266_v19 }
 0x291   : > { %v1412_v61 = vand.u32 4294901760, %v1411_v60  ;;  %v8254_v3 = vsub.f32 %v1312_v24, %v8242_v25  ;;  %v8300_v60 = vsub.f32 %v1315_v50, %v8279_v39 }
 0x293   : > { %1264 = vadd.xlane.f32.xlu1 %v1263_v7  ;;  %5813 = vmatprep.mubr.f32.mxu1 %v1412_v61  ;;  %v9920_v27 = vand.u32 4294901760, %v8254_v3 }
 0x294   : > { %1273 = vadd.xlane.f32.xlu0 %v1272_v23 }
 0x295   : > { %v8289_v58 = vsub.f32 %v8254_v3, %v9920_v27 }
 0x297   : > { %1270 = vadd.xlane.f32.xlu1 %v1269_v33 }
 0x298   : > { %1279 = vadd.xlane.f32.xlu0 %v1278_v34  ;;  %v9919_v34 = vand.u32 4294901760, %v8257_v57 }
 0x29a   : > { %v8297_v10 = vsub.f32 %v8257_v57, %v9919_v34 }
 0x29b   : > { %1276 = vadd.xlane.f32.xlu1 %v1275_v38 }
 0x29c   : > { %1285 = vadd.xlane.f32.xlu0 %v1284_v52  ;;  %v1317_v52 = vld [vmem:[#allocation3 + $0x30] sm:$0xff] }
 0x29f   : > { %1282 = vadd.xlane.f32.xlu1 %v1281_v53 }
 0x2a3   : > { %1288 = vadd.xlane.f32.xlu1 %v1287_v18 }
 0x30d   : > { %v1201_v21 = vpop.xlane.xlu0 %1200 }
 0x30e   : > { %v1293_v9 = vrot.slane %v1201_v21, %v8150_v2 }
 0x310   : > { %7231 = vrcp.f32 %v1293_v9  ;;  %v1244_v5 = vpop.xlane.xlu1 %1243  ;;  %v8307_v9 = vsub.f32 %v1316_v46, %v8282_v41 }
 0x311   : > { %v1250_v6 = vpop.xlane.xlu0 %1249 }
 0x314   : > { %v1247_v4 = vpop.xlane.xlu1 %1246 }
 0x315   : > { %v1256_v47 = vpop.xlane.xlu0 %1255 }
 0x318   : > { %v1253_v8 = vpop.xlane.xlu1 %1252 }
 0x319   : > { %v1262_v11 = vpop.xlane.xlu0 %1261 }
 0x31a   : > { %v8234_v48 = vpop.eup %7231 }
 0x31b   : > { %v1295_v0 = vmul.f32 %v8234_v48, %v1244_v5  ;;  %v1297_v29 = vmul.f32 %v8234_v48, %v1250_v6  ;;  %v1296_v56 = vmul.f32 %v8234_v48, %v1247_v4  ;;  %v8240_v54 = vmul.f32 %v8234_v48, %v1253_v8 }
 0x31c   : > { %v1259_v2 = vpop.xlane.xlu1 %1258  ;;  %v1299_v7 = vmul.f32 %v8234_v48, %v1256_v47  ;;  %v1301_v33 = vmul.f32 %v8234_v48, %v1262_v11  ;;  %v8309_v5 = vand.u32 4294901760, %v1317_v52  ;;  %v8317_v11 = vld [vmem:[#allocation3 + $0x38] sm:$0xff] }
 0x31d   : > { %v1328_v44 = vand.u32 4294901760, %v1295_v0  ;;  %v1334_v22 = vand.u32 4294901760, %v1297_v29  ;;  %v1331_v16 = vand.u32 4294901760, %v1296_v56  ;;  %v1268_v19 = vpop.xlane.xlu0 %1267  ;;  %v1337_v63 = vand.u32 4294901760, %v8240_v54 }
 0x31e   : > { %v8248_v55 = vmul.f32 %v8234_v48, %v1259_v2  ;;  %v1340_v17 = vand.u32 4294901760, %v1299_v7  ;;  %v1346_v42 = vand.u32 4294901760, %v1301_v33  ;;  %v1303_v51 = vmul.f32 %v8234_v48, %v1268_v19 }
 0x31f   : > { %v8250_v13 = vpack.c.bf16 %v1331_v16, %v1328_v44  ;;  %v8261_v23 = vpack.c.bf16 %v1337_v63, %v1334_v22  ;;  %v8302_v61 = vsub.f32 %v1295_v0, %v1328_v44  ;;  %v8311_v6 = vsub.f32 %v1297_v29, %v1334_v22 }
 0x320   : > { %v1265_v26 = vpop.xlane.xlu1 %1264  ;;  %v1343_v45 = vand.u32 4294901760, %v8248_v55  ;;  %v8313_v4 = vsub.f32 %v1296_v56, %v1331_v16  ;;  %v1352_v47 = vand.u32 4294901760, %v1303_v51  ;;  %v8319_v24 = vsub.f32 %v1299_v7, %v1340_v17 }
 0x321   : > { %6622 = vmatprep.subr.bf16.mxu1 %v8250_v13  ;;  %v1274_v31 = vpop.xlane.xlu0 %1273  ;;  %v1302_v32 = vmul.f32 %v8234_v48, %v1265_v26  ;;  %v8322_v14 = vsub.f32 %v8240_v54, %v1337_v63  ;;  %v1491_v19 = vand.u32 4294901760, %v8302_v61  ;;  %v8331_v12 = vsub.f32 %v1301_v33, %v1346_v42 }
 0x322   : > { %6624 = vmatpush3.bf16.msra.mxu1 %v8250_v13  ;;  %v8276_v43 = vpack.c.bf16 %v1343_v45, %v1340_v17  ;;  %v1305_v8 = vmul.f32 %v8234_v48, %v1274_v31  ;;  %v8335_v54 = vsub.f32 %v1317_v52, %v8309_v5  ;;  %v8338_v63 = vand.u32 4294901760, %v8317_v11 }
 0x323   : > { %6626 = vmatprep.subr.bf16.mxu1 %v8261_v23  ;;  %v1349_v49 = vand.u32 4294901760, %v1302_v32  ;;  %v1505_v7 = vand.u32 4294901760, %v8311_v6  ;;  %v1498_v26 = vand.u32 4294901760, %v8313_v4  ;;  %v1512_v33 = vand.u32 4294901760, %v8322_v14 }
 0x324   : > { %v1271_v40 = vpop.xlane.xlu1 %1270  ;;  %v1358_v31 = vand.u32 4294901760, %v1305_v8 }
 0x325   : > { %v1304_v37 = vmul.f32 %v8234_v48, %v1271_v40  ;;  %v1280_v38 = vpop.xlane.xlu0 %1279  ;;  %v8292_v30 = vpack.c.bf16 %v1349_v49, %v1346_v42  ;;  %v8348_v42 = vsub.f32 %v8248_v55, %v1343_v45  ;;  %v8350_v52 = vsub.f32 %v1302_v32, %v1349_v49 }
 0x326   : > { %6628 = vmatpush3.bf16.msra.mxu1 %v8261_v23  ;;  %v1307_v0 = vmul.f32 %v8234_v48, %v1280_v38  ;;  %v8364_v16 = vsub.f32 %v1305_v8, %v1358_v31  ;;  %v1492_v45 = vsub.f32 %v8302_v61, %v1491_v19  ;;  %v1499_v32 = vsub.f32 %v8313_v4, %v1498_v26 }
 0x327   : > { %6630 = vmatprep.subr.bf16.mxu1 %v8276_v43  ;;  %v1355_v59 = vand.u32 4294901760, %v1304_v37  ;;  %v8393_v17 = vpack.c.bf16 %v1512_v33, %v1505_v7 }
 0x328   : > { %v1277_v53 = vpop.xlane.xlu1 %1276  ;;  %v1364_v46 = vand.u32 4294901760, %v1307_v0 }
 0x329   : > { %v1286_v18 = vpop.xlane.xlu0 %1285  ;;  %v1306_v21 = vmul.f32 %v8234_v48, %v1277_v53  ;;  %v8326_v44 = vpack.c.bf16 %v1355_v59, %v1352_v47  ;;  %v8357_v34 = vsub.f32 %v1304_v37, %v1355_v59  ;;  %v1526_v59 = vand.u32 4294901760, %v8348_v42  ;;  %10209 = vst [vmem:[#allocation54_spill] sm:$0xff] %v8393_v17 }
 0x32a   : > { %6632 = vmatpush3.bf16.msra.mxu1 %v8276_v43  ;;  %v1309_v2 = vmul.f32 %v8234_v48, %v1286_v18  ;;  %v8370_v49 = vsub.f32 %v1307_v0, %v1364_v46  ;;  %v1513_v0 = vsub.f32 %v8322_v14, %v1512_v33 }
 0x32b   : > { %6634 = vmatprep.subr.bf16.mxu1 %v8292_v30  ;;  %v1361_v56 = vand.u32 4294901760, %v1306_v21 }
 0x32c   : > { %v1283_v29 = vpop.xlane.xlu1 %1282  ;;  %v1370_v40 = vand.u32 4294901760, %v1309_v2 }
 0x32d   : > { %v1308_v22 = vmul.f32 %v8234_v48, %v1283_v29  ;;  %v8352_v53 = vpack.c.bf16 %v1361_v56, %v1358_v31  ;;  %v8355_v29 = vsub.f32 %v1303_v51, %v1352_v47  ;;  %v8359_v27 = vsub.f32 %v1306_v21, %v1361_v56 }
 0x32e   : > { %6636 = vmatpush3.bf16.msra.mxu1 %v8292_v30  ;;  %v8372_v37 = vsub.f32 %v1309_v2, %v1370_v40  ;;  %v1506_v51 = vsub.f32 %v8311_v6, %v1505_v7  ;;  %v1540_v21 = vand.u32 4294901760, %v8350_v52  ;;  %v8391_v56 = vpack.c.bf16 %v1498_v26, %v1491_v19 }
 0x32f   : > { %v1367_v50 = vand.u32 4294901760, %v1308_v22  ;;  %6638 = vmatprep.subr.bf16.mxu1 %v8326_v44  ;;  %10208 = vst [vmem:[#allocation52_spill] sm:$0xff] %v8352_v53  ;;  %v10210_v2 = vand.u32 4294901760, %v8319_v24  ;;  %v10215_v19 = vand.u32 4294901760, %v8364_v16  ;;  %v10216_v7 = vand.u32 4294901760, %v8359_v27 }
 0x330   : > { %v1289_v38 = vpop.xlane.xlu1 %1288  ;;  %v9928_v1 = vand.u32 4294901760, %v8372_v37 }
 0x331   : > { %v1310_v18 = vmul.f32 %v8234_v48, %v1289_v38  ;;  %v8361_v35 = vsub.f32 %v1308_v22, %v1367_v50  ;;  %v1533_v48 = vand.u32 4294901760, %v8331_v12  ;;  %v8377_v47 = vpack.c.bf16 %v1367_v50, %v1364_v46 }
 0x332   : > { %6640 = vmatpush3.bf16.msra.mxu1 %v8326_v44  ;;  %v1554_v22 = vand.u32 4294901760, %v8357_v34  ;;  %v1493_v50 = vand.u32 4294901760, %v1492_v45  ;;  %v1500_v46 = vand.u32 4294901760, %v1499_v32  ;;  %v10213_v45 = vand.u32 4294901760, %v8355_v29 }
 0x333   : > { %v1373_v55 = vand.u32 4294901760, %v1310_v18  ;;  %6642 = vmatprep.subr.bf16.mxu1 %v8352_v53  ;;  %v8402_v38 = vpack.c.bf16 %v1540_v21, %v1533_v48  ;;  %v8413_v26 = vpack.c.bf16 %v10216_v7, %v10215_v19  ;;  %v10218_v33 = vand.u32 4294901760, %v8361_v35 }
 0x334   : > { %v8407_v32 = vpack.c.bf16 %v1554_v22, %v10213_v45  ;;  %v1422_v45 = vand.u32 4294901760, %v8289_v58  ;;  %v10223_v58 = vand.u32 4294901760, %v8300_v60  ;;  %v10224_v7 = vand.u32 4294901760, %v8319_v24 }
 0x335   : > { %v8379_v8 = vsub.f32 %v1310_v18, %v1373_v55  ;;  %v9925_v18 = vand.u32 4294901760, %v8370_v49  ;;  %v8395_v31 = vpack.c.bf16 %v1373_v55, %v1370_v40  ;;  %10212 = vst [vmem:[#allocation18_spill] sm:$0xff] %v8402_v38  ;;  %10217 = vst [vmem:[#allocation22_spill] sm:$0xff] %v8413_v26  ;;  %v1514_v26 = vand.u32 4294901760, %v1513_v0 }
 0x336   : > { %6644 = vmatpush3.bf16.msra.mxu1 %v8352_v53  ;;  %v8400_v53 = vpack.c.bf16 %v1526_v59, %v10210_v2  ;;  %10214 = vst [vmem:[#allocation58_spill] sm:$0xff] %v8407_v32  ;;  %v10222_v32 = vand.u32 4294901760, %v8272_v62 }
 0x337   : > { %6646 = vmatprep.subr.bf16.mxu1 %v8377_v47  ;;  %v8419_v40 = vpack.c.bf16 %v10218_v33, %v9925_v18  ;;  %v10220_v55 = vand.u32 4294901760, %v8379_v8  ;;  %v8435_v33 = vsub.f32 %v8317_v11, %v8338_v63  ;;  %v6653_v18 = vpack.c.bf16 %v1500_v46, %v1493_v50 }
 0x338   : > { %10211 = vst [vmem:[#allocation57_spill] sm:$0xff] %v8400_v53  ;;  %v1441_v19 = vsub.f32 %v8272_v62, %v10222_v32  ;;  %v1470_v32 = vand.u32 4294901760, %v8335_v54  ;;  %v1520_v11 = vsub.f32 %v8319_v24, %v10224_v7  ;;  %v1534_v7 = vsub.f32 %v8331_v12, %v1533_v48 }
 0x339   : > { %10219 = vst [vmem:[#allocation23_spill] sm:$0xff] %v8419_v40  ;;  %v8425_v2 = vpack.c.bf16 %v10220_v55, %v9928_v1  ;;  %v1507_v40 = vand.u32 4294901760, %v1506_v51  ;;  %v1527_v55 = vsub.f32 %v8348_v42, %v1526_v59  ;;  %v1432_v1 = vand.u32 4294901760, %v8297_v10 }
 0x33a   : > { %6648 = vmatpush3.bf16.msra.mxu1 %v8377_v47  ;;  %v1442_v50 = vand.u32 4294901760, %v1441_v19  ;;  %v10225_v51 = vand.u32 4294901760, %v8307_v9  ;;  %v1541_v10 = vsub.f32 %v8350_v52, %v1540_v21  ;;  %v1480_v38 = vand.u32 4294901760, %v8435_v33 }
 0x33b   : > { %10221 = vst [vmem:[#allocation27_spill] sm:$0xff] %v8425_v2  ;;  %6650 = vmatprep.subr.bf16.mxu1 %v8395_v31  ;;  %v1451_v2 = vsub.f32 %v8300_v60, %v10223_v58  ;;  %v6657_v0 = vpack.c.bf16 %v1514_v26, %v1507_v40  ;;  %v1528_v46 = vand.u32 4294901760, %v1527_v55  ;;  %v1471_v53 = vsub.f32 %v8335_v54, %v1470_v32 }
 0x33c   : > { %v1461_v59 = vsub.f32 %v8307_v9, %v10225_v51  ;;  %v1521_v19 = vand.u32 4294901760, %v1520_v11  ;;  %v1555_v26 = vsub.f32 %v8357_v34, %v1554_v22  ;;  %v1481_v21 = vsub.f32 %v8435_v33, %v1480_v38 }
 0x33d   : > { %v1452_v58 = vand.u32 4294901760, %v1451_v2  ;;  %v10226_v40 = vand.u32 4294901760, %v8355_v29  ;;  %v10227_v11 = vand.u32 4294901760, %v8359_v27 }
 0x33e   : > { %6652 = vmatpush3.bf16.msra.mxu1 %v8395_v31  ;;  %v1462_v17 = vand.u32 4294901760, %v1461_v59  ;;  %v6661_v51 = vpack.c.bf16 %v1528_v46, %v1521_v19  ;;  %v1556_v55 = vand.u32 4294901760, %v1555_v26 }
 0x33f   : > { %6654 = vmatprep.subr.bf16.mxu1 %v6653_v18  ;;  %v1548_v2 = vsub.f32 %v8355_v29, %v10226_v40  ;;  %v1569_v22 = vsub.f32 %v8359_v27, %v10227_v11  ;;  %v10232_v40 = vand.u32 4294901760, %v8372_v37 }
 0x341   : > { %5814 = vmatmul.mubr.f32.vlgmr.msra.gmra.mrb[0].mxu1 %v1422_v45  ;;  %v1542_v45 = vand.u32 4294901760, %v1541_v10  ;;  %v1549_v59 = vand.u32 4294901760, %v1548_v2  ;;  %v1570_v10 = vand.u32 4294901760, %v1569_v22  ;;  %v1590_v2 = vsub.f32 %v8372_v37, %v10232_v40 }
 0x342   : > { %6656 = vmatpush3.bf16.msra.mxu1 %v6653_v18  ;;  %5816 = vmatprep.mubr.f32.mxu1 %v1432_v1  ;;  %v1472_v1 = vand.u32 4294901760, %v1471_v53  ;;  %v1535_v18 = vand.u32 4294901760, %v1534_v7  ;;  %v10228_v53 = vand.u32 4294901760, %v8364_v16  ;;  %v10230_v7 = vand.u32 4294901760, %v8370_v49 }
 0x343   : > { %6658 = vmatprep.subr.bf16.mxu1 %v6657_v0  ;;  %v6669_v46 = vpack.c.bf16 %v1556_v55, %v1549_v59  ;;  %v1591_v11 = vand.u32 4294901760, %v1590_v2  ;;  %v6689_v59 = vpack.c.bf16 %v8322_v14, %v8311_v6  ;;  %v6701_v6 = vpack.c.bf16 %v8357_v34, %v8355_v29  ;;  %v8519_v14 = vld [vmem:[%s9829_s4 + $0x10] sm:$0xff]  ;;  %v8579_v29 = vld [vmem:[%s9829_s4 + $0x38] sm:$0xff] }
 0x344   : > { %v6665_v48 = vpack.c.bf16 %v1542_v45, %v1535_v18  ;;  %v6705_v34 = vpack.c.bf16 %v8359_v27, %v8364_v16  ;;  %v8532_v27 = vld [vmem:[%s9829_s4 + $0x18] sm:$0xff] }
 0x345   : > { %5817 = vmatmul.mubr.f32.gmra.mrb[2].mxu1 %v1442_v50  ;;  %v1482_v50 = vand.u32 4294901760, %v1481_v21  ;;  %v10231_v21 = vand.u32 4294901760, %v8379_v8 }
 0x346   : > { %6660 = vmatpush3.bf16.msra.mxu1 %v6657_v0  ;;  %5819 = vmatprep.mubr.f32.mxu1 %v1452_v58  ;;  %v1562_v0 = vsub.f32 %v8364_v16, %v10228_v53  ;;  %v10229_v58 = vand.u32 4294901760, %v8361_v35  ;;  %v6693_v53 = vpack.c.bf16 %v8348_v42, %v8319_v24  ;;  %v8510_v24 = vld [vmem:[%s9829_s4] sm:$0xff]  ;;  %v6713_v16 = vpack.c.bf16 %v8379_v8, %v8372_v37  ;;  %v8553_v42 = vld [vmem:[%s9829_s4 + $0x28] sm:$0xff] }
 0x347   : > { %6662 = vmatprep.subr.bf16.mxu1 %v6661_v51  ;;  %2321 = vrot.lane.b32.xlu0 %v8510_v24, %s7433_s25  ;;  %v10234_v37 = vld [vmem:[#allocation52_spill] sm:$0xff] }
 0x348   : > { %v1583_v19 = vsub.f32 %v8361_v35, %v10229_v58  ;;  %v10240_v58 = vld [vmem:[#allocation57_spill] sm:$0xff] }
 0x349   : > { %5820 = vmatmul.mubr.f32.gmra.mrb[4].mxu1 %v1462_v17  ;;  %v1563_v17 = vand.u32 4294901760, %v1562_v0  ;;  %v10237_v0 = vld [vmem:[#allocation54_spill] sm:$0xff] }
 0x34a   : > { %6664 = vmatpush3.bf16.msra.mxu1 %v6661_v51  ;;  %5822 = vmatprep.mubr.f32.mxu1 %v1472_v1  ;;  %v1576_v51 = vsub.f32 %v8370_v49, %v10230_v7  ;;  %v1584_v26 = vand.u32 4294901760, %v1583_v19  ;;  %v1597_v1 = vsub.f32 %v8379_v8, %v10231_v21  ;;  %v10236_v8 = vand.u32 4294901760, %v8257_v57 }
 0x34b   : > { %6666 = vmatprep.subr.bf16.mxu1 %v6665_v48  ;;  %v6673_v45 = vpack.c.bf16 %v1570_v10, %v1563_v17  ;;  %2325 = vrot.lane.b32.xlu0 %v8519_v14, %s7433_s25  ;;  %v10239_v10 = vand.u32 4294901760, %v8300_v60 }
 0x34c   : > { %v1577_v18 = vand.u32 4294901760, %v1576_v51  ;;  %v1598_v55 = vand.u32 4294901760, %v1597_v1 }
 0x34d   : > { %5823 = vmatmul.mubr.f32.gmra.mrb[6].mxu1 %v1482_v50  ;;  %v6685_v50 = vpack.c.bf16 %v8313_v4, %v8302_v61  ;;  %v6697_v61 = vpack.c.bf16 %v8350_v52, %v8331_v12  ;;  %v8502_v4 = vld [vmem:[%s9829_s4 + $0x8] sm:$0xff]  ;;  %v6709_v12 = vpack.c.bf16 %v8361_v35, %v8370_v49  ;;  %v8541_v35 = vld [vmem:[%s9829_s4 + $0x20] sm:$0xff]  ;;  %v8561_v52 = vld [vmem:[%s9829_s4 + $0x30] sm:$0xff]  ;;  %v10233_v49 = vand.u32 4294901760, %v8227_v36 }
 0x34e   : > { %6668 = vmatpush3.bf16.msra.mxu1 %v6665_v48  ;;  %5857 = vmatprep.mubr.f32.mxu1 %v8224_v20  ;;  %v6677_v48 = vpack.c.bf16 %v1584_v26, %v1577_v18  ;;  %v6681_v22 = vpack.c.bf16 %v1598_v55, %v1591_v11 }
 0x34f   : > { %6670 = vmatprep.subr.bf16.mxu1 %v6669_v46  ;;  %2323 = vrot.lane.b32.xlu1 %v8502_v4, %s7433_s25 }
 0x350   : > { %2341 = vrot.lane.b32.xlu0 %v8519_v14, %s7434_s17 }
 0x352   : > { %6672 = vmatpush3.bf16.msra.mxu1 %v6669_v46  ;;  %v10238_v46 = vand.u32 4294901760, %v8272_v62 }
 0x353   : > { %6674 = vmatprep.subr.bf16.mxu1 %v6673_v45  ;;  %2337 = vrot.lane.b32.xlu1 %v8510_v24, %s7434_s17 }
 0x354   : > { %2403 = vrot.lane.b32.xlu0 %v8541_v35, %s7433_s25 }
 0x356   : > { %6676 = vmatpush3.bf16.msra.mxu1 %v6673_v45 }
 0x357   : > { %6678 = vmatprep.subr.bf16.mxu1 %v6677_v48  ;;  %2339 = vrot.lane.b32.xlu1 %v8502_v4, %s7434_s17 }
 0x358   : > { %2419 = vrot.lane.b32.xlu0 %v8541_v35, %s7434_s17 }
 0x35a   : > { %6680 = vmatpush3.bf16.msra.mxu1 %v6677_v48 }
 0x35b   : > { %6682 = vmatprep.subr.bf16.mxu1 %v6681_v22  ;;  %2327 = vrot.lane.b32.xlu1 %v8532_v27, %s7433_s25 }
 0x35c   : > { %2407 = vrot.lane.b32.xlu0 %v8561_v52, %s7433_s25 }
 0x35e   : > { %6684 = vmatpush3.bf16.msra.mxu1 %v6681_v22 }
 0x35f   : > { %6686 = vmatprep.subr.bf16.mxu1 %v6685_v50  ;;  %2343 = vrot.lane.b32.xlu1 %v8532_v27, %s7434_s17 }
 0x360   : > { %2423 = vrot.lane.b32.xlu0 %v8561_v52, %s7434_s17 }
 0x361   : > { %5858 = vmatmul.mubr.f32.vlgmr.msra.gmra.mrb[0].mxu1 %v8242_v25 }
 0x362   : > { %6688 = vmatpush3.bf16.msra.mxu1 %v6685_v50  ;;  %5860 = vmatprep.mubr.f32.mxu1 %v8244_v15 }
 0x363   : > { %6690 = vmatprep.subr.bf16.mxu1 %v6689_v59  ;;  %2405 = vrot.lane.b32.xlu1 %v8553_v42, %s7433_s25 }
 0x365   : > { %5861 = vmatmul.mubr.f32.gmra.mrb[2].mxu1 %v8259_v28 }
 0x366   : > { %6692 = vmatpush3.bf16.msra.mxu1 %v6689_v59  ;;  %5863 = vmatprep.mubr.f32.mxu1 %v8279_v39 }
 0x367   : > { %6694 = vmatprep.subr.bf16.mxu1 %v6693_v53  ;;  %2421 = vrot.lane.b32.xlu1 %v8553_v42, %s7434_s17 }
 0x369   : > { %5864 = vmatmul.mubr.f32.gmra.mrb[4].mxu1 %v8282_v41 }
 0x36a   : > { %6696 = vmatpush3.bf16.msra.mxu1 %v6693_v53  ;;  %5866 = vmatprep.mubr.f32.mxu1 %v8309_v5 }
 0x36b   : > { %6698 = vmatprep.subr.bf16.mxu1 %v6697_v61  ;;  %2409 = vrot.lane.b32.xlu1 %v8579_v29, %s7433_s25 }
 0x36d   : > { %5867 = vmatmul.mubr.f32.gmra.mrb[6].mxu1 %v8338_v63 }
 0x36e   : > { %6700 = vmatpush3.bf16.msra.mxu1 %v6697_v61  ;;  %5901 = vmatprep.mubr.f32.mxu1 %v8227_v36  ;;  %v10235_v36 = vand.u32 4294901760, %v8254_v3 }
 0x36f   : > { %6702 = vmatprep.subr.bf16.mxu1 %v6701_v6  ;;  %2425 = vrot.lane.b32.xlu1 %v8579_v29, %s7434_s17 }
 0x372   : > { %6704 = vmatpush3.bf16.msra.mxu1 %v6701_v6 }
 0x373   : > { %6706 = vmatprep.subr.bf16.mxu1 %v6705_v34 }
 0x376   : > { %6708 = vmatpush3.bf16.msra.mxu1 %v6705_v34 }
 0x377   : > { %6710 = vmatprep.subr.bf16.mxu1 %v6709_v12 }
 0x37a   : > { %6712 = vmatpush3.bf16.msra.mxu1 %v6709_v12 }
 0x37b   : > { %6714 = vmatprep.subr.bf16.mxu1 %v6713_v16 }
 0x37e   : > { %6716 = vmatpush3.bf16.msra.mxu1 %v6713_v16 }
 0x37f   : > { %6718 = vmatprep.subr.bf16.mxu1 %v8250_v13 }
 0x381   : > { %5902 = vmatmul.mubr.f32.vlgmr.msra.gmra.mrb[0].mxu1 %v8254_v3  ;;  %v10241_v3 = vand.u32 4294901760, %v8307_v9 }
 0x382   : > { %6720 = vmatpush3.bf16.msra.mxu1 %v8250_v13  ;;  %5904 = vmatprep.mubr.f32.mxu1 %v8257_v57  ;;  %v10242_v57 = vld [vmem:[#allocation18_spill] sm:$0xff] }
 0x383   : > { %6722 = vmatprep.subr.bf16.mxu1 %v8261_v23 }
 0x385   : > { %5905 = vmatmul.mubr.f32.gmra.mrb[2].mxu1 %v8272_v62  ;;  %v10243_v62 = vld [vmem:[#allocation58_spill] sm:$0xff] }
 0x386   : > { %6724 = vmatpush3.bf16.msra.mxu1 %v8261_v23  ;;  %5907 = vmatprep.mubr.f32.mxu1 %v8300_v60  ;;  %v10244_v60 = vld [vmem:[#allocation22_spill] sm:$0xff] }
 0x387   : > { %6726 = vmatprep.subr.bf16.mxu1 %v8276_v43 }
 0x389   : > { %5908 = vmatmul.mubr.f32.gmra.mrb[4].mxu1 %v8307_v9  ;;  %v10245_v9 = vld [vmem:[#allocation23_spill] sm:$0xff] }
 0x38a   : > { %6728 = vmatpush3.bf16.msra.mxu1 %v8276_v43  ;;  %5910 = vmatprep.mubr.f32.mxu1 %v8335_v54  ;;  %v10246_v54 = vld [vmem:[#allocation27_spill] sm:$0xff] }
 0x38b   : > { %6730 = vmatprep.subr.bf16.mxu1 %v8292_v30 }
 0x38d   : > { %5911 = vmatmul.mubr.f32.gmra.mrb[6].mxu1 %v8435_v33 }
 0x38e   : > { %6732 = vmatpush3.bf16.msra.mxu1 %v8292_v30  ;;  %5945 = vmatprep.mubr.f32.mxu1 %v10233_v49 }
 0x38f   : > { %6734 = vmatprep.subr.bf16.mxu1 %v8326_v44 }
 0x392   : > { %6736 = vmatpush3.bf16.msra.mxu1 %v8326_v44 }
 0x393   : > { %6738 = vmatprep.subr.bf16.mxu1 %v10234_v37 }
 0x396   : > { %6740 = vmatpush3.bf16.msra.mxu1 %v10234_v37 }
 0x397   : > { %6742 = vmatprep.subr.bf16.mxu1 %v8377_v47 }
 0x39a   : > { %6744 = vmatpush3.bf16.msra.mxu1 %v8377_v47 }
 0x39b   : > { %6746 = vmatprep.subr.bf16.mxu1 %v8395_v31 }
 0x39e   : > { %6748 = vmatpush3.bf16.msra.mxu1 %v8395_v31 }
 0x39f   : > { %6750 = vmatprep.subr.bf16.mxu1 %v8391_v56 }
 0x3a1   : > { %5946 = vmatmul.mubr.f32.vlgmr.msra.gmra.mrb[0].mxu1 %v10235_v36 }
 0x3a2   : > { %6752 = vmatpush3.bf16.msra.mxu1 %v8391_v56  ;;  %5948 = vmatprep.mubr.f32.mxu1 %v10236_v8 }
 0x3a3   : > { %6754 = vmatprep.subr.bf16.mxu1 %v10237_v0 }
 0x3a5   : > { %5949 = vmatmul.mubr.f32.gmra.mrb[2].mxu1 %v10238_v46 }
 0x3a6   : > { %6756 = vmatpush3.bf16.msra.mxu1 %v10237_v0  ;;  %5951 = vmatprep.mubr.f32.mxu1 %v10239_v10  ;;  %v2440_v0 = vld [vmem:[%s9830_s5 + $0x8] sm:$0xff]  ;;  %v2441_v10 = vld [vmem:[%s9830_s5 + $0x10] sm:$0xff] }
 0x3a7   : > { %6758 = vmatprep.subr.bf16.mxu1 %v10240_v58 }
 0x3a9   : > { %5952 = vmatmul.mubr.f32.gmra.mrb[4].mxu1 %v10241_v3 }
 0x3aa   : > { %6760 = vmatpush3.bf16.msra.mxu1 %v10240_v58  ;;  %5954 = vmatprep.mubr.f32.mxu1 %v1470_v32 }
 0x3ab   : > { %6762 = vmatprep.subr.bf16.mxu1 %v10242_v57 }
 0x3ad   : > { %5955 = vmatmul.mubr.f32.gmra.mrb[6].mxu1 %v1480_v38 }
 0x3ae   : > { %6764 = vmatpush3.bf16.msra.mxu1 %v10242_v57  ;;  %5989 = vmatprep.mubr.f32.mxu1 %v8224_v20 }
 0x3af   : > { %6766 = vmatprep.subr.bf16.mxu1 %v10243_v62 }
 0x3b2   : > { %6768 = vmatpush3.bf16.msra.mxu1 %v10243_v62 }
 0x3b3   : > { %6770 = vmatprep.subr.bf16.mxu1 %v10244_v60 }
 0x3b6   : > { %6772 = vmatpush3.bf16.msra.mxu1 %v10244_v60 }
 0x3b7   : > { %6774 = vmatprep.subr.bf16.mxu1 %v10245_v9 }
 0x3ba   : > { %6776 = vmatpush3.bf16.msra.mxu1 %v10245_v9  ;;  %v2442_v9 = vld [vmem:[%s9830_s5 + $0x18] sm:$0xff] }
 0x3bb   : > { %6778 = vmatprep.subr.bf16.mxu1 %v10246_v54 }
 0x3be   : > { %6780 = vmatpush3.bf16.msra.mxu1 %v10246_v54 }
 0x3bf   : > { %6782 = vmatprep.subr.bf16.mxu1 %v8250_v13 }
 0x3c1   : > { %5990 = vmatmul.mubr.f32.vlgmr.msra.gmra.mrb[0].mxu1 %v8242_v25 }
 0x3c2   : > { %6784 = vmatpush3.bf16.msra.mxu1 %v8250_v13  ;;  %5992 = vmatprep.mubr.f32.mxu1 %v8244_v15 }
 0x3c3   : > { %6786 = vmatprep.subr.bf16.mxu1 %v8261_v23 }
 0x3c5   : > { %5993 = vmatmul.mubr.f32.gmra.mrb[2].mxu1 %v8259_v28 }
 0x3c6   : > { %6788 = vmatpush3.bf16.msra.mxu1 %v8261_v23  ;;  %5995 = vmatprep.mubr.f32.mxu1 %v8279_v39 }
 0x3c7   : > { %6790 = vmatprep.subr.bf16.mxu1 %v8276_v43 }
 0x3c9   : > { %5996 = vmatmul.mubr.f32.gmra.mrb[4].mxu1 %v8282_v41 }
 0x3ca   : > { %6792 = vmatpush3.bf16.msra.mxu1 %v8276_v43  ;;  %5998 = vmatprep.mubr.f32.mxu1 %v8309_v5 }
 0x3cb   : > { %6794 = vmatprep.subr.bf16.mxu1 %v8292_v30 }
 0x3cd   : > { %5999 = vmatmul.mubr.f32.gmra.mrb[6].mxu1 %v8338_v63 }
 0x3ce   : > { %6796 = vmatpush3.bf16.msra.mxu1 %v8292_v30  ;;  %6033 = vmatprep.mubr.f32.mxu1 %v8224_v20  ;;  %v2439_v20 = vld [vmem:[%s9830_s5] sm:$0xff] }
 0x3cf   : > { %6798 = vmatprep.subr.bf16.mxu1 %v8326_v44  ;;  %v2473_v13 = vsel %vm2471_vm1, %v2439_v20, 0  ;;  %v8725_v20 = vpop.permute.xlu1 %2323 }
 0x3d2   : > { %6800 = vmatpush3.bf16.msra.mxu1 %v8326_v44 }
 0x3d3   : > { %6802 = vmatprep.subr.bf16.mxu1 %v10234_v37 }
 0x3d6   : > { %6804 = vmatpush3.bf16.msra.mxu1 %v10234_v37 }
 0x3d7   : > { %6806 = vmatprep.subr.bf16.mxu1 %v8377_v47 }
 0x3da   : > { %6808 = vmatpush3.bf16.msra.mxu1 %v8377_v47 }
 0x3db   : > { %6810 = vmatprep.subr.bf16.mxu1 %v8395_v31 }
 0x3de   : > { %6812 = vmatpush3.bf16.msra.mxu1 %v8395_v31 }
 0x3e1   : > { %6034 = vmatmul.mubr.f32.vlgmr.msra.gmra.mrb[0].mxu1 %v8242_v25  ;;  %v8669_v25 = vand.u32 4294901760, %v2473_v13 }
 0x3e2   : > { %6036 = vmatprep.mubr.f32.mxu1 %v8244_v15 }
 0x3e3   : > { %v8672_v15 = vsub.f32 %v2473_v13, %v8669_v25 }
 0x3e5   : > { %6037 = vmatmul.mubr.f32.gmra.mrb[2].mxu1 %v8259_v28  ;;  %10247 = vst [vmem:[#allocation31_spill] sm:$0xff] %v8672_v15  ;;  %v5360_v28 = vld [vmem:[%s9830_s5 + $0x90] sm:$0xff]  ;;  %v9937_v23 = vand.u32 4294901760, %v8672_v15 }
 0x3e6   : > { %6039 = vmatprep.mubr.f32.mxu1 %v8279_v39  ;;  %v3738_v43 = vsel %vm2471_vm1, %v5360_v28, 0  ;;  %v2479_v28 = vsel %vm2471_vm1, %v2441_v10, 0 }
 0x3e7   : > { %v2592_v39 = vsub.f32 %v8672_v15, %v9937_v23  ;;  %v2452_v15 = vld [vmem:[%s9830_s5 + $0x68] sm:$0xff] }
 0x3e9   : > { %6040 = vmatmul.mubr.f32.gmra.mrb[4].mxu1 %v8282_v41  ;;  %v8682_v41 = vand.u32 4294901760, %v3738_v43  ;;  %v2593_v30 = vand.u32 4294901760, %v2592_v39 }
 0x3ea   : > { %6042 = vmatprep.mubr.f32.mxu1 %v8309_v5 }
 0x3eb   : > { %10248 = vst [vmem:[#allocation32_spill] sm:$0xff] %v8682_v41  ;;  %v8685_v5 = vsub.f32 %v3738_v43, %v8682_v41  ;;  %6053 = vmatprep.mubr.f32.mxu0 %v2593_v30 }
 0x3ed   : > { %6043 = vmatmul.mubr.f32.gmra.mrb[6].mxu1 %v8338_v63  ;;  %10249 = vst [vmem:[#allocation35_spill] sm:$0xff] %v8685_v5  ;;  %v9933_v44 = vand.u32 4294901760, %v8685_v5 }
 0x3ef   : > { %v3871_v63 = vsub.f32 %v8685_v5, %v9933_v44 }
 0x3f1   : > { %v3872_v47 = vand.u32 4294901760, %v3871_v63 }
 0x3f3   : > { %6248 = vmatprep.mubr.f32.mxu1 %v3872_v47 }
 0x4b4   : > { %v6035_v56 = vpop.f32.mrb[0].mxu1 }
 0x4b5   : > { %v6915_v31 = vadd.f32 %v6035_v56, %v8502_v4  ;;  %v2223_v38 = vpop.f32.mrb[1].mxu1  ;;  %v2482_v56 = vsel %vm2471_vm1, %v2442_v9, 0 }
 0x4b6   : > { %v6916_v33 = vadd.f32 %v8510_v24, %v2223_v38 }
 0x4b7   : > { %v2275_v32 = vsel %vm2273_vm2, %v6915_v31, 0.0 }
 0x4b8   : > { %v2274_v19 = vsel %vm2273_vm2, %v6916_v33, 0.0  ;;  %v6038_v17 = vpop.f32.mrb[2].mxu1 }
 0x4b9   : > { %v2276_v7 = vadd.f32 %v2275_v32, %v2274_v19  ;;  %v2235_v51 = vpop.f32.mrb[3].mxu1  ;;  %v6917_v45 = vadd.f32 %v6038_v17, %v8532_v27 }
 0x4ba   : > { %v6918_v26 = vadd.f32 %v8519_v14, %v2235_v51  ;;  %v8747_v51 = vand.u32 4294901760, %v2482_v56 }
 0x4bb   : > { %v2279_v48 = vsel %vm2273_vm2, %v6917_v45, 0.0 }
 0x4bc   : > { %v2277_v21 = vsel %vm2273_vm2, %v6918_v26, 0.0  ;;  %v6041_v1 = vpop.f32.mrb[4].mxu1 }
 0x4bd   : > { %v2278_v18 = vadd.f32 %v2277_v21, %v2276_v7  ;;  %v6919_v40 = vadd.f32 %v6041_v1, %v8553_v42  ;;  %v2247_v2 = vpop.f32.mrb[5].mxu1 }
 0x4be   : > { %v6920_v55 = vadd.f32 %v2247_v2, %v8541_v35 }
 0x4bf   : > { %v2280_v11 = vadd.f32 %v2279_v48, %v2278_v18  ;;  %v2358_v22 = vsel %vm2273_vm2, %v6919_v40, 0.0  ;;  %v8756_v18 = vpop.permute.xlu1 %2337 }
 0x4c0   : > { %v2357_v50 = vsel %vm2273_vm2, %v6920_v55, 0.0  ;;  %v6044_v59 = vpop.f32.mrb[6].mxu1 }
 0x4c1   : > { %v2281_v53 = vrot.slane %v2280_v11, 4  ;;  %v2359_v61 = vadd.f32 %v2358_v22, %v2357_v50  ;;  %v2259_v6 = vpop.f32.mrb[7].mxu1  ;;  %v6921_v4 = vadd.f32 %v6044_v59, %v8579_v29 }
 0x4c2   : > { %v6922_v24 = vadd.f32 %v2259_v6, %v8561_v52  ;;  %v2476_v52 = vsel %vm2471_vm1, %v2440_v0, 0  ;;  %v8801_v0 = vpop.permute.xlu0 %2321 }
 0x4c3   : > { %v2282_v34 = vadd.f32 %v2281_v53, %v2280_v11  ;;  %v2362_v16 = vsel %vm2273_vm2, %v6921_v4, 0.0  ;;  %v8734_v30 = vand.u32 4294901760, %v2476_v52 }
 0x4c4   : > { %v2360_v14 = vsel %vm2273_vm2, %v6922_v24, 0.0 }
 0x4c5   : > { %v2283_v12 = vrot.slane %v2282_v34, 2  ;;  %v2361_v27 = vadd.f32 %v2360_v14, %v2359_v61  ;;  %v8745_v7 = vsub.f32 %v2476_v52, %v8734_v30 }
 0x4c7   : > { %v2284_v35 = vadd.f32 %v2283_v12, %v2282_v34  ;;  %v2363_v42 = vadd.f32 %v2362_v16, %v2361_v27  ;;  %10250 = vst [vmem:[#allocation42_spill] sm:$0xff] %v8745_v7  ;;  %v9936_v6 = vand.u32 4294901760, %v8745_v7  ;;  %v2445_v12 = vld [vmem:[%s9830_s5 + $0x30] sm:$0xff] }
 0x4c9   : > { %v2285_v49 = vrot.slane %v2284_v35, 1  ;;  %v2364_v37 = vrot.slane %v2363_v42, 4 }
 0x4cb   : > { %v2286_v36 = vadd.f32 %v2285_v49, %v2284_v35  ;;  %v2365_v8 = vadd.f32 %v2364_v37, %v2363_v42  ;;  %v5362_v49 = vld [vmem:[%s9830_s5 + $0xa0] sm:$0xff]  ;;  %v2446_v37 = vld [vmem:[%s9830_s5 + $0x38] sm:$0xff] }
 0x4cd   : > { %v2288_v29 = vmul.f32 0.03125, %v2286_v36  ;;  %v2366_v46 = vrot.slane %v2365_v8, 2 }
 0x4cf   : > { %v8714_v58 = vsub.f32 %v6918_v26, %v2288_v29  ;;  %v8716_v3 = vsub.f32 %v6917_v45, %v2288_v29  ;;  %v2367_v57 = vadd.f32 %v2366_v46, %v2365_v8  ;;  %v8718_v62 = vsub.f32 %v6916_v33, %v2288_v29  ;;  %v2443_v45 = vld [vmem:[%s9830_s5 + $0x20] sm:$0xff]  ;;  %v8799_v8 = vpop.permute.xlu1 %2339 }
 0x4d0   : > { %v8720_v60 = vsub.f32 %v6915_v31, %v2288_v29  ;;  %v8741_v33 = vand.u32 4294901760, %v2479_v28  ;;  %v2485_v53 = vsel %vm2471_vm1, %v2443_v45, 0 }
 0x4d1   : > { %v2368_v54 = vrot.slane %v2367_v57, 1  ;;  %v2293_v13 = vmul.f32 %v8718_v62, %v8718_v62  ;;  %v2295_v43 = vmul.f32 %v8714_v58, %v8714_v58  ;;  %v2296_v31 = vmul.f32 %v8716_v3, %v8716_v3 }
 0x4d2   : > { %v2294_v39 = vmul.f32 %v8720_v60, %v8720_v60  ;;  %v8764_v22 = vsub.f32 %v2479_v28, %v8741_v33  ;;  %v8791_v42 = vand.u32 4294901760, %v2485_v53  ;;  %v2447_v28 = vld [vmem:[%s9830_s5 + $0x40] sm:$0xff] }
 0x4d3   : > { %v2369_v63 = vadd.f32 %v2368_v54, %v2367_v57  ;;  %v2297_v47 = vsel %vm2273_vm2, %v2293_v13, 0.0  ;;  %v2300_v17 = vsel %vm2273_vm2, %v2295_v43, 0.0  ;;  %v2302_v48 = vsel %vm2273_vm2, %v2296_v31, 0.0  ;;  %v5363_v13 = vld [vmem:[%s9830_s5 + $0xa8] sm:$0xff] }
 0x4d4   : > { %v2298_v38 = vsel %vm2273_vm2, %v2294_v39, 0.0  ;;  %10251 = vst [vmem:[#allocation43_spill] sm:$0xff] %v8764_v22  ;;  %v9935_v35 = vand.u32 4294901760, %v8764_v22  ;;  %10253 = vst [vmem:[#allocation47_spill] sm:$0xff] %v8791_v42  ;;  %v8809_v57 = vsub.f32 %v8745_v7, %v9936_v6  ;;  %v2491_v54 = vsel %vm2471_vm1, %v2445_v12, 0 }
 0x4d5   : > { %v2370_v32 = vmul.f32 0.03125, %v2369_v63  ;;  %v2299_v19 = vadd.f32 %v2298_v38, %v2297_v47  ;;  %v3744_v63 = vsel %vm2471_vm1, %v5362_v49, 0  ;;  %v2494_v47 = vsel %vm2471_vm1, %v2446_v37, 0 }
 0x4d6   : > { %v8825_v31 = vsub.f32 %v8764_v22, %v9935_v35  ;;  %v3747_v45 = vsel %vm2471_vm1, %v5363_v13, 0 }
 0x4d7   : > { %v8752_v26 = vsub.f32 %v6922_v24, %v2370_v32  ;;  %v8754_v21 = vsub.f32 %v6921_v4, %v2370_v32  ;;  %v2301_v1 = vadd.f32 %v2300_v17, %v2299_v19  ;;  %v8758_v2 = vsub.f32 %v6920_v55, %v2370_v32  ;;  %v2444_v4 = vld [vmem:[%s9830_s5 + $0x28] sm:$0xff]  ;;  %v5361_v24 = vld [vmem:[%s9830_s5 + $0x98] sm:$0xff] }
 0x4d8   : > { %v8761_v11 = vsub.f32 %v6919_v40, %v2370_v32  ;;  %v8775_v40 = vsub.f32 %v2482_v56, %v8747_v51  ;;  %v2488_v46 = vsel %vm2471_vm1, %v2444_v4, 0  ;;  %v3741_v52 = vsel %vm2471_vm1, %v5361_v24, 0  ;;  %v8845_v24 = vpop.permute.xlu1 %2327 }
 0x4d9   : > { %v2303_v50 = vadd.f32 %v2302_v48, %v2301_v1  ;;  %v2375_v59 = vmul.f32 %v8758_v2, %v8758_v2  ;;  %v2377_v61 = vmul.f32 %v8752_v26, %v8752_v26  ;;  %v2378_v27 = vmul.f32 %v8754_v21, %v8754_v21  ;;  %v5364_v48 = vld [vmem:[%s9830_s5 + $0xb0] sm:$0xff] }
 0x4da   : > { %v2376_v55 = vmul.f32 %v8761_v11, %v8761_v11  ;;  %10252 = vst [vmem:[#allocation46_spill] sm:$0xff] %v8775_v40  ;;  %v9934_v9 = vand.u32 4294901760, %v8775_v40  ;;  %v8827_v38 = vand.u32 4294901760, %v2488_v46  ;;  %v8829_v32 = vand.u32 4294901760, %v3741_v52 }
 0x4db   : > { %v2304_v34 = vrot.slane %v2303_v50, 4  ;;  %v2379_v14 = vsel %vm2273_vm2, %v2375_v59, 0.0  ;;  %v2382_v10 = vsel %vm2273_vm2, %v2377_v61, 0.0  ;;  %v2384_v56 = vsel %vm2273_vm2, %v2378_v27, 0.0 }
 0x4dc   : > { %v2380_v16 = vsel %vm2273_vm2, %v2376_v55, 0.0  ;;  %10254 = vst [vmem:[#allocation48_spill] sm:$0xff] %v8827_v38  ;;  %10255 = vst [vmem:[#allocation49_spill] sm:$0xff] %v8829_v32  ;;  %v2497_v1 = vsel %vm2471_vm1, %v2447_v28, 0  ;;  %v8839_v59 = vand.u32 4294901760, %v2491_v54  ;;  %v8841_v61 = vand.u32 4294901760, %v3744_v63  ;;  %v8897_v44 = vpop.permute.xlu1 %2343 }
 0x4dd   : > { %v2305_v36 = vadd.f32 %v2304_v34, %v2303_v50  ;;  %v2381_v29 = vadd.f32 %v2380_v16, %v2379_v14  ;;  %v8837_v50 = vsub.f32 %v2485_v53, %v8791_v42  ;;  %v8843_v55 = vand.u32 4294901760, %v2494_v47  ;;  %v8847_v34 = vpop.permute.xlu0 %2325  ;;  %v2448_v53 = vld [vmem:[%s9830_s5 + $0x48] sm:$0xff] }
 0x4de   : > { %10257 = vst [vmem:[#allocation59_spill] sm:$0xff] %v8839_v59  ;;  %10258 = vst [vmem:[#allocation60_spill] sm:$0xff] %v8841_v61  ;;  %v8853_v27 = vsub.f32 %v8775_v40, %v9934_v9  ;;  %v8859_v16 = vsub.f32 %v2488_v46, %v8827_v38  ;;  %v8861_v49 = vand.u32 4294901760, %v3747_v45  ;;  %v8863_v37 = vand.u32 4294901760, %v2497_v1 }
 0x4df   : > { %v2306_v43 = vrot.slane %v2305_v36, 2  ;;  %v2383_v39 = vadd.f32 %v2382_v10, %v2381_v29  ;;  %10256 = vst [vmem:[#allocation53_spill] sm:$0xff] %v8837_v50  ;;  %10259 = vst [vmem:[#allocation61_spill] sm:$0xff] %v8843_v55  ;;  %v8868_v28 = vsub.f32 %v3741_v52, %v8829_v32  ;;  %v8874_v46 = vsub.f32 %v2491_v54, %v8839_v59 }
 0x4e0   : > { %10260 = vst [vmem:[#allocation62_spill] sm:$0xff] %v8859_v16  ;;  %10261 = vst [vmem:[#allocation11_spill] sm:$0xff] %v8861_v49  ;;  %v9940_v52 = vand.u32 4294901760, %v8837_v50  ;;  %v10273_v12 = vand.u32 4294901760, %v8859_v16 }
 0x4e1   : > { %v2307_v19 = vadd.f32 %v2306_v43, %v2305_v36  ;;  %v2385_v17 = vadd.f32 %v2384_v56, %v2383_v39  ;;  %10262 = vst [vmem:[#allocation15_spill] sm:$0xff] %v8863_v37  ;;  %v3750_v36 = vsel %vm2471_vm1, %v5364_v48, 0  ;;  %10263 = vst [vmem:[#allocation9_spill] sm:$0xff] %v8868_v28  ;;  %v5365_v43 = vld [vmem:[%s9830_s5 + $0xb8] sm:$0xff]  ;;  %v8877_v39 = vsub.f32 %v3744_v63, %v8841_v61  ;;  %v8899_v9 = vpop.permute.xlu0 %2341 }
 0x4e2   : > { %10264 = vst [vmem:[#allocation13_spill] sm:$0xff] %v8874_v46  ;;  %v8880_v56 = vsub.f32 %v2494_v47, %v8843_v55  ;;  %v8891_v63 = vsub.f32 %v3747_v45, %v8861_v49  ;;  %v8894_v47 = vsub.f32 %v2497_v1, %v8863_v37 }
 0x4e3   : > { %v2308_v4 = vrot.slane %v2307_v19, 1  ;;  %v2386_v14 = vrot.slane %v2385_v17, 4  ;;  %10265 = vst [vmem:[#allocation12_spill] sm:$0xff] %v8877_v39 }
 0x4e4   : > { %10266 = vst [vmem:[#allocation10_spill] sm:$0xff] %v8880_v56  ;;  %10268 = vst [vmem:[#allocation17_spill] sm:$0xff] %v8891_v63 }
 0x4e5   : > { %v2309_v29 = vadd.f32 %v2308_v4, %v2307_v19  ;;  %v2387_v10 = vadd.f32 %v2386_v14, %v2385_v17  ;;  %v2500_v19 = vsel %vm2471_vm1, %v2448_v53, 0  ;;  %v8884_v4 = vand.u32 4294901760, %v3750_v36  ;;  %v2449_v14 = vld [vmem:[%s9830_s5 + $0x50] sm:$0xff]  ;;  %10269 = vst [vmem:[#allocation16_spill] sm:$0xff] %v8894_v47 }
 0x4e6   : > { %v3753_v53 = vsel %vm2471_vm1, %v5365_v43, 0  ;;  %v8902_v23 = vand.u32 4294901760, %v2500_v19  ;;  %v2503_v1 = vsel %vm2471_vm1, %v2449_v14, 0  ;;  %v8924_v14 = vsub.f32 %v8859_v16, %v10273_v12 }
 0x4e7   : > { %v2310_v17 = vmul.f32 0.03125, %v2309_v29  ;;  %v2388_v48 = vrot.slane %v2387_v10, 2  ;;  %10267 = vst [vmem:[#allocation20_spill] sm:$0xff] %v8884_v4  ;;  %v8911_v54 = vand.u32 4294901760, %v3753_v53  ;;  %v8932_v5 = vand.u32 4294901760, %v2503_v1 }
 0x4e8   : > { %10270 = vst [vmem:[#allocation14_spill] sm:$0xff] %v8902_v23  ;;  %v8930_v6 = vsub.f32 %v2500_v19, %v8902_v23  ;;  %v10277_v12 = vand.u32 4294901760, %v8874_v46 }
 0x4e9   : > { %v2311_v29 = vadd.f32 1e-05, %v2310_v17  ;;  %v2389_v35 = vadd.f32 %v2388_v48, %v2387_v10  ;;  %v8909_v17 = vsub.f32 %v3750_v36, %v8884_v4  ;;  %10272 = vst [vmem:[#allocation24_spill] sm:$0xff] %v8911_v54  ;;  %v5366_v10 = vld [vmem:[%s9830_s5 + $0xc0] sm:$0xff]  ;;  %v8919_v48 = vsub.f32 %v8837_v50, %v9940_v52  ;;  %10275 = vst [vmem:[#allocation19_spill] sm:$0xff] %v8932_v5 }
 0x4ea   : > { %10274 = vst [vmem:[#allocation21_spill] sm:$0xff] %v8930_v6  ;;  %v10276_v52 = vand.u32 4294901760, %v8868_v28  ;;  %v8942_v16 = vsub.f32 %v8874_v46, %v10277_v12  ;;  %v10278_v36 = vand.u32 4294901760, %v8877_v39  ;;  %v3756_v19 = vsel %vm2471_vm1, %v5366_v10, 0 }
 0x4eb   : > { %7233 = vrsqrt.f32 %v2311_v29  ;;  %v2390_v43 = vrot.slane %v2389_v35, 1  ;;  %10271 = vst [vmem:[#allocation26_spill] sm:$0xff] %v8909_v17  ;;  %v8952_v29 = vpop.permute.xlu0 %2403  ;;  %v8961_v46 = vsub.f32 %v3753_v53, %v8911_v54  ;;  %v8980_v22 = vsub.f32 %v2503_v1, %v8932_v5 }
 0x4ec   : > { %v8937_v50 = vsub.f32 %v8868_v28, %v10276_v52  ;;  %v10279_v52 = vand.u32 4294901760, %v8880_v56  ;;  %v8982_v7 = vand.u32 4294901760, %v3756_v19  ;;  %v10286_v1 = vand.u32 4294901760, %v8930_v6 }
 0x4ed   : > { %v2391_v45 = vadd.f32 %v2390_v43, %v2389_v35  ;;  %v8947_v35 = vsub.f32 %v8877_v39, %v10278_v36  ;;  %v8950_v43 = vpop.permute.xlu1 %2405  ;;  %10280 = vst [vmem:[#allocation33_spill] sm:$0xff] %v8961_v46  ;;  %v2450_v36 = vld [vmem:[%s9830_s5 + $0x58] sm:$0xff]  ;;  %v10281_v39 = vand.u32 4294901760, %v8891_v63  ;;  %10283 = vst [vmem:[#allocation29_spill] sm:$0xff] %v8980_v22 }
 0x4ee   : > { %v8957_v28 = vsub.f32 %v8880_v56, %v10279_v52  ;;  %v10282_v52 = vand.u32 4294901760, %v8894_v47  ;;  %10284 = vst [vmem:[#allocation28_spill] sm:$0xff] %v8982_v7  ;;  %v2506_v56 = vsel %vm2471_vm1, %v2450_v36, 0  ;;  %v9016_v5 = vsub.f32 %v3756_v19, %v8982_v7  ;;  %v5369_v19 = vld [vmem:[%s9830_s5 + $0xd8] sm:$0xff] }
 0x4ef   : > { %v2392_v13 = vmul.f32 0.03125, %v2391_v45  ;;  %v8971_v40 = vsub.f32 %v8891_v63, %v10281_v39  ;;  %v5367_v45 = vld [vmem:[%s9830_s5 + $0xc8] sm:$0xff]  ;;  %v2451_v39 = vld [vmem:[%s9830_s5 + $0x60] sm:$0xff]  ;;  %v9018_v10 = vand.u32 4294901760, %v2506_v56 }
 0x4f0   : > { %v8976_v12 = vsub.f32 %v8894_v47, %v10282_v52  ;;  %v10285_v47 = vand.u32 4294901760, %v8909_v17  ;;  %v3759_v52 = vsel %vm2471_vm1, %v5367_v45, 0 }
 0x4f1   : > { %v2393_v53 = vadd.f32 1e-05, %v2392_v13  ;;  %v2509_v13 = vsel %vm2471_vm1, %v2451_v39, 0  ;;  %v9005_v36 = vpop.permute.xlu1 %2421  ;;  %10287 = vst [vmem:[#allocation25_spill] sm:$0xff] %v9018_v10  ;;  %v9048_v49 = vsub.f32 %v2506_v56, %v9018_v10 }
 0x4f2   : > { %v8998_v63 = vsub.f32 %v8909_v17, %v10285_v47  ;;  %v9012_v47 = vsub.f32 %v8930_v6, %v10286_v1  ;;  %v5368_v1 = vld [vmem:[%s9830_s5 + $0xd0] sm:$0xff] }
 0x4f3   : > { %7235 = vrsqrt.f32 %v2393_v53  ;;  %v9007_v53 = vpop.permute.xlu0 %2419 }
 0x4f5   : > { %v7234_v54 = vpop.eup %7233  ;;  %v2410_v56 = vpop.permute.xlu1 %2409 }
 0x4f6   : > { %v2314_v45 = vmul.f32 %v7234_v54, %v8720_v60  ;;  %v2313_v39 = vmul.f32 %v7234_v54, %v8718_v62  ;;  %v2316_v17 = vmul.f32 %v7234_v54, %v8716_v3  ;;  %v2315_v23 = vmul.f32 %v7234_v54, %v8714_v58 }
 0x4f7   : > { %v10288_v62 = vand.u32 4294901760, %v8961_v46  ;;  %v9039_v58 = vand.u32 4294901760, %v3759_v52  ;;  %v9041_v54 = vand.u32 4294901760, %v2509_v13  ;;  %v9051_v60 = vsel %vm2471_vm1, %v5368_v1, 0 }
 0x4f8   : > { %v2334_v6 = vmul.f32 %v8725_v20, %v2314_v45  ;;  %v2333_v7 = vmul.f32 %v8801_v0, %v2313_v39  ;;  %v2336_v4 = vmul.f32 %v8845_v24, %v2316_v17  ;;  %v2335_v37 = vmul.f32 %v8847_v34, %v2315_v23  ;;  %v2453_v34 = vld [vmem:[%s9830_s5 + $0x70] sm:$0xff]  ;;  %v2408_v17 = vpop.permute.xlu0 %2407 }
 0x4f9   : > { %v9037_v3 = vsub.f32 %v8961_v46, %v10288_v62  ;;  %10289 = vst [vmem:[#allocation38_spill] sm:$0xff] %v9039_v58  ;;  %10290 = vst [vmem:[#allocation36_spill] sm:$0xff] %v9041_v54  ;;  %v9054_v62 = vsel %vm2471_vm1, %v2452_v15, 0  ;;  %v9057_v46 = vsel %vm2471_vm1, %v5369_v19, 0  ;;  %v10291_v15 = vand.u32 4294901760, %v8980_v22  ;;  %v2426_v38 = vpop.permute.xlu1 %2425 }
 0x4fa   : > { %v2350_v20 = vadd.f32 %v8799_v8, %v2334_v6  ;;  %v2349_v0 = vadd.f32 %v8756_v18, %v2333_v7  ;;  %v2352_v24 = vadd.f32 %v8897_v44, %v2336_v4  ;;  %v2351_v23 = vadd.f32 %v8899_v9, %v2335_v37 }
 0x4fb   : > { %v9069_v45 = vsub.f32 %v8980_v22, %v10291_v15  ;;  %v9073_v6 = vsub.f32 %v3759_v52, %v9039_v58  ;;  %v9076_v44 = vsub.f32 %v2509_v13, %v9041_v54  ;;  %v9079_v4 = vand.u32 4294901760, %v9051_v60 }
 0x4fc   : > { %v2354_v7 = vmax.f32 %v2350_v20, 0.0  ;;  %v2353_v18 = vmax.f32 %v2349_v0, 0.0  ;;  %v2356_v8 = vmax.f32 %v2352_v24, 0.0  ;;  %v2355_v9 = vmax.f32 %v2351_v23, 0.0 }
 0x4fd   : > { %v7236_v37 = vpop.eup %7235  ;;  %10292 = vst [vmem:[#allocation34_spill] sm:$0xff] %v9079_v4  ;;  %v9082_v1 = vand.u32 4294901760, %v9054_v62  ;;  %v9085_v19 = vand.u32 4294901760, %v9057_v46  ;;  %v9088_v52 = vsel %vm2471_vm1, %v2453_v34, 0 }
 0x4fe   : > { %v2524_v15 = vand.u32 4294901760, %v2354_v7  ;;  %v2521_v13 = vand.u32 4294901760, %v2353_v18  ;;  %v2530_v39 = vand.u32 4294901760, %v2356_v8  ;;  %v2527_v20 = vand.u32 4294901760, %v2355_v9 }
 0x4ff   : > { %10293 = vst [vmem:[#allocation30_spill] sm:$0xff] %v9082_v1  ;;  %10294 = vst [vmem:[#allocation44_spill] sm:$0xff] %v9085_v19  ;;  %v2396_v0 = vmul.f32 %v7236_v37, %v8761_v11  ;;  %v2395_v24 = vmul.f32 %v7236_v37, %v8758_v2  ;;  %v2398_v23 = vmul.f32 %v7236_v37, %v8754_v21  ;;  %v2424_v11 = vpop.permute.xlu0 %2423 }
 0x500   : > { %v2397_v22 = vmul.f32 %v7236_v37, %v8752_v26  ;;  %v2758_v54 = vsub.f32 %v2354_v7, %v2524_v15  ;;  %v9094_v58 = vpack.c.bf16 %v2524_v15, %v2521_v13  ;;  %v2751_v10 = vsub.f32 %v2353_v18, %v2521_v13 }
 0x501   : > { %v2772_v55 = vsub.f32 %v2356_v8, %v2530_v39  ;;  %v9096_v61 = vpack.c.bf16 %v2530_v39, %v2527_v20  ;;  %v2765_v34 = vsub.f32 %v2355_v9, %v2527_v20  ;;  %v2416_v59 = vmul.f32 %v8950_v43, %v2396_v0 }
 0x502   : > { %v2415_v32 = vmul.f32 %v8952_v29, %v2395_v24  ;;  %v2759_v41 = vand.u32 4294901760, %v2758_v54  ;;  %v2418_v42 = vmul.f32 %v2410_v56, %v2398_v23  ;;  %v2417_v21 = vmul.f32 %v2408_v17, %v2397_v22  ;;  %6814 = vmatprep.subr.bf16.mxu0 %v9094_v58 }
 0x503   : > { %v2773_v2 = vand.u32 4294901760, %v2772_v55  ;;  %v2766_v26 = vand.u32 4294901760, %v2765_v34  ;;  %v2432_v7 = vadd.f32 %v9005_v36, %v2416_v59  ;;  %6816 = vmatpush3.bf16.msra.mxu0 %v9094_v58  ;;  %v2752_v39 = vand.u32 4294901760, %v2751_v10 }
 0x504   : > { %v2431_v18 = vadd.f32 %v9007_v53, %v2415_v32  ;;  %v2434_v8 = vadd.f32 %v2426_v38, %v2418_v42  ;;  %v2433_v43 = vadd.f32 %v2424_v11, %v2417_v21  ;;  %6818 = vmatprep.subr.bf16.mxu0 %v9096_v61  ;;  %v2760_v29 = vsub.f32 %v2758_v54, %v2759_v41 }
 0x505   : > { %v2774_v9 = vsub.f32 %v2772_v55, %v2773_v2  ;;  %v2436_v37 = vmax.f32 %v2432_v7, 0.0  ;;  %v2753_v56 = vsub.f32 %v2751_v10, %v2752_v39  ;;  %v2767_v22 = vsub.f32 %v2765_v34, %v2766_v26 }
 0x506   : > { %v2435_v15 = vmax.f32 %v2431_v18, 0.0  ;;  %v2438_v17 = vmax.f32 %v2434_v8, 0.0  ;;  %v2437_v13 = vmax.f32 %v2433_v43, 0.0  ;;  %v2761_v20 = vand.u32 4294901760, %v2760_v29 }
 0x507   : > { %v2775_v0 = vand.u32 4294901760, %v2774_v9  ;;  %v3783_v59 = vand.u32 4294901760, %v2436_v37  ;;  %6820 = vmatpush3.bf16.msra.mxu0 %v9096_v61  ;;  %v2754_v32 = vand.u32 4294901760, %v2753_v56  ;;  %v2768_v53 = vand.u32 4294901760, %v2767_v22 }
 0x508   : > { %v3780_v36 = vand.u32 4294901760, %v2435_v15  ;;  %v3789_v42 = vand.u32 4294901760, %v2438_v17  ;;  %v3786_v38 = vand.u32 4294901760, %v2437_v13  ;;  %v9106_v24 = vpack.c.bf16 %v2758_v54, %v2751_v10  ;;  %v5370_v10 = vld [vmem:[%s9830_s5 + $0xe0] sm:$0xff] }
 0x509   : > { %v9108_v23 = vpack.c.bf16 %v2772_v55, %v2765_v34  ;;  %v4017_v11 = vsub.f32 %v2436_v37, %v3783_v59  ;;  %v6821_v18 = vpack.c.bf16 %v2761_v20, %v2754_v32  ;;  %v10295_v9 = vand.u32 4294901760, %v8809_v57  ;;  %v2454_v57 = vld [vmem:[%s9830_s5 + $0x78] sm:$0xff] }
 0x50a   : > { %v9110_v21 = vpack.c.bf16 %v3783_v59, %v3780_v36  ;;  %v4010_v7 = vsub.f32 %v2435_v15, %v3780_v36  ;;  %v4031_v8 = vsub.f32 %v2438_v17, %v3789_v42  ;;  %v9112_v43 = vpack.c.bf16 %v3789_v42, %v3786_v38 }
 0x50b   : > { %v4024_v29 = vsub.f32 %v2437_v13, %v3786_v38  ;;  %6054 = vmatmul.mubr.f32.vlgmr.msra.gmra.mrb[2].mxu0 %v10295_v9  ;;  %v6825_v56 = vpack.c.bf16 %v2775_v0, %v2768_v53  ;;  %v4018_v54 = vand.u32 4294901760, %v4017_v11  ;;  %6822 = vmatprep.subr.bf16.mxu0 %v6821_v18  ;;  %v9122_v37 = vpack.c.bf16 %v2759_v41, %v2752_v39  ;;  %v5371_v39 = vld [vmem:[%s9830_s5 + $0xe8] sm:$0xff] }
 0x50c   : > { %v4011_v55 = vand.u32 4294901760, %v4010_v7  ;;  %6909 = vmatprep.subr.bf16.mxu1 %v9110_v21  ;;  %v9120_v34 = vpack.c.bf16 %v4017_v11, %v4010_v7  ;;  %v4032_v15 = vand.u32 4294901760, %v4031_v8  ;;  %6824 = vmatpush3.bf16.msra.mxu0 %v6821_v18  ;;  %v9130_v13 = vpack.c.bf16 %v2773_v2, %v2766_v26  ;;  %v5372_v26 = vld [vmem:[%s9830_s5 + $0xf0] sm:$0xff] }
 0x50d   : > { %v4025_v22 = vand.u32 4294901760, %v4024_v29  ;;  %6911 = vmatpush3.bf16.msra.mxu1 %v9110_v21  ;;  %v9128_v17 = vpack.c.bf16 %v4031_v8, %v4024_v29  ;;  %6826 = vmatprep.subr.bf16.mxu0 %v6825_v56  ;;  %v4019_v0 = vsub.f32 %v4017_v11, %v4018_v54  ;;  %v3768_v41 = vsel %vm2471_vm1, %v5370_v10, 0 }
 0x50e   : > { %6910 = vmatprep.subr.bf16.mxu1 %v9112_v43  ;;  %v4012_v20 = vsub.f32 %v4010_v7, %v4011_v55  ;;  %v9137_v59 = vpack.c.bf16 %v4018_v54, %v4011_v55  ;;  %v10296_v36 = vand.u32 4294901760, %v8825_v31  ;;  %v4033_v53 = vsub.f32 %v4031_v8, %v4032_v15 }
 0x50f   : > { %v4026_v32 = vsub.f32 %v4024_v29, %v4025_v22  ;;  %v9143_v2 = vsub.f32 %v9051_v60, %v9079_v4  ;;  %v9148_v42 = vpack.c.bf16 %v4032_v15, %v4025_v22  ;;  %v10297_v38 = vand.u32 4294901760, %v8853_v27  ;;  %v5373_v22 = vld [vmem:[%s9830_s5 + $0xf8] sm:$0xff] }
 0x510   : > { %6056 = vmatprep.mubr.f32.mxu0 %v10296_v36  ;;  %v4013_v11 = vand.u32 4294901760, %v4012_v20  ;;  %v4020_v7 = vand.u32 4294901760, %v4019_v0  ;;  %v9153_v31 = vand.u32 4294901760, %v9088_v52  ;;  %v2518_v18 = vsel %vm2471_vm1, %v2454_v57, 0  ;;  %6828 = vmatpush3.bf16.msra.mxu0 %v6825_v56 }
 0x511   : > { %6057 = vmatmul.mubr.f32.gmra.mrb[4].mxu0 %v10297_v38  ;;  %6912 = vmatpush3.bf16.msra.mxu1 %v9112_v43  ;;  %v4027_v60 = vand.u32 4294901760, %v4026_v32  ;;  %v4034_v8 = vand.u32 4294901760, %v4033_v53  ;;  %v9157_v29 = vand.u32 4294901760, %v3768_v41  ;;  %v3771_v9 = vsel %vm2471_vm1, %v5371_v39, 0 }
 0x512   : > { %10298 = vst [vmem:[#allocation40_spill] sm:$0xff] %v9153_v31  ;;  %6830 = vmatprep.subr.bf16.mxu0 %v9106_v24  ;;  %v10300_v27 = vand.u32 4294901760, %v8919_v48  ;;  %v6869_v10 = vpack.c.bf16 %v4020_v7, %v4013_v11  ;;  %v10301_v54 = vand.u32 4294901760, %v9016_v5  ;;  %v10018_v56 = vand.u32 4294901760, %v9048_v49 }
 0x513   : > { %10299 = vst [vmem:[#allocation39_spill] sm:$0xff] %v9157_v29  ;;  %v3774_v15 = vsel %vm2471_vm1, %v5372_v26, 0  ;;  %v6873_v57 = vpack.c.bf16 %v4034_v8, %v4027_v60  ;;  %v10017_v20 = vand.u32 4294901760, %v9073_v6  ;;  %v10016_v0 = vand.u32 4294901760, %v9076_v44 }
 0x514   : > { %6059 = vmatprep.mubr.f32.mxu0 %v10300_v27  ;;  %v3931_v55 = vsub.f32 %v9016_v5, %v10301_v54  ;;  %v9175_v48 = vsub.f32 %v9054_v62, %v9082_v1  ;;  %v10302_v39 = vand.u32 4294901760, %v8924_v14  ;;  %v10303_v36 = vand.u32 4294901760, %v8937_v50  ;;  %6870 = vmatprep.subr.bf16.mxu1 %v6869_v10 }
 0x515   : > { %v10015_v32 = vand.u32 4294901760, %v9143_v2  ;;  %v9184_v53 = vsub.f32 %v9057_v46, %v9085_v19  ;;  %v9186_v26 = vand.u32 4294901760, %v2518_v18  ;;  %v9188_v38 = vand.u32 4294901760, %v3771_v9 }
 0x516   : > { %6060 = vmatmul.mubr.f32.gmra.mrb[6].mxu0 %v10302_v39  ;;  %6249 = vmatmul.mubr.f32.vlgmr.msra.gmra.mrb[8].mxu1 %v10303_v36  ;;  %v10306_v62 = vand.u32 4294901760, %v8942_v16  ;;  %v9194_v14 = vsub.f32 %v9088_v52, %v9153_v31  ;;  %v9197_v50 = vsub.f32 %v3768_v41, %v9157_v29  ;;  %v9199_v11 = vand.u32 4294901760, %v3774_v15 }
 0x517   : > { %10304 = vst [vmem:[#allocation37_spill] sm:$0xff] %v9186_v26  ;;  %10305 = vst [vmem:[#allocation55_spill] sm:$0xff] %v9188_v38  ;;  %v3777_v46 = vsel %vm2471_vm1, %v5373_v22, 0  ;;  %6872 = vmatpush3.bf16.msra.mxu1 %v6869_v10  ;;  %v10308_v7 = vand.u32 4294901760, %v8947_v35  ;;  %v2683_v60 = vand.u32 4294901760, %v9012_v47  ;;  %v3922_v16 = vand.u32 4294901760, %v9037_v3 }
 0x518   : > { %6062 = vmatprep.mubr.f32.mxu0 %v10306_v62  ;;  %10307 = vst [vmem:[#allocation50_spill] sm:$0xff] %v9199_v11  ;;  %v2693_v8 = vand.u32 4294901760, %v9069_v45  ;;  %v2702_v52 = vsub.f32 %v9048_v49, %v10018_v56  ;;  %6874 = vmatprep.subr.bf16.mxu1 %v6873_v57  ;;  %v3932_v41 = vand.u32 4294901760, %v3931_v55  ;;  %v3941_v27 = vsub.f32 %v9073_v6, %v10017_v20  ;;  %v10338_v20 = vld [vmem:[#allocation35_spill] sm:$0xff]  ;;  %v10339_v56 = vld [vmem:[#allocation62_spill] sm:$0xff] }
 0x519   : > { %6251 = vmatprep.mubr.f32.mxu1 %v10308_v7  ;;  %v2712_v35 = vsub.f32 %v9076_v44, %v10016_v0  ;;  %v10014_v47 = vand.u32 4294901760, %v9175_v48  ;;  %v10309_v3 = vand.u32 4294901760, %v8957_v28  ;;  %v10310_v45 = vand.u32 4294901760, %v8971_v40  ;;  %v10337_v0 = vld [vmem:[#allocation53_spill] sm:$0xff] }
 0x51a   : > { %v10013_v10 = vand.u32 4294901760, %v9184_v53  ;;  %v9223_v54 = vsub.f32 %v2518_v18, %v9186_v26  ;;  %v9226_v55 = vsub.f32 %v3771_v9, %v9188_v38  ;;  %v9228_v22 = vand.u32 4294901760, %v3777_v46 }
 0x51b   : > { %6063 = vmatmul.mubr.f32.gmra.mrb[8].mxu0 %v10309_v3  ;;  %6252 = vmatmul.mubr.f32.gmra.mrb[10].mxu1 %v10310_v45  ;;  %v10312_v39 = vand.u32 4294901760, %v8976_v12  ;;  %v10313_v36 = vand.u32 4294901760, %v8998_v63  ;;  %v3951_v40 = vsub.f32 %v9143_v2, %v10015_v32  ;;  %v10012_v28 = vand.u32 4294901760, %v9194_v14  ;;  %v9342_v32 = vld [vmem:[%s9831_s6] sm:$0xff] }
 0x51c   : > { %10311 = vst [vmem:[#allocation45_spill] sm:$0xff] %v9228_v22  ;;  %v10011_v18 = vand.u32 4294901760, %v9197_v50  ;;  %v9240_v62 = vsub.f32 %v3774_v15, %v9199_v11  ;;  %6876 = vmatpush3.bf16.msra.mxu1 %v6873_v57  ;;  %v2703_v9 = vand.u32 4294901760, %v2702_v52  ;;  %v3942_v12 = vand.u32 4294901760, %v3941_v27  ;;  %10334 = vst [vmem:[#allocation56_spill] sm:$0xff] %v9342_v32  ;;  %3683 = vrot.lane.b32.xlu0 %v9342_v32, %s7433_s25  ;;  %v9365_v32 = vld [vmem:[%s9831_s6 + $0x18] sm:$0xff] }
 0x51d   : > { %6065 = vmatprep.mubr.f32.mxu0 %v10312_v39  ;;  %6254 = vmatprep.mubr.f32.mxu1 %v10313_v36  ;;  %v2713_v7 = vand.u32 4294901760, %v2712_v35  ;;  %v2722_v63 = vsub.f32 %v9175_v48, %v10014_v47  ;;  %v3961_v3 = vsub.f32 %v9184_v53, %v10013_v10  ;;  %v10010_v45 = vand.u32 4294901760, %v9223_v54  ;;  %v9337_v47 = vld [vmem:[%s9831_s6 + $0x8] sm:$0xff]  ;;  %10341 = vst [vmem:[#allocation51_spill] sm:$0xff] %v9365_v32 }
 0x51e   : > { %6878 = vmatprep.subr.bf16.mxu1 %v9120_v34  ;;  %v10007_v15 = vand.u32 4294901760, %v9226_v55  ;;  %v9252_v57 = vsub.f32 %v3777_v46, %v9228_v22  ;;  %v3952_v52 = vand.u32 4294901760, %v3951_v40  ;;  %v2732_v27 = vsub.f32 %v9194_v14, %v10012_v28  ;;  %v10332_v28 = vld [vmem:[#allocation42_spill] sm:$0xff]  ;;  %10333 = vst [vmem:[#allocation41_spill] sm:$0xff] %v9337_v47  ;;  %3685 = vrot.lane.b32.xlu1 %v9337_v47, %s7433_s25  ;;  %v10340_v47 = vld [vmem:[#allocation9_spill] sm:$0xff] }
 0x51f   : > { %6066 = vmatmul.mubr.f32.gmra.mrb[10].mxu0 %v2683_v60  ;;  %6255 = vmatmul.mubr.f32.gmra.mrb[12].mxu1 %v3922_v16  ;;  %v3971_v60 = vsub.f32 %v9197_v50, %v10011_v18  ;;  %v10009_v16 = vand.u32 4294901760, %v9240_v62  ;;  %v2723_v35 = vand.u32 4294901760, %v2722_v63  ;;  %v3962_v39 = vand.u32 4294901760, %v3961_v3 }
 0x520   : > { %6068 = vmatprep.mubr.f32.mxu0 %v2693_v8  ;;  %6257 = vmatprep.mubr.f32.mxu1 %v3932_v41  ;;  %v2742_v46 = vsub.f32 %v9223_v54, %v10010_v45  ;;  %v3981_v8 = vsub.f32 %v9226_v55, %v10007_v15  ;;  %v10008_v41 = vand.u32 4294901760, %v9252_v57  ;;  %v2733_v36 = vand.u32 4294901760, %v2732_v27  ;;  %v5358_v15 = vld [vmem:[%s9830_s5 + $0x80] sm:$0xff]  ;;  %v10331_v45 = vld [vmem:[#allocation31_spill] sm:$0xff] }
 0x521   : > { %v3972_v40 = vand.u32 4294901760, %v3971_v60  ;;  %v3732_v27 = vsel %vm2471_vm1, %v5358_v15, 0  ;;  %v10314_v15 = vld [vmem:[#allocation47_spill] sm:$0xff] }
 0x522   : > { %v3982_v63 = vand.u32 4294901760, %v3981_v8  ;;  %v4001_v3 = vsub.f32 %v9252_v57, %v10008_v41  ;;  %v10316_v8 = vld [vmem:[#allocation48_spill] sm:$0xff]  ;;  %v10329_v41 = vld [vmem:[#allocation38_spill] sm:$0xff]  ;;  %3689 = vrot.lane.b32.xlu1 %v9365_v32, %s7433_s25 }
 0x523   : > { %6069 = vmatmul.mubr.f32.gmra.mrb[12].mxu0 %v2703_v9  ;;  %6258 = vmatmul.mubr.f32.gmra.mrb[14].mxu1 %v3942_v12  ;;  %v3991_v9 = vsub.f32 %v9240_v62, %v10009_v16  ;;  %v2743_v12 = vand.u32 4294901760, %v2742_v46  ;;  %v10330_v16 = vld [vmem:[#allocation36_spill] sm:$0xff]  ;;  %v10350_v32 = vld [vmem:[#allocation26_spill] sm:$0xff] }
 0x524   : > { %6071 = vmatprep.mubr.f32.mxu0 %v2713_v7  ;;  %6260 = vmatprep.mubr.f32.mxu1 %v3952_v52  ;;  %v5359_v52 = vld [vmem:[%s9830_s5 + $0x88] sm:$0xff]  ;;  %v4002_v60 = vand.u32 4294901760, %v4001_v3 }
 0x525   : > { %v3992_v7 = vand.u32 4294901760, %v3991_v9  ;;  %v10321_v9 = vld [vmem:[#allocation11_spill] sm:$0xff]  ;;  %v10324_v3 = vld [vmem:[#allocation14_spill] sm:$0xff] }
 0x527   : > { %6072 = vmatmul.mubr.f32.gmra.mrb[14].mxu0 %v2723_v35  ;;  %6261 = vmatmul.mubr.f32.gmra.mrb[16].mxu1 %v3962_v39  ;;  %v3735_v35 = vsel %vm2471_vm1, %v5359_v52, 0  ;;  %v9283_v39 = vand.u32 4294901760, %v3732_v27  ;;  %v10326_v52 = vld [vmem:[#allocation19_spill] sm:$0xff] }
 0x528   : > { %6074 = vmatprep.mubr.f32.mxu0 %v2733_v36  ;;  %6263 = vmatprep.mubr.f32.mxu1 %v3972_v40  ;;  %v9286_v46 = vand.u32 4294901760, %v3735_v35  ;;  %v10317_v36 = vld [vmem:[#allocation49_spill] sm:$0xff]  ;;  %v10318_v40 = vld [vmem:[#allocation59_spill] sm:$0xff] }
 0x529   : > { %v9327_v18 = vsub.f32 %v3732_v27, %v9283_v39  ;;  %v10335_v27 = vld [vmem:[#allocation43_spill] sm:$0xff] }
 0x52a   : > { %v9332_v10 = vsub.f32 %v3735_v35, %v9286_v46  ;;  %v10336_v35 = vld [vmem:[#allocation46_spill] sm:$0xff] }
 0x52b   : > { %6075 = vmatmul.mubr.f32.gmra.mrb[16].mxu0 %v2743_v12  ;;  %6264 = vmatmul.mubr.f32.gmra.mrb[18].mxu1 %v3982_v63  ;;  %v10322_v12 = vld [vmem:[#allocation15_spill] sm:$0xff]  ;;  %v10323_v63 = vld [vmem:[#allocation20_spill] sm:$0xff] }
 0x52c   : > { %6085 = vmatprep.mubr.f32.mxu0 %v8669_v25  ;;  %6266 = vmatprep.mubr.f32.mxu1 %v3992_v7  ;;  %v10325_v7 = vld [vmem:[#allocation24_spill] sm:$0xff] }
 0x52f   : > { %6086 = vmatmul.mubr.f32.vlgmr.msra.gmra.mrb[2].mxu0 %v8734_v30  ;;  %6267 = vmatmul.mubr.f32.gmra.mrb[20].mxu1 %v4002_v60  ;;  %v10328_v60 = vld [vmem:[#allocation25_spill] sm:$0xff] }
 0x530   : > { %6832 = vmatpush3.bf16.msra.mxu0 %v9106_v24  ;;  %6088 = vmatprep.mubr.f32.mxu0 %v8741_v33  ;;  %v10315_v24 = vld [vmem:[#allocation32_spill] sm:$0xff] }
 0x531   : > { %6834 = vmatprep.subr.bf16.mxu0 %v9108_v23  ;;  %6277 = vmatprep.mubr.f32.mxu1 %v9283_v39 }
 0x533   : > { %6089 = vmatmul.mubr.f32.gmra.mrb[4].mxu0 %v8747_v51  ;;  %6278 = vmatmul.mubr.f32.vlgmr.msra.gmra.mrb[22].mxu1 %v9286_v46 }
 0x534   : > { %6836 = vmatpush3.bf16.msra.mxu0 %v9108_v23  ;;  %6880 = vmatpush3.bf16.msra.mxu1 %v9120_v34  ;;  %v10319_v23 = vld [vmem:[#allocation60_spill] sm:$0xff]  ;;  %v10320_v34 = vld [vmem:[#allocation61_spill] sm:$0xff] }
 0x535   : > { %6838 = vmatprep.subr.bf16.mxu0 %v9094_v58  ;;  %6882 = vmatprep.subr.bf16.mxu1 %v9128_v17 }
 0x536   : > { %6091 = vmatprep.mubr.f32.mxu0 %v10314_v15  ;;  %6280 = vmatprep.mubr.f32.mxu1 %v10315_v24 }
 0x537   : > { %6092 = vmatmul.mubr.f32.gmra.mrb[6].mxu0 %v10316_v8  ;;  %6281 = vmatmul.mubr.f32.gmra.mrb[8].mxu1 %v10317_v36 }
 0x538   : > { %6884 = vmatpush3.bf16.msra.mxu1 %v9128_v17  ;;  %6094 = vmatprep.mubr.f32.mxu0 %v10318_v40  ;;  %v10327_v17 = vld [vmem:[#allocation28_spill] sm:$0xff] }
 0x539   : > { %6886 = vmatprep.subr.bf16.mxu1 %v9110_v21  ;;  %6283 = vmatprep.mubr.f32.mxu1 %v10319_v23 }
 0x53b   : > { %6095 = vmatmul.mubr.f32.gmra.mrb[8].mxu0 %v10320_v34  ;;  %6284 = vmatmul.mubr.f32.gmra.mrb[10].mxu1 %v10321_v9 }
 0x53c   : > { %6097 = vmatprep.mubr.f32.mxu0 %v10322_v12  ;;  %6286 = vmatprep.mubr.f32.mxu1 %v10323_v63 }
 0x53f   : > { %6098 = vmatmul.mubr.f32.gmra.mrb[10].mxu0 %v10324_v3  ;;  %6287 = vmatmul.mubr.f32.gmra.mrb[12].mxu1 %v10325_v7 }
 0x540   : > { %6100 = vmatprep.mubr.f32.mxu0 %v10326_v52  ;;  %6289 = vmatprep.mubr.f32.mxu1 %v10327_v17  ;;  %v10360_v17 = vand.u32 4294901760, %v10331_v45  ;;  %v3860_v52 = vand.u32 4294901760, %v9332_v10 }
 0x543   : > { %6101 = vmatmul.mubr.f32.gmra.mrb[12].mxu0 %v10328_v60  ;;  %6290 = vmatmul.mubr.f32.gmra.mrb[14].mxu1 %v10329_v41  ;;  %v9408_v41 = vld [vmem:[%s9831_s6 + $0x30] sm:$0xff]  ;;  %v10355_v60 = vld [vmem:[#allocation29_spill] sm:$0xff] }
 0x544   : > { %6103 = vmatprep.mubr.f32.mxu0 %v10330_v16  ;;  %6292 = vmatprep.mubr.f32.mxu1 %v9079_v4  ;;  %v10352_v4 = vld [vmem:[#allocation33_spill] sm:$0xff]  ;;  %v9403_v16 = vld [vmem:[%s9831_s6 + $0x38] sm:$0xff]  ;;  %10354 = vst [vmem:[#allocation58_spill] sm:$0xff] %v9408_v41 }
 0x545   : > { %10353 = vst [vmem:[#allocation18_spill] sm:$0xff] %v9403_v16 }
 0x547   : > { %6104 = vmatmul.mubr.f32.gmra.mrb[14].mxu0 %v9082_v1  ;;  %6293 = vmatmul.mubr.f32.gmra.mrb[16].mxu1 %v9085_v19  ;;  %v9390_v19 = vld [vmem:[%s9831_s6 + $0x20] sm:$0xff] }
 0x548   : > { %6106 = vmatprep.mubr.f32.mxu0 %v9153_v31  ;;  %6295 = vmatprep.mubr.f32.mxu1 %v9157_v29  ;;  %v10346_v29 = vld [vmem:[#allocation17_spill] sm:$0xff]  ;;  %10348 = vst [vmem:[#allocation57_spill] sm:$0xff] %v9390_v19  ;;  %v10349_v1 = vld [vmem:[#allocation16_spill] sm:$0xff] }
 0x549   : > { %v9385_v31 = vld [vmem:[%s9831_s6 + $0x28] sm:$0xff] }
 0x54a   : > { %10347 = vst [vmem:[#allocation54_spill] sm:$0xff] %v9385_v31  ;;  %3693 = vrot.lane.b32.xlu1 %v9385_v31, %s7433_s25  ;;  %v9426_v31 = vld [vmem:[%s9831_s6 + $0x40] sm:$0xff] }
 0x54b   : > { %6107 = vmatmul.mubr.f32.gmra.mrb[16].mxu0 %v9186_v26  ;;  %6296 = vmatmul.mubr.f32.gmra.mrb[18].mxu1 %v9188_v38  ;;  %v10344_v38 = vld [vmem:[#allocation12_spill] sm:$0xff]  ;;  %v10345_v26 = vld [vmem:[#allocation10_spill] sm:$0xff]  ;;  %10357 = vst [vmem:[#allocation23_spill] sm:$0xff] %v9426_v31 }
 0x54c   : > { %6117 = vmatprep.mubr.f32.mxu0 %v10331_v45  ;;  %6298 = vmatprep.mubr.f32.mxu1 %v9199_v11  ;;  %v10343_v11 = vld [vmem:[#allocation13_spill] sm:$0xff]  ;;  %v9479_v45 = vld [vmem:[%s9831_s6 + $0x78] sm:$0xff] }
 0x54e   : > { %3697 = vrot.lane.b32.xlu1 %v9403_v16, %s7433_s25  ;;  %v9444_v16 = vld [vmem:[%s9831_s6 + $0x50] sm:$0xff] }
 0x54f   : > { %6118 = vmatmul.mubr.f32.vlgmr.msra.gmra.mrb[2].mxu0 %v10332_v28  ;;  %6299 = vmatmul.mubr.f32.gmra.mrb[20].mxu1 %v9228_v22  ;;  %v9370_v22 = vld [vmem:[%s9831_s6 + $0x10] sm:$0xff]  ;;  %10359 = vst [vmem:[#allocation47_spill] sm:$0xff] %v9444_v16 }
 0x550   : > { %6840 = vmatpush3.bf16.msra.mxu0 %v9094_v58  ;;  %6120 = vmatprep.mubr.f32.mxu0 %v10335_v27  ;;  %10342 = vst [vmem:[#allocation52_spill] sm:$0xff] %v9370_v22 }
 0x551   : > { %6842 = vmatprep.subr.bf16.mxu0 %v9096_v61  ;;  %6309 = vmatprep.mubr.f32.mxu1 %v9327_v18 }
 0x552   : > { %3687 = vrot.lane.b32.xlu0 %v9370_v22, %s7433_s25  ;;  %v10351_v22 = vld [vmem:[#allocation21_spill] sm:$0xff] }
 0x553   : > { %6121 = vmatmul.mubr.f32.gmra.mrb[4].mxu0 %v10336_v35  ;;  %6310 = vmatmul.mubr.f32.vlgmr.msra.gmra.mrb[22].mxu1 %v9332_v10 }
 0x554   : > { %6844 = vmatpush3.bf16.msra.mxu0 %v9096_v61  ;;  %6888 = vmatpush3.bf16.msra.mxu1 %v9110_v21 }
 0x555   : > { %6846 = vmatprep.subr.bf16.mxu0 %v9122_v37  ;;  %6890 = vmatprep.subr.bf16.mxu1 %v9112_v43 }
 0x556   : > { %6123 = vmatprep.mubr.f32.mxu0 %v10337_v0  ;;  %6312 = vmatprep.mubr.f32.mxu1 %v10338_v20 }
 0x557   : > { %6124 = vmatmul.mubr.f32.gmra.mrb[6].mxu0 %v10339_v56  ;;  %6313 = vmatmul.mubr.f32.gmra.mrb[8].mxu1 %v10340_v47 }
 0x558   : > { %6892 = vmatpush3.bf16.msra.mxu1 %v9112_v43  ;;  %6126 = vmatprep.mubr.f32.mxu0 %v10343_v11 }
 0x559   : > { %6894 = vmatprep.subr.bf16.mxu1 %v9137_v59  ;;  %6315 = vmatprep.mubr.f32.mxu1 %v10344_v38 }
 0x55a   : > { %3691 = vrot.lane.b32.xlu0 %v9390_v19, %s7433_s25  ;;  %v9421_v19 = vld [vmem:[%s9831_s6 + $0x48] sm:$0xff] }
 0x55b   : > { %6127 = vmatmul.mubr.f32.gmra.mrb[8].mxu0 %v10345_v26  ;;  %6316 = vmatmul.mubr.f32.gmra.mrb[10].mxu1 %v10346_v29  ;;  %10356 = vst [vmem:[#allocation22_spill] sm:$0xff] %v9421_v19 }
 0x55c   : > { %6129 = vmatprep.mubr.f32.mxu0 %v10349_v1  ;;  %6318 = vmatprep.mubr.f32.mxu1 %v10350_v32 }
 0x55d   : > { %3701 = vrot.lane.b32.xlu1 %v9421_v19, %s7433_s25  ;;  %v9462_v19 = vld [vmem:[%s9831_s6 + $0x60] sm:$0xff] }
 0x55e   : > { %3695 = vrot.lane.b32.xlu0 %v9408_v41, %s7433_s25  ;;  %v9439_v41 = vld [vmem:[%s9831_s6 + $0x58] sm:$0xff] }
 0x55f   : > { %6130 = vmatmul.mubr.f32.gmra.mrb[10].mxu0 %v10351_v22  ;;  %6319 = vmatmul.mubr.f32.gmra.mrb[12].mxu1 %v10352_v4  ;;  %10358 = vst [vmem:[#allocation27_spill] sm:$0xff] %v9439_v41 }
 0x560   : > { %6132 = vmatprep.mubr.f32.mxu0 %v10355_v60  ;;  %6321 = vmatprep.mubr.f32.mxu1 %v9016_v5 }
 0x561   : > { %3705 = vrot.lane.b32.xlu1 %v9439_v41, %s7433_s25  ;;  %v10361_v41 = vand.u32 4294901760, %v10332_v28  ;;  %v10363_v28 = vand.u32 4294901760, %v9327_v18 }
 0x562   : > { %3699 = vrot.lane.b32.xlu0 %v9426_v31, %s7433_s25  ;;  %v9457_v31 = vld [vmem:[%s9831_s6 + $0x68] sm:$0xff] }
 0x563   : > { %6133 = vmatmul.mubr.f32.gmra.mrb[12].mxu0 %v9048_v49  ;;  %6322 = vmatmul.mubr.f32.gmra.mrb[14].mxu1 %v9073_v6 }
 0x564   : > { %6135 = vmatprep.mubr.f32.mxu0 %v9076_v44  ;;  %6324 = vmatprep.mubr.f32.mxu1 %v9143_v2 }
 0x565   : > { %3709 = vrot.lane.b32.xlu1 %v9457_v31, %s7433_s25 }
 0x566   : > { %3703 = vrot.lane.b32.xlu0 %v9444_v16, %s7433_s25  ;;  %v10362_v16 = vand.u32 4294901760, %v10335_v27  ;;  %v10367_v27 = vand.u32 4294901760, %v10339_v56  ;;  %v10373_v56 = vand.u32 4294901760, %v10349_v1  ;;  %v10380_v1 = vand.u32 4294901760, %v9073_v6 }
 0x567   : > { %6136 = vmatmul.mubr.f32.gmra.mrb[14].mxu0 %v9175_v48  ;;  %6325 = vmatmul.mubr.f32.gmra.mrb[16].mxu1 %v9184_v53  ;;  %v10387_v6 = vand.u32 4294901760, %v9223_v54 }
 0x568   : > { %6138 = vmatprep.mubr.f32.mxu0 %v9194_v14  ;;  %6327 = vmatprep.mubr.f32.mxu1 %v9197_v50 }
 0x569   : > { %3713 = vrot.lane.b32.xlu1 %v9479_v45, %s7433_s25 }
 0x56a   : > { %3707 = vrot.lane.b32.xlu0 %v9462_v19, %s7433_s25 }
 0x56b   : > { %6139 = vmatmul.mubr.f32.gmra.mrb[16].mxu0 %v9223_v54  ;;  %6328 = vmatmul.mubr.f32.gmra.mrb[18].mxu1 %v9226_v55  ;;  %v10396_v54 = vld [vmem:[#allocation34_spill] sm:$0xff] }
 0x56c   : > { %6149 = vmatprep.mubr.f32.mxu0 %v10360_v17  ;;  %6330 = vmatprep.mubr.f32.mxu1 %v9240_v62  ;;  %v9484_v17 = vld [vmem:[%s9831_s6 + $0x70] sm:$0xff] }
 0x56e   : > { %3711 = vrot.lane.b32.xlu0 %v9484_v17, %s7433_s25  ;;  %s286_s25 = sand.u32 1, %s7419_s27  }
 0x56f   : > { %6150 = vmatmul.mubr.f32.vlgmr.msra.gmra.mrb[2].mxu0 %v10361_v41  ;;  %6331 = vmatmul.mubr.f32.gmra.mrb[20].mxu1 %v9252_v57  ;;  %v10364_v41 = vand.u32 4294901760, %v10336_v35  ;;  %v10368_v35 = vand.u32 4294901760, %v10340_v47  ;;  %v10374_v47 = vand.u32 4294901760, %v10350_v32  ;;  %v10381_v32 = vand.u32 4294901760, %v9076_v44  ;;  %s5355_s20 = sshll.u32 %s286_s25, 8  ;;  %s9784_s2 = scalar_lea.sflag [#allocation5], %s286_s25 }
 0x570   : > { %6848 = vmatpush3.bf16.msra.mxu0 %v9122_v37  ;;  %6152 = vmatprep.mubr.f32.mxu0 %v10362_v16  ;;  %v10365_v37 = vand.u32 4294901760, %v10337_v0  ;;  %v10366_v16 = vand.u32 4294901760, %v10338_v20  ;;  %v10371_v0 = vand.u32 4294901760, %v10345_v26  ;;  %v10372_v20 = vand.u32 4294901760, %v10346_v29  ;;  %s9695_s14 = scalar_lea.vmem [#allocation6], %s5355_s20 }
 0x571   : > { %6850 = vmatprep.subr.bf16.mxu0 %v9130_v13  ;;  %6341 = vmatprep.mubr.f32.mxu1 %v10363_v28  ;;  %v10378_v26 = vand.u32 4294901760, %v9016_v5  ;;  %v10379_v29 = vand.u32 4294901760, %v9048_v49  ;;  %v10385_v5 = vand.u32 4294901760, %v9194_v14  ;;  %v10386_v49 = vand.u32 4294901760, %v9197_v50  ;;  %v10394_v14 = vld [vmem:[#allocation38_spill] sm:$0xff]  ;;  %v10395_v50 = vld [vmem:[#allocation36_spill] sm:$0xff] }
 0x572   : > { %v10388_v44 = vand.u32 4294901760, %v9226_v55  ;;  %v10397_v55 = vld [vmem:[#allocation30_spill] sm:$0xff]  ;;  %v10400_v28 = vld [vmem:[#allocation39_spill] sm:$0xff]  ;;  %s5275_s22 = sshll.u32 %s9695_s14, 4  ;;  %s9776_s22 = int_to_ptr.vmem [resolvable:$true] %s5275_s22 }
 0x573   : > { %6153 = vmatmul.mubr.f32.gmra.mrb[4].mxu0 %v10364_v41  ;;  %6342 = vmatmul.mubr.f32.vlgmr.msra.gmra.mrb[22].mxu1 %v3860_v52  ;;  %v10401_v41 = vld [vmem:[#allocation37_spill] sm:$0xff]  ;;  %p7368_p2 = scmp.lt.s32.totalorder %s9776_s22, %s7366_s10 }
 0x574   : > { %6852 = vmatpush3.bf16.msra.mxu0 %v9130_v13  ;;  %6896 = vmatpush3.bf16.msra.mxu1 %v9137_v59  ;;  %v10369_v13 = vand.u32 4294901760, %v10343_v11  ;;  %v10370_v59 = vand.u32 4294901760, %v10344_v38  ;;  %v10376_v11 = vand.u32 4294901760, %v10352_v4  ;;  %v10377_v38 = vand.u32 4294901760, %v10355_v60 }
 0x575   : > { %6854 = vmatprep.subr.bf16.mxu0 %v9094_v58  ;;  %6898 = vmatprep.subr.bf16.mxu1 %v9148_v42  ;;  %v10383_v4 = vand.u32 4294901760, %v9175_v48  ;;  %v10384_v60 = vand.u32 4294901760, %v9184_v53  ;;  %v10390_v48 = vand.u32 4294901760, %v9252_v57  ;;  %v10393_v53 = vld [vmem:[#allocation25_spill] sm:$0xff]  ;;  %v10399_v57 = vld [vmem:[#allocation40_spill] sm:$0xff] }
 0x576   : > { %6155 = vmatprep.mubr.f32.mxu0 %v10365_v37  ;;  %6344 = vmatprep.mubr.f32.mxu1 %v10366_v16  ;;  %v10402_v37 = vld [vmem:[#allocation55_spill] sm:$0xff]  ;;  %v10403_v16 = vld [vmem:[#allocation50_spill] sm:$0xff] }
 0x577   : > { %6156 = vmatmul.mubr.f32.gmra.mrb[6].mxu0 %v10367_v27  ;;  %6345 = vmatmul.mubr.f32.gmra.mrb[8].mxu1 %v10368_v35  ;;  %v10404_v27 = vld [vmem:[#allocation45_spill] sm:$0xff] }
 0x578   : > { %6900 = vmatpush3.bf16.msra.mxu1 %v9148_v42  ;;  %6158 = vmatprep.mubr.f32.mxu0 %v10369_v13  ;;  %v10375_v42 = vand.u32 4294901760, %v10351_v22  ;;  %v10382_v22 = vand.u32 4294901760, %v9143_v2  ;;  %v10389_v2 = vand.u32 4294901760, %v9240_v62  ;;  %v10398_v62 = vld [vmem:[#allocation44_spill] sm:$0xff] }
 0x579   : > { %6902 = vmatprep.subr.bf16.mxu1 %v9110_v21  ;;  %6347 = vmatprep.mubr.f32.mxu1 %v10370_v59 }
 0x57b   : > { %6159 = vmatmul.mubr.f32.gmra.mrb[8].mxu0 %v10371_v0  ;;  %6348 = vmatmul.mubr.f32.gmra.mrb[10].mxu1 %v10372_v20  ;;  %v10409_v0 = vld [vmem:[#allocation52_spill] sm:$0xff] }
 0x57c   : > { %6161 = vmatprep.mubr.f32.mxu0 %v10373_v56  ;;  %6350 = vmatprep.mubr.f32.mxu1 %v10374_v47 }
 0x57f   : > { %6162 = vmatmul.mubr.f32.gmra.mrb[10].mxu0 %v10375_v42  ;;  %6351 = vmatmul.mubr.f32.gmra.mrb[12].mxu1 %v10376_v11 }
 0x580   : > { %6164 = vmatprep.mubr.f32.mxu0 %v10377_v38  ;;  %6353 = vmatprep.mubr.f32.mxu1 %v10378_v26  ;;  %v10410_v38 = vld [vmem:[#allocation54_spill] sm:$0xff] }
 0x583   : > { %6165 = vmatmul.mubr.f32.gmra.mrb[12].mxu0 %v10379_v29  ;;  %6354 = vmatmul.mubr.f32.gmra.mrb[14].mxu1 %v10380_v1 }
 0x584   : > { %6167 = vmatprep.mubr.f32.mxu0 %v10381_v32  ;;  %6356 = vmatprep.mubr.f32.mxu1 %v10382_v22  ;;  %v10411_v22 = vld [vmem:[#allocation57_spill] sm:$0xff] }
 0x587   : > { %6168 = vmatmul.mubr.f32.gmra.mrb[14].mxu0 %v10383_v4  ;;  %6357 = vmatmul.mubr.f32.gmra.mrb[16].mxu1 %v10384_v60 }
 0x588   : > { %6170 = vmatprep.mubr.f32.mxu0 %v10385_v5  ;;  %6359 = vmatprep.mubr.f32.mxu1 %v10386_v49 }
 0x58b   : > { %6171 = vmatmul.mubr.f32.gmra.mrb[16].mxu0 %v10387_v6  ;;  %6360 = vmatmul.mubr.f32.gmra.mrb[18].mxu1 %v10388_v44 }
 0x58c   : > { %6181 = vmatprep.mubr.f32.mxu0 %v8669_v25  ;;  %6362 = vmatprep.mubr.f32.mxu1 %v10389_v2  ;;  %v10412_v2 = vld [vmem:[#allocation18_spill] sm:$0xff] }
 0x58f   : > { %6182 = vmatmul.mubr.f32.vlgmr.msra.gmra.mrb[2].mxu0 %v8734_v30  ;;  %6363 = vmatmul.mubr.f32.gmra.mrb[20].mxu1 %v10390_v48 }
 0x590   : > { %6856 = vmatpush3.bf16.msra.mxu0 %v9094_v58  ;;  %6184 = vmatprep.mubr.f32.mxu0 %v8741_v33  ;;  %v10392_v58 = vld [vmem:[#allocation28_spill] sm:$0xff] }
 0x591   : > { %6858 = vmatprep.subr.bf16.mxu0 %v9096_v61  ;;  %6373 = vmatprep.mubr.f32.mxu1 %v9283_v39 }
 0x593   : > { %6185 = vmatmul.mubr.f32.gmra.mrb[4].mxu0 %v8747_v51  ;;  %6374 = vmatmul.mubr.f32.vlgmr.msra.gmra.mrb[22].mxu1 %v9286_v46 }
 0x594   : > { %6860 = vmatpush3.bf16.msra.mxu0 %v9096_v61  ;;  %6904 = vmatpush3.bf16.msra.mxu1 %v9110_v21  ;;  %v10391_v61 = vld [vmem:[#allocation19_spill] sm:$0xff] }
 0x595   : > { %6862 = vmatprep.subr.bf16.mxu0 %v9110_v21  ;;  %6906 = vmatprep.subr.bf16.mxu1 %v9112_v43 }
 0x596   : > { %6187 = vmatprep.mubr.f32.mxu0 %v10314_v15  ;;  %6376 = vmatprep.mubr.f32.mxu1 %v10315_v24 }
 0x597   : > { %6188 = vmatmul.mubr.f32.gmra.mrb[6].mxu0 %v10316_v8  ;;  %6377 = vmatmul.mubr.f32.gmra.mrb[8].mxu1 %v10317_v36 }
 0x598   : > { %6908 = vmatpush3.bf16.msra.mxu1 %v9112_v43  ;;  %6190 = vmatprep.mubr.f32.mxu0 %v10318_v40 }
 0x599   : > { %6379 = vmatprep.mubr.f32.mxu1 %v10319_v23 }
 0x59b   : > { %6191 = vmatmul.mubr.f32.gmra.mrb[8].mxu0 %v10320_v34  ;;  %6380 = vmatmul.mubr.f32.gmra.mrb[10].mxu1 %v10321_v9 }
 0x59c   : > { %6193 = vmatprep.mubr.f32.mxu0 %v10322_v12  ;;  %6382 = vmatprep.mubr.f32.mxu1 %v10323_v63 }
 0x59f   : > { %6194 = vmatmul.mubr.f32.gmra.mrb[10].mxu0 %v10324_v3  ;;  %6383 = vmatmul.mubr.f32.gmra.mrb[12].mxu1 %v10325_v7 }
 0x5a0   : > { %6196 = vmatprep.mubr.f32.mxu0 %v10391_v61  ;;  %6385 = vmatprep.mubr.f32.mxu1 %v10392_v58 }
 0x5a3   : > { %6197 = vmatmul.mubr.f32.gmra.mrb[12].mxu0 %v10393_v53  ;;  %6386 = vmatmul.mubr.f32.gmra.mrb[14].mxu1 %v10394_v14 }
 0x5a4   : > { %6199 = vmatprep.mubr.f32.mxu0 %v10395_v50  ;;  %6388 = vmatprep.mubr.f32.mxu1 %v10396_v54 }
 0x5a7   : > { %6200 = vmatmul.mubr.f32.gmra.mrb[14].mxu0 %v10397_v55  ;;  %6389 = vmatmul.mubr.f32.gmra.mrb[16].mxu1 %v10398_v62 }
 0x5a8   : > { %6202 = vmatprep.mubr.f32.mxu0 %v10399_v57  ;;  %6391 = vmatprep.mubr.f32.mxu1 %v10400_v28 }
 0x5ab   : > { %6203 = vmatmul.mubr.f32.gmra.mrb[16].mxu0 %v10401_v41  ;;  %6392 = vmatmul.mubr.f32.gmra.mrb[18].mxu1 %v10402_v37 }
 0x5ac   : > { %6213 = vmatprep.mubr.f32.mxu0 %v8669_v25  ;;  %6394 = vmatprep.mubr.f32.mxu1 %v10403_v16  ;;  %v10405_v25 = vand.u32 4294901760, %v9327_v18 }
 0x5af   : > { %6214 = vmatmul.mubr.f32.vlgmr.msra.gmra.mrb[2].mxu0 %v8734_v30  ;;  %6395 = vmatmul.mubr.f32.gmra.mrb[20].mxu1 %v10404_v27  ;;  %v3851_v30 = vsub.f32 %v9327_v18, %v10405_v25  ;;  %v9640_v18 = vpop.permute.xlu0 %3683 }
 0x5b0   : > { %6864 = vmatpush3.bf16.msra.mxu0 %v9110_v21  ;;  %6216 = vmatprep.mubr.f32.mxu0 %v8741_v33  ;;  %v3861_v33 = vsub.f32 %v9332_v10, %v3860_v52  ;;  %v9638_v10 = vpop.permute.xlu1 %3685  ;;  %v10408_v52 = vld [vmem:[#allocation51_spill] sm:$0xff] }
 0x5b1   : > { %6866 = vmatprep.subr.bf16.mxu0 %v9112_v43  ;;  %6405 = vmatprep.mubr.f32.mxu1 %v9283_v39 }
 0x5b2   : > { %v3862_v21 = vand.u32 4294901760, %v3861_v33 }
 0x5b3   : > { %6217 = vmatmul.mubr.f32.gmra.mrb[4].mxu0 %v8747_v51  ;;  %6406 = vmatmul.mubr.f32.vlgmr.msra.gmra.mrb[22].mxu1 %v9286_v46  ;;  %v3852_v51 = vand.u32 4294901760, %v3851_v30 }
 0x5b4   : > { %6868 = vmatpush3.bf16.msra.mxu0 %v9112_v43  ;;  %6219 = vmatprep.mubr.f32.mxu0 %v10314_v15  ;;  %v7435_v43 = vmov 0   ;;  %v3690_v39 = vpop.permute.xlu1 %3689 }
 0x5b5   : > { %6408 = vmatprep.mubr.f32.mxu1 %v10315_v24  ;;  %7225 = vset.pattern.permute.xlu0 %v7435_v43 }
 0x5b6   : > { %7226 = vset.pattern.permute.xlu1 %v7435_v43 }
 0x5b7   : > { %6220 = vmatmul.mubr.f32.gmra.mrb[6].mxu0 %v10316_v8  ;;  %6409 = vmatmul.mubr.f32.gmra.mrb[8].mxu1 %v10317_v36 }
 0x5b8   : > { %6222 = vmatprep.mubr.f32.mxu0 %v10318_v40  ;;  %6411 = vmatprep.mubr.f32.mxu1 %v10319_v23  ;;  %v10406_v40 = vld [vmem:[#allocation41_spill] sm:$0xff] }
 0x5bb   : > { %6223 = vmatmul.mubr.f32.gmra.mrb[8].mxu0 %v10320_v34  ;;  %6412 = vmatmul.mubr.f32.gmra.mrb[10].mxu1 %v10321_v9 }
 0x5bc   : > { %6225 = vmatprep.mubr.f32.mxu0 %v10322_v12  ;;  %6414 = vmatprep.mubr.f32.mxu1 %v10323_v63  ;;  %v3694_v15 = vpop.permute.xlu1 %3693  ;;  %v10407_v12 = vld [vmem:[#allocation56_spill] sm:$0xff] }
 0x5bf   : > { %6226 = vmatmul.mubr.f32.gmra.mrb[10].mxu0 %v10324_v3  ;;  %6415 = vmatmul.mubr.f32.gmra.mrb[12].mxu1 %v10325_v7 }
 0x5c0   : > { %6228 = vmatprep.mubr.f32.mxu0 %v10391_v61  ;;  %6417 = vmatprep.mubr.f32.mxu1 %v10392_v58  ;;  %v3698_v36 = vpop.permute.xlu1 %3697 }
 0x5c3   : > { %6229 = vmatmul.mubr.f32.gmra.mrb[12].mxu0 %v10393_v53  ;;  %6418 = vmatmul.mubr.f32.gmra.mrb[14].mxu1 %v10394_v14  ;;  %v10413_v14 = vld [vmem:[#allocation58_spill] sm:$0xff] }
 0x5c4   : > { %6231 = vmatprep.mubr.f32.mxu0 %v10395_v50  ;;  %6420 = vmatprep.mubr.f32.mxu1 %v10396_v54  ;;  %v3688_v46 = vpop.permute.xlu0 %3687 }
 0x5c7   : > { %6232 = vmatmul.mubr.f32.gmra.mrb[14].mxu0 %v10397_v55  ;;  %6421 = vmatmul.mubr.f32.gmra.mrb[16].mxu1 %v10398_v62 }
 0x5c8   : > { %6234 = vmatprep.mubr.f32.mxu0 %v10399_v57  ;;  %6423 = vmatprep.mubr.f32.mxu1 %v10400_v28 }
 0x5cb   : > { %6235 = vmatmul.mubr.f32.gmra.mrb[16].mxu0 %v10401_v41  ;;  %6424 = vmatmul.mubr.f32.gmra.mrb[18].mxu1 %v10402_v37 }
 0x5cc   : > { %6245 = vmatprep.mubr.f32.mxu0 %v3852_v51  ;;  %6426 = vmatprep.mubr.f32.mxu1 %v10403_v16  ;;  %v3692_v24 = vpop.permute.xlu0 %3691  ;;  %v10414_v16 = vld [vmem:[#allocation22_spill] sm:$0xff]  ;;  %v10415_v51 = vld [vmem:[#allocation23_spill] sm:$0xff] }
 0x5cf   : > { %6246 = vmatmul.mubr.f32.vlgmr.msra.gmra.mrb[18].mxu0 %v3862_v21  ;;  %6427 = vmatmul.mubr.f32.gmra.mrb[20].mxu1 %v10404_v27  ;;  %v3702_v56 = vpop.permute.xlu1 %3701 }
 0x5d0   : > { %v3696_v9 = vpop.permute.xlu0 %3695 }
 0x5d3   : > { %v3706_v62 = vpop.permute.xlu1 %3705 }
 0x5d4   : > { %v3700_v47 = vpop.permute.xlu0 %3699 }
 0x5d8   : > { %v3704_v57 = vpop.permute.xlu0 %3703 }
 0x682   : > { %v6215_v8 = vpop.f32.mrb[2].mxu0 }
 0x683   : > { %v6923_v23 = vadd.f32 %v6215_v8, %v10406_v40  ;;  %v3556_v34 = vpop.f32.mrb[3].mxu0  ;;  %v10416_v8 = vld [vmem:[#allocation27_spill] sm:$0xff] }
 0x684   : > { %v6924_v63 = vadd.f32 %v3556_v34, %v10407_v12 }
 0x685   : > { %5124 = vperm.xlu0 %7225, %v6923_v23  }
 0x686   : > { %v6218_v3 = vpop.f32.mrb[4].mxu0  ;;  %5119 = vperm.xlu1 %7226, %v6924_v63   ;;  %v9644_v7 = vpop.f32.mrb[22].mxu1 }
 0x687   : > { %v6925_v35 = vadd.f32 %v6218_v3, %v10408_v52  ;;  %v3568_v13 = vpop.f32.mrb[5].mxu0  ;;  %v9647_v59 = vpop.f32.mrb[23].mxu1 }
 0x688   : > { %v6926_v20 = vadd.f32 %v3568_v13, %v10409_v0  ;;  %v3708_v13 = vpop.permute.xlu0 %3707 }
 0x689   : > { %5134 = vperm.xlu0 %7225, %v6925_v35  }
 0x68a   : > { %v6221_v42 = vpop.f32.mrb[6].mxu0  ;;  %5129 = vperm.xlu1 %7226, %v6926_v20   ;;  %v6410_v11 = vpop.f32.mrb[8].mxu1 }
 0x68b   : > { %v6927_v26 = vadd.f32 %v6221_v42, %v10410_v38  ;;  %v6943_v29 = vadd.f32 %v6410_v11, %v3690_v39  ;;  %v3580_v1 = vpop.f32.mrb[7].mxu0  ;;  %v4827_v32 = vpop.f32.mrb[9].mxu1 }
 0x68c   : > { %v6928_v4 = vadd.f32 %v3580_v1, %v10411_v22  ;;  %v6944_v60 = vadd.f32 %v4827_v32, %v3688_v46 }
 0x68d   : > { %v5377_v5 = vmul.f32 -1.442695, %v6943_v29  ;;  %5144 = vperm.xlu0 %7225, %v6927_v26  }
 0x68e   : > { %v5376_v49 = vmul.f32 -1.442695, %v6944_v60  ;;  %v6224_v6 = vpop.f32.mrb[8].mxu0  ;;  %5139 = vperm.xlu1 %7226, %v6928_v4   ;;  %v6413_v44 = vpop.f32.mrb[10].mxu1 }
 0x68f   : > { %7237 = vpow2.f32 %v5377_v5  ;;  %v6929_v48 = vadd.f32 %v6224_v6, %v10412_v2  ;;  %v6945_v61 = vadd.f32 %v6413_v44, %v3694_v15  ;;  %v3592_v58 = vpop.f32.mrb[9].mxu0  ;;  %v4839_v53 = vpop.f32.mrb[11].mxu1 }
 0x690   : > { %7239 = vpow2.f32 %v5376_v49  ;;  %v6930_v50 = vadd.f32 %v3592_v58, %v10413_v14  ;;  %v6946_v54 = vadd.f32 %v4839_v53, %v3692_v24 }
 0x691   : > { %v5379_v55 = vmul.f32 -1.442695, %v6945_v61  ;;  %5154 = vperm.xlu0 %7225, %v6929_v48  }
 0x692   : > { %v5378_v28 = vmul.f32 -1.442695, %v6946_v54  ;;  %v6227_v41 = vpop.f32.mrb[10].mxu0  ;;  %5149 = vperm.xlu1 %7226, %v6930_v50   ;;  %v6416_v37 = vpop.f32.mrb[12].mxu1 }
 0x693   : > { %7241 = vpow2.f32 %v5379_v55  ;;  %v6931_v27 = vadd.f32 %v6227_v41, %v10414_v16  ;;  %v6947_v25 = vadd.f32 %v6416_v37, %v3698_v36  ;;  %v3604_v30 = vpop.f32.mrb[11].mxu0  ;;  %v4851_v33 = vpop.f32.mrb[13].mxu1  ;;  %v10417_v36 = vld [vmem:[#allocation47_spill] sm:$0xff] }
 0x694   : > { %7243 = vpow2.f32 %v5378_v28  ;;  %v6932_v21 = vadd.f32 %v3604_v30, %v10415_v51  ;;  %v6948_v43 = vadd.f32 %v4851_v33, %v3696_v9  ;;  %v3710_v9 = vpop.permute.xlu1 %3709  ;;  %v3712_v54 = vpop.permute.xlu0 %3711 }
 0x695   : > { %v5381_v39 = vmul.f32 -1.442695, %v6947_v25  ;;  %5164 = vperm.xlu0 %7225, %v6931_v27  }
 0x696   : > { %v5380_v46 = vmul.f32 -1.442695, %v6948_v43  ;;  %v6230_v15 = vpop.f32.mrb[12].mxu0  ;;  %5159 = vperm.xlu1 %7226, %v6932_v21   ;;  %v6419_v24 = vpop.f32.mrb[14].mxu1 }
 0x697   : > { %7245 = vpow2.f32 %v5381_v39  ;;  %v6933_v40 = vadd.f32 %v6230_v15, %v10416_v8  ;;  %v6949_v23 = vadd.f32 %v6419_v24, %v3702_v56  ;;  %v3616_v34 = vpop.f32.mrb[13].mxu0  ;;  %v4863_v12 = vpop.f32.mrb[15].mxu1 }
 0x698   : > { %7247 = vpow2.f32 %v5380_v46  ;;  %v6934_v63 = vadd.f32 %v3616_v34, %v10417_v36  ;;  %v6950_v3 = vadd.f32 %v4863_v12, %v3700_v47  ;;  %v3714_v53 = vpop.permute.xlu1 %3713 }
 0x699   : > { %v7238_v52 = vpop.eup %7237  ;;  %v5383_v35 = vmul.f32 -1.442695, %v6949_v23  ;;  %5174 = vperm.xlu0 %7225, %v6933_v40  }
 0x69a   : > { %v7240_v0 = vpop.eup %7239  ;;  %v4960_v20 = vadd.f32 1.0, %v7238_v52  ;;  %v5382_v42 = vmul.f32 -1.442695, %v6950_v3  ;;  %v6233_v11 = vpop.f32.mrb[14].mxu0  ;;  %5169 = vperm.xlu1 %7226, %v6934_v63  }
 0x69b   : > { %v6422_v38 = vpop.f32.mrb[16].mxu1  ;;  %v4959_v26 = vadd.f32 1.0, %v7240_v0  ;;  %7249 = vpow2.f32 %v5383_v35  ;;  %v6935_v56 = vadd.f32 %v6233_v11, %v9457_v31  ;;  %v3628_v1 = vpop.f32.mrb[15].mxu0 }
 0x69c   : > { %v6951_v29 = vadd.f32 %v6422_v38, %v3706_v62  ;;  %v4875_v32 = vpop.f32.mrb[17].mxu1  ;;  %7251 = vrcp.f32 %v4960_v20  ;;  %v6936_v47 = vadd.f32 %v3628_v1, %v9462_v19 }
 0x69d   : > { %v6952_v22 = vadd.f32 %v4875_v32, %v3704_v57  ;;  %v7242_v4 = vpop.eup %7241  ;;  %7253 = vrcp.f32 %v4959_v26  ;;  %5184 = vperm.xlu0 %7225, %v6935_v56  }
 0x69e   : > { %v5385_v60 = vmul.f32 -1.442695, %v6951_v29  ;;  %v7244_v5 = vpop.eup %7243  ;;  %v4962_v49 = vadd.f32 1.0, %v7242_v4  ;;  %7255 = vpow2.f32 %v5382_v42  ;;  %v9660_v44 = vpop.f32.mrb[16].mxu0  ;;  %5179 = vperm.xlu1 %7226, %v6936_v47  }
 0x69f   : > { %v5384_v6 = vmul.f32 -1.442695, %v6952_v22  ;;  %v6425_v2 = vpop.f32.mrb[18].mxu1  ;;  %v4961_v31 = vadd.f32 1.0, %v7244_v5  ;;  %v9662_v61 = vpop.f32.mrb[17].mxu0 }
 0x6a0   : > { %7257 = vpow2.f32 %v5385_v60  ;;  %v6953_v48 = vadd.f32 %v6425_v2, %v3710_v9  ;;  %v4887_v58 = vpop.f32.mrb[19].mxu1 }
 0x6a1   : > { %7259 = vrcp.f32 %v4962_v49  ;;  %v6954_v19 = vadd.f32 %v4887_v58, %v3708_v13  ;;  %v7246_v14 = vpop.eup %7245 }
 0x6a2   : > { %7261 = vrcp.f32 %v4961_v31  ;;  %v5387_v50 = vmul.f32 -1.442695, %v6953_v48  ;;  %v7248_v55 = vpop.eup %7247  ;;  %v4964_v62 = vadd.f32 1.0, %v7246_v14  ;;  %v6247_v28 = vpop.f32.mrb[18].mxu0  ;;  %v6937_v48 = vadd.f32 %v9660_v44, %v9479_v45 }
 0x6a3   : > { %7263 = vpow2.f32 %v5384_v6  ;;  %v5386_v57 = vmul.f32 -1.442695, %v6954_v19  ;;  %v6428_v41 = vpop.f32.mrb[20].mxu1  ;;  %v4963_v37 = vadd.f32 1.0, %v7248_v55  ;;  %v3865_v16 = vadd.f32 %v6247_v28, %v9638_v10  ;;  %v3854_v25 = vpop.f32.mrb[19].mxu0 }
 0x6a4   : > { %7265 = vpow2.f32 %v5387_v50  ;;  %v6955_v27 = vadd.f32 %v6428_v41, %v3714_v53  ;;  %v4899_v30 = vpop.f32.mrb[21].mxu1  ;;  %v3855_v33 = vadd.f32 %v3854_v25, %v9640_v18  ;;  %v6938_v19 = vadd.f32 %v9662_v61, %v9484_v17 }
 0x6a5   : > { %7267 = vrcp.f32 %v4964_v62  ;;  %v7250_v51 = vpop.eup %7249  ;;  %v6940_v21 = vadd.f32 %v9644_v7, %v3865_v16  ;;  %v6956_v39 = vadd.f32 %v4899_v30, %v3712_v54  ;;  %v7302_v30 = vld [vmem:[%s7571_s16 + $0x38] sm:$0xff] }
 0x6a6   : > { %7269 = vrcp.f32 %v4963_v37  ;;  %v5389_v43 = vmul.f32 -1.442695, %v6955_v27  ;;  %v7252_v46 = vpop.eup %7251  ;;  %v4966_v15 = vadd.f32 1.0, %v7250_v51  ;;  %v6942_v24 = vadd.f32 %v9647_v59, %v3855_v33  ;;  %v7301_v27 = vld [vmem:[%s7571_s16 + $0x30] sm:$0xff] }
 0x6a7   : > { %7271 = vpow2.f32 %v5386_v57  ;;  %v7254_v8 = vpop.eup %7253  ;;  %v5375_v40 = vmul.f32 -1.442695, %v6940_v21  ;;  %5022 = vperm.xlu0 %7225, %v7252_v46   ;;  %v5388_v12 = vmul.f32 -1.442695, %v6956_v39  ;;  %v7303_v21 = vld [vmem:[%s7571_s16 + $0x20] sm:$0xff]  ;;  %v7304_v39 = vld [vmem:[%s7571_s16 + $0x28] sm:$0xff] }
 0x6a8   : > { %7273 = vpow2.f32 %v5389_v43  ;;  %v7256_v10 = vpop.eup %7255  ;;  %v5374_v23 = vmul.f32 -1.442695, %v6942_v24  ;;  %5017 = vperm.xlu1 %7226, %v7254_v8  }
 0x6a9   : > { %7275 = vrcp.f32 %v4966_v15  ;;  %v4965_v34 = vadd.f32 1.0, %v7256_v10 }
 0x6aa   : > { %v7258_v18 = vpop.eup %7257  ;;  %7277 = vpow2.f32 %v5375_v40 }
 0x6ab   : > { %v7260_v7 = vpop.eup %7259  ;;  %v4968_v36 = vadd.f32 1.0, %v7258_v18  ;;  %7279 = vpow2.f32 %v5374_v23  ;;  %v7305_v23 = vld [vmem:[%s7571_s16 + $0x50] sm:$0xff] }
 0x6ac   : > { %v7262_v63 = vpop.eup %7261  ;;  %7281 = vrcp.f32 %v4965_v34  ;;  %5032 = vperm.xlu0 %7225, %v7260_v7   ;;  %v7306_v34 = vld [vmem:[%s7571_s16 + $0x58] sm:$0xff] }
 0x6ad   : > { %v7264_v3 = vpop.eup %7263  ;;  %7283 = vrcp.f32 %v4968_v36  ;;  %5027 = vperm.xlu1 %7226, %v7262_v63   ;;  %v7307_v36 = vld [vmem:[%s7571_s16 + $0x40] sm:$0xff] }
 0x6ae   : > { %v7266_v59 = vpop.eup %7265  ;;  %v4967_v52 = vadd.f32 1.0, %v7264_v3  ;;  %7285 = vpow2.f32 %v5388_v12  ;;  %v7308_v3 = vld [vmem:[%s7571_s16 + $0x48] sm:$0xff] }
 0x6af   : > { %v7268_v35 = vpop.eup %7267  ;;  %v4970_v9 = vadd.f32 1.0, %v7266_v59 }
 0x6b0   : > { %v7270_v13 = vpop.eup %7269  ;;  %7287 = vrcp.f32 %v4967_v52  ;;  %5042 = vperm.xlu0 %7225, %v7268_v35  }
 0x6b1   : > { %v7272_v0 = vpop.eup %7271  ;;  %7289 = vrcp.f32 %v4970_v9  ;;  %5037 = vperm.xlu1 %7226, %v7270_v13  }
 0x6b2   : > { %v7274_v20 = vpop.eup %7273  ;;  %v4969_v42 = vadd.f32 1.0, %v7272_v0 }
 0x6b3   : > { %v7276_v11 = vpop.eup %7275  ;;  %v4972_v38 = vadd.f32 1.0, %v7274_v20  ;;  %v7309_v20 = vld [vmem:[%s7571_s16 + $0x70] sm:$0xff] }
 0x6b4   : > { %v7278_v26 = vpop.eup %7277  ;;  %7291 = vrcp.f32 %v4969_v42  ;;  %5052 = vperm.xlu0 %7225, %v7276_v11   ;;  %v7310_v11 = vld [vmem:[%s7571_s16 + $0x78] sm:$0xff] }
 0x6b5   : > { %v7280_v56 = vpop.eup %7279  ;;  %7293 = vrcp.f32 %v4972_v38  ;;  %v4958_v5 = vadd.f32 1.0, %v7278_v26 }
 0x6b6   : > { %v7282_v29 = vpop.eup %7281  ;;  %v4957_v1 = vadd.f32 1.0, %v7280_v56  ;;  %v7311_v56 = vld [vmem:[%s7571_s16 + $0x60] sm:$0xff] }
 0x6b7   : > { %v7284_v32 = vpop.eup %7283  ;;  %5047 = vperm.xlu1 %7226, %v7282_v29  }
 0x6b8   : > { %v7286_v47 = vpop.eup %7285  ;;  %7295 = vrcp.f32 %v4957_v1  ;;  %5062 = vperm.xlu0 %7225, %v7284_v32   ;;  %v7312_v1 = vld [vmem:[%s7571_s16 + $0x68] sm:$0xff] }
 0x6b9   : > { %v4971_v22 = vadd.f32 1.0, %v7286_v47 }
 0x6ba   : > { %v7288_v4 = vpop.eup %7287 }
 0x6bb   : > { %v7290_v60 = vpop.eup %7289  ;;  %7297 = vrcp.f32 %v4971_v22  ;;  %5057 = vperm.xlu1 %7226, %v7288_v4  }
 0x6bc   : > { %5072 = vperm.xlu0 %7225, %v7290_v60   ;;  %7299 = vrcp.f32 %v4958_v5 }
 0x6be   : > { %v7292_v49 = vpop.eup %7291 }
 0x6bf   : > { %v7294_v6 = vpop.eup %7293  ;;  %5067 = vperm.xlu1 %7226, %v7292_v49   ;;  %v7313_v49 = vld [vmem:[%s7571_s16 + $0x90] sm:$0xff] }
 0x6c0   : > { %5082 = vperm.xlu0 %7225, %v7294_v6  }
 0x6c2   : > { %v7296_v2 = vpop.eup %7295 }
 0x6c4   : > { %5007 = vperm.xlu0 %7225, %v7296_v2   ;;  %v7314_v2 = vld [vmem:[%s7571_s16 + $0x98] sm:$0xff] }
 0x6c5   : > { %v7298_v31 = vpop.eup %7297 }
 0x6c6   : > { %5077 = vperm.xlu1 %7226, %v7298_v31   ;;  %v7300_v58 = vpop.eup %7299 }
 0x6c8   : > { %5194 = vperm.xlu0 %7225, %v6937_v48  }
 0x6ca   : > { %5012 = vperm.xlu1 %7226, %v7300_v58  }
 0x6ce   : > { %5189 = vperm.xlu1 %7226, %v6938_v19  }
 0x704   : > { %v9672_v53 = vpop.permute.xlu0 %5124 }
 0x705   : > { %v9674_v14 = vpop.permute.xlu1 %5119 }
 0x708   : > { %v5135_v50 = vpop.permute.xlu0 %5134 }
 0x709   : > { %v5130_v54 = vpop.permute.xlu1 %5129 }
 0x70c   : > { %v5145_v55 = vpop.permute.xlu0 %5144 }
 0x70d   : > { %v5140_v45 = vpop.permute.xlu1 %5139 }
 0x710   : > { %v5155_v44 = vpop.permute.xlu0 %5154 }
 0x711   : > { %v5150_v62 = vpop.permute.xlu1 %5149 }
 0x714   : > { %v9676_v57 = vpop.permute.xlu0 %5164 }
 0x715   : > { %v9678_v28 = vpop.permute.xlu1 %5159 }
 0x718   : > { %v9680_v17 = vpop.permute.xlu0 %5174 }
 0x719   : > { %v9682_v61 = vpop.permute.xlu1 %5169 }
 0x71c   : > { %v9684_v41 = vpop.permute.xlu0 %5184 }
 0x71d   : > { %v9687_v37 = vpop.permute.xlu1 %5179 }
 0x726   : > { %v5023_v16 = vpop.permute.xlu0 %5022 }
 0x727   : > { %v5091_v25 = vmul.f32 %v7301_v27, %v5023_v16  ;;  %v5092_v33 = vmul.f32 %v7302_v30, %v5023_v16  ;;  %v5018_v51 = vpop.permute.xlu1 %5017  ;;  %v7318_v27 = vld [vmem:[%s7571_s16 + $0xb8] sm:$0xff] }
 0x728   : > { %v5089_v43 = vmul.f32 %v7303_v21, %v5018_v51  ;;  %v5090_v46 = vmul.f32 %v7304_v39, %v5018_v51 }
 0x729   : > { %v5203_v15 = vadd.f32 %v5135_v50, %v5091_v25  ;;  %v5204_v24 = vadd.f32 %v5135_v50, %v5092_v33  ;;  %v7315_v50 = vld [vmem:[%s7571_s16 + $0x80] sm:$0xff] }
 0x72a   : > { %v5201_v8 = vadd.f32 %v5130_v54, %v5089_v43  ;;  %v5202_v40 = vadd.f32 %v5130_v54, %v5090_v46  ;;  %v7319_v43 = vld [vmem:[%s7571_s16 + $0xa0] sm:$0xff]  ;;  %v7320_v46 = vld [vmem:[%s7571_s16 + $0xa8] sm:$0xff] }
 0x72b   : > { %v5033_v10 = vpop.permute.xlu0 %5032  ;;  %5235 = vst [vmem:[%s9695_s14 + $0x30] sm:$0xff] %v5203_v15  ;;  %5236 = vst [vmem:[%s9695_s14 + $0x38] sm:$0xff] %v5204_v24 }
 0x72c   : > { %v5095_v18 = vmul.f32 %v7305_v23, %v5033_v10  ;;  %v5096_v12 = vmul.f32 %v7306_v34, %v5033_v10  ;;  %v5028_v7 = vpop.permute.xlu1 %5027  ;;  %5233 = vst [vmem:[%s9695_s14 + $0x20] sm:$0xff] %v5201_v8  ;;  %5234 = vst [vmem:[%s9695_s14 + $0x28] sm:$0xff] %v5202_v40  ;;  %v7321_v8 = vld [vmem:[%s7571_s16 + $0xd0] sm:$0xff]  ;;  %v7322_v40 = vld [vmem:[%s7571_s16 + $0xd8] sm:$0xff] }
 0x72d   : > { %v5093_v63 = vmul.f32 %v7307_v36, %v5028_v7  ;;  %v5094_v59 = vmul.f32 %v7308_v3, %v5028_v7  ;;  %v7323_v7 = vld [vmem:[%s7571_s16 + $0xc0] sm:$0xff] }
 0x72e   : > { %v5207_v52 = vadd.f32 %v5145_v55, %v5095_v18  ;;  %v5208_v35 = vadd.f32 %v5145_v55, %v5096_v12  ;;  %v7316_v55 = vld [vmem:[%s7571_s16 + $0x88] sm:$0xff] }
 0x72f   : > { %v5205_v9 = vadd.f32 %v5140_v45, %v5093_v63  ;;  %v5206_v13 = vadd.f32 %v5140_v45, %v5094_v59  ;;  %v5043_v0 = vpop.permute.xlu0 %5042  ;;  %v7324_v63 = vld [vmem:[%s7571_s16 + $0xc8] sm:$0xff] }
 0x730   : > { %5239 = vst [vmem:[%s9695_s14 + $0x50] sm:$0xff] %v5207_v52  ;;  %5240 = vst [vmem:[%s9695_s14 + $0x58] sm:$0xff] %v5208_v35  ;;  %v5099_v42 = vmul.f32 %v7309_v20, %v5043_v0  ;;  %v5100_v38 = vmul.f32 %v7310_v11, %v5043_v0  ;;  %v5038_v26 = vpop.permute.xlu1 %5037  ;;  %v7325_v35 = vld [vmem:[%s7571_s16] sm:$0xff] }
 0x731   : > { %5237 = vst [vmem:[%s9695_s14 + $0x40] sm:$0xff] %v5205_v9  ;;  %5238 = vst [vmem:[%s9695_s14 + $0x48] sm:$0xff] %v5206_v13  ;;  %v5097_v29 = vmul.f32 %v7311_v56, %v5038_v26  ;;  %v5098_v32 = vmul.f32 %v7312_v1, %v5038_v26  ;;  %v7326_v13 = vld [vmem:[%s7571_s16 + $0x8] sm:$0xff] }
 0x732   : > { %v5211_v47 = vadd.f32 %v5155_v44, %v5099_v42  ;;  %v5212_v22 = vadd.f32 %v5155_v44, %v5100_v38  ;;  %v7327_v42 = vld [vmem:[%s7571_s16 + $0xf0] sm:$0xff]  ;;  %v7328_v38 = vld [vmem:[%s7571_s16 + $0xf8] sm:$0xff] }
 0x733   : > { %v5209_v4 = vadd.f32 %v5150_v62, %v5097_v29  ;;  %v5210_v60 = vadd.f32 %v5150_v62, %v5098_v32  ;;  %v5053_v5 = vpop.permute.xlu0 %5052  ;;  %v7317_v62 = vld [vmem:[%s7571_s16 + $0xb0] sm:$0xff] }
 0x734   : > { %5243 = vst [vmem:[%s9695_s14 + $0x70] sm:$0xff] %v5211_v47  ;;  %5244 = vst [vmem:[%s9695_s14 + $0x78] sm:$0xff] %v5212_v22  ;;  %v5103_v6 = vmul.f32 %v7313_v49, %v5053_v5  ;;  %v5104_v31 = vmul.f32 %v7314_v2, %v5053_v5  ;;  %v7329_v22 = vld [vmem:[%s7571_s16 + $0x10] sm:$0xff] }
 0x735   : > { %5241 = vst [vmem:[%s9695_s14 + $0x60] sm:$0xff] %v5209_v4  ;;  %5242 = vst [vmem:[%s9695_s14 + $0x68] sm:$0xff] %v5210_v60  ;;  %v7330_v60 = vld [vmem:[%s7571_s16 + $0x18] sm:$0xff] }
 0x736   : > { %v5215_v48 = vadd.f32 %v9676_v57, %v5103_v6  ;;  %v5216_v58 = vadd.f32 %v9676_v57, %v5104_v31  ;;  %v5048_v19 = vpop.permute.xlu1 %5047  ;;  %v7332_v6 = vld [vmem:[%s7571_s16 + $0xe8] sm:$0xff] }
 0x737   : > { %v5101_v54 = vmul.f32 %v7315_v50, %v5048_v19  ;;  %v5102_v45 = vmul.f32 %v7316_v55, %v5048_v19  ;;  %v5063_v44 = vpop.permute.xlu0 %5062 }
 0x738   : > { %5247 = vst [vmem:[%s9695_s14 + $0x90] sm:$0xff] %v5215_v48  ;;  %5248 = vst [vmem:[%s9695_s14 + $0x98] sm:$0xff] %v5216_v58  ;;  %v5107_v16 = vmul.f32 %v7317_v62, %v5063_v44  ;;  %v5108_v25 = vmul.f32 %v7318_v27, %v5063_v44 }
 0x739   : > { %v5213_v57 = vadd.f32 %v9678_v28, %v5101_v54  ;;  %v5214_v30 = vadd.f32 %v9678_v28, %v5102_v45 }
 0x73a   : > { %v5219_v33 = vadd.f32 %v9680_v17, %v5107_v16  ;;  %v5220_v51 = vadd.f32 %v9680_v17, %v5108_v25  ;;  %v5058_v21 = vpop.permute.xlu1 %5057 }
 0x73b   : > { %5245 = vst [vmem:[%s9695_s14 + $0x80] sm:$0xff] %v5213_v57  ;;  %5246 = vst [vmem:[%s9695_s14 + $0x88] sm:$0xff] %v5214_v30  ;;  %v5105_v39 = vmul.f32 %v7319_v43, %v5058_v21  ;;  %v5106_v15 = vmul.f32 %v7320_v46, %v5058_v21  ;;  %v5073_v24 = vpop.permute.xlu0 %5072 }
 0x73c   : > { %5251 = vst [vmem:[%s9695_s14 + $0xb0] sm:$0xff] %v5219_v33  ;;  %5252 = vst [vmem:[%s9695_s14 + $0xb8] sm:$0xff] %v5220_v51  ;;  %v5111_v28 = vmul.f32 %v7321_v8, %v5073_v24  ;;  %v5112_v17 = vmul.f32 %v7322_v40, %v5073_v24 }
 0x73d   : > { %v5217_v10 = vadd.f32 %v9682_v61, %v5105_v39  ;;  %v5218_v23 = vadd.f32 %v9682_v61, %v5106_v15 }
 0x73e   : > { %v5223_v18 = vadd.f32 %v9684_v41, %v5111_v28  ;;  %v5224_v34 = vadd.f32 %v9684_v41, %v5112_v17  ;;  %v5068_v12 = vpop.permute.xlu1 %5067 }
 0x73f   : > { %5249 = vst [vmem:[%s9695_s14 + $0xa0] sm:$0xff] %v5217_v10  ;;  %5250 = vst [vmem:[%s9695_s14 + $0xa8] sm:$0xff] %v5218_v23  ;;  %v5109_v36 = vmul.f32 %v7323_v7, %v5068_v12  ;;  %v5110_v3 = vmul.f32 %v7324_v63, %v5068_v12  ;;  %v5083_v59 = vpop.permute.xlu0 %5082 }
 0x740   : > { %5255 = vst [vmem:[%s9695_s14 + $0xd0] sm:$0xff] %v5223_v18  ;;  %5256 = vst [vmem:[%s9695_s14 + $0xd8] sm:$0xff] %v5224_v34  ;;  %v5115_v11 = vmul.f32 %v7327_v42, %v5083_v59  ;;  %v5116_v26 = vmul.f32 %v7328_v38, %v5083_v59 }
 0x741   : > { %v5221_v61 = vadd.f32 %v9687_v37, %v5109_v36  ;;  %v5222_v52 = vadd.f32 %v9687_v37, %v5110_v3 }
 0x743   : > { %5253 = vst [vmem:[%s9695_s14 + $0xc0] sm:$0xff] %v5221_v61  ;;  %5254 = vst [vmem:[%s9695_s14 + $0xc8] sm:$0xff] %v5222_v52  ;;  %v5008_v41 = vpop.permute.xlu0 %5007 }
 0x744   : > { %v5085_v9 = vmul.f32 %v7325_v35, %v5008_v41  ;;  %v5086_v0 = vmul.f32 %v7326_v13, %v5008_v41 }
 0x745   : > { %v5078_v20 = vpop.permute.xlu1 %5077 }
 0x746   : > { %v5197_v37 = vadd.f32 %v9674_v14, %v5085_v9  ;;  %v5198_v56 = vadd.f32 %v9674_v14, %v5086_v0  ;;  %v7331_v14 = vld [vmem:[%s7571_s16 + $0xe0] sm:$0xff]  ;;  %v5114_v2 = vmul.f32 %v7332_v6, %v5078_v20  ;;  %s7361_s16 = scalar_lea.vmem %s9776_s22, 4096 }
 0x747   : > { %v5195_v29 = vpop.permute.xlu0 %5194  ;;  %v5113_v49 = vmul.f32 %v7331_v14, %v5078_v20  ;;  %p7362_p6 = scmp.ne.s32.totalorder %s9776_s22, %s7361_s16  ;;  %p7369_p3 = scmp.lt.s32.totalorder %s7367_s15, %s7361_s16 }
 0x748   : > { %5229 = vst [vmem:[%s9695_s14] sm:$0xff] %v5197_v37  ;;  %5230 = vst [vmem:[%s9695_s14 + $0x8] sm:$0xff] %v5198_v56  ;;  %v5227_v1 = vadd.f32 %v5195_v29, %v5115_v11  ;;  %v5228_v32 = vadd.f32 %v5195_v29, %v5116_v26 }
 0x749   : > { %v5013_v47 = vpop.permute.xlu1 %5012  ;;  %p7363_p10 = pnand %p7362_p6, %p10418_p9  ;;  %p7370_p4 = por %p7369_p3, %p7368_p2 }
 0x74a   : > { %v5087_v4 = vmul.f32 %v7329_v22, %v5013_v47  ;;  %v5088_v5 = vmul.f32 %v7330_v60, %v5013_v47  ;;  %5259 = vst [vmem:[%s9695_s14 + $0xf0] sm:$0xff] %v5227_v1  ;;  %5260 = vst [vmem:[%s9695_s14 + $0xf8] sm:$0xff] %v5228_v32 }
 0x74b   : > { %p7364_p12 = pneg %p7363_p10 }
 0x74c   : > { %v5199_v31 = vadd.f32 %v9672_v53, %v5087_v4  ;;  %v5200_v48 = vadd.f32 %v9672_v53, %v5088_v5 }
 0x74d   : > { %v5190_v58 = vpop.permute.xlu1 %5189  ;;  %p7371_p7 = pnand %p7370_p4, %p7364_p12 }
 0x74e   : > { %5231 = vst [vmem:[%s9695_s14 + $0x10] sm:$0xff] %v5199_v31  ;;  %5232 = vst [vmem:[%s9695_s14 + $0x18] sm:$0xff] %v5200_v48  ;;  %v5225_v19 = vadd.f32 %v5190_v58, %v5113_v49  ;;  %v5226_v50 = vadd.f32 %v5190_v58, %v5114_v2 }
 0x750   : > { %5257 = vst [vmem:[%s9695_s14 + $0xe0] sm:$0xff] %v5225_v19  ;;  %5258 = vst [vmem:[%s9695_s14 + $0xe8] sm:$0xff] %v5226_v50 }
 0x751   : > { %7374 = shalt.err (!%p7371_p7)
}
 0x752   : > { %s7375_s17 = scalar_lea.hbm %s9774_s30, 4096  ;;  %s7379_s25 = scalar_lea.hbm %s9832_s7, 8192 }
 0x753   : > { %p7376_p8 = scmp.ne.s32.totalorder %s9774_s30, %s7375_s17  ;;  %p7380_p1 = scmp.lt.u32.totalorder %s9774_s30, %s9832_s7 }
 0x754   : > { %p7381_p0 = scmp.lt.u32.totalorder %s7379_s25, %s7375_s17  ;;  %p7383_p6 = scmp.lt.u32.totalorder %s7375_s17, %s9774_s30 }
 0x755   : > { %p7377_p11 = pnand %p7376_p8, %p10418_p9 }
 0x756   : > { %p7382_p5 = por %p7381_p0, %p7380_p1 }
 0x757   : > { %p7378_p13 = pneg %p7377_p11 }
 0x758   : > { %p7384_p10 = por %p7383_p6, %p7382_p5 }
 0x75a   : > { %p7385_p12 = pnand %p7384_p10, %p7378_p13 }
 0x75c   : > { %7388 = shalt.err (!%p7385_p12)
}
 0x75d   : > { %s7437_s21 = smov 256   ;;  %s7438_s23 = smov 16  }
 0x75e   : > { %7171 = dma.vmem_to_hbm [thread:$0]  (%p10418_p9), %s9776_s22, 4096, %s9774_s30, %s9784_s2, %s7437_s21, %s7437_s21, %s7438_s23  }
 0x75f PF: > { %p7183_p2 = scmp.ge.s32.totalorder %s7427_s29, 2  ;;  %s5290_s24 = sand.u32 1, %s7415_s26  }
 0x760   : > { %p10419_p3 = scmp.ne.s32.totalorder %s10050_s13, 0  ;;  %s5291_s16 = scalar_lea.sflag [#allocation5], %s5290_s24 }
 0x762   : > { %p7178_p4 = pnand %p7183_p2, %p10419_p3 }
 0x764   : > { %7410 = dma.done.wait (!%p7178_p4), %s5291_s16, 4096  }
 0x765   : > { %7412 = vsyncadd (!%p7178_p4), %s5291_s16, 4294963200  ;;  %p20_p7 = scmp.ge.s32.totalorder %s7507_s8, 4   ;;  %s10420_s26 = smov %s7419_s27 }
 0x766   : > { %s10421_s27 = smov %s7423_s28  ;;  %s10422_s28 = smov %s7518_s11 }
 0x767   : > { %s10423_s29 = smov %s7507_s8  ;;  %22 = sbr.rel (!%p20_p7) target bundleno = 7 (0x7), region = 89 }
 0x76e   :  { %5296 = vsyncpa [#allocation4], 1 }
 0x76f   :  { %5298 = vsyncpa [#allocation4 + $0x1], 1 }
 0x770   :  { %5299 = vsyncpa [#allocation5], 1 }
 0x771   :  { %5301 = vsyncpa [#allocation5 + $0x1], 1 }

</bundles_post_ra>
